<compile_context>
chip_gen: v7x
topology: tpu7x:2x2x1
jax: 0.10.0
libtpu: 0.0.40
codegen_flags: <defaults>
</compile_context>

<pallas_src>
import jax
import jax.numpy as jnp
from jax import lax
from jax.experimental import pallas as pl
from jax.experimental.pallas import tpu as pltpu

C_IN = 726
C_OUT = 2904
H = W = 14
HW = H * W


def _default_tile():
    """Channel tile: 2 pipelined grid steps per TensorCore on 2-TC chips (v7x),
    exact-divisor 3-step grid on single-TC chips (v5e/v6e)."""
    try:
        kind = jax.devices()[0].device_kind.lower()
    except Exception:
        kind = ""
    if "v7" in kind or "7x" in kind:
        return 728   # cdiv(2904, 728) = 4 -> 2 steps per core on a 2-core chip
    return 968       # 2904 / 968 = 3 exactly -> no ragged tile, 1-TC chips


def _se_gate_kernel_float(s_ref, w_ref, x_ref, o_ref):
    # s_ref: [1, C_IN+1] f32   raw squeeze vector with a trailing 1.0 (bias column)
    # w_ref: [TC, C_IN+1] f32/bf16  weight tile with bias folded in as last column
    # x_ref: [TC, HW] f32      tile of the feature map to be gated
    # o_ref: [TC, HW] f32
    s = jnp.maximum(s_ref[...], 0.0).astype(w_ref.dtype)   # ReLU; relu(1.0)=1.0 keeps bias col
    g = lax.dot_general(
        w_ref[...], s,
        dimension_numbers=(((1,), (1,)), ((), ())),
        preferred_element_type=jnp.float32,
    )                                                       # [TC, 1] f32 (W@relu(s) + b)
    g = jax.nn.sigmoid(g)
    o_ref[...] = (x_ref[...] * g).astype(o_ref.dtype)       # broadcast over lanes


def _se_gate_kernel_int8(s_ref, w_ref, sb_ref, x_ref, o_ref):
    # s_ref : [1, C_IN]  f32   raw squeeze vector
    # w_ref : [TC, C_IN] int8  per-output-channel quantized weight tile
    # sb_ref: [TC, 2]    f32   col 0 = dequant scale, col 1 = bias
    # x_ref : [TC, HW]   f32
    s = jnp.maximum(s_ref[...], 0.0)                        # ReLU
    w = w_ref[...].astype(jnp.float32)                      # in-VMEM dequant (int values exact)
    g = lax.dot_general(
        w, s,
        dimension_numbers=(((1,), (1,)), ((), ())),
        preferred_element_type=jnp.float32,
    )                                                       # [TC, 1]
    sb = sb_ref[...]
    g = jax.nn.sigmoid(g * sb[:, 0:1] + sb[:, 1:2])         # scale BEFORE bias + sigmoid
    o_ref[...] = (x_ref[...] * g).astype(o_ref.dtype)


def se_gate(x353, x351, weight, bias, *, weight_mode="f32", tc=None):
    """x353: [1, C_IN, 1, 1], x351: [1, C_OUT, H, W],
    weight: [C_OUT, C_IN, 1, 1], bias: [C_OUT]  ->  [1, C_OUT, H, W]

    weight_mode:
      "f32"  (default) exact module numerics.
      "bf16" weight streamed at half the bytes (gate through sigmoid -> benign).
      "int8" per-output-channel quantized weight (~24% fewer bytes than bf16).
    In a real model the weight prep below happens once offline, not per call.
    """
    if tc is None:
        tc = _default_tile()
    grid = (pl.cdiv(C_OUT, tc),)

    s2d = x353.reshape(1, C_IN).astype(jnp.float32)                 # [1, 726]
    w2d = weight.reshape(C_OUT, C_IN).astype(jnp.float32)           # [2904, 726]
    b2d = bias.reshape(C_OUT, 1).astype(jnp.float32)                # [2904, 1]
    x2d = x351.reshape(C_OUT, HW)                                   # [2904, 196]
    out_dtype = x351.dtype

    if weight_mode in ("f32", "bf16"):
        wdt = jnp.float32 if weight_mode == "f32" else jnp.bfloat16
        s_in = jnp.concatenate([s2d, jnp.ones((1, 1), jnp.float32)], axis=1)  # [1, 727]
        w_in = jnp.concatenate([w2d, b2d], axis=1).astype(wdt)                # [2904, 727]
        kernel = _se_gate_kernel_float
        operands = (s_in, w_in, x2d)
        in_specs = [
            pl.BlockSpec((1, C_IN + 1), lambda i: (0, 0)),     # squeeze vector (+1.0)
            pl.BlockSpec((tc, C_IN + 1), lambda i: (i, 0)),    # weight tile (+bias col)
            pl.BlockSpec((tc, HW), lambda i: (i, 0)),          # feature tile
        ]
    elif weight_mode == "int8":
        amax = jnp.max(jnp.abs(w2d), axis=1, keepdims=True)
        scale = jnp.maximum(amax, 1e-30) / 127.0                               # [2904, 1]
        w8 = jnp.clip(jnp.round(w2d / scale), -127, 127).astype(jnp.int8)      # [2904, 726]
        sb = jnp.concatenate([scale, b2d], axis=1).astype(jnp.float32)         # [2904, 2]
        kernel = _se_gate_kernel_int8
        operands = (s2d, w8, sb, x2d)
        in_specs = [
            pl.BlockSpec((1, C_IN), lambda i: (0, 0)),         # squeeze vector
            pl.BlockSpec((tc, C_IN), lambda i: (i, 0)),        # int8 weight tile
            pl.BlockSpec((tc, 2), lambda i: (i, 0)),           # (scale, bias) sidecar
            pl.BlockSpec((tc, HW), lambda i: (i, 0)),          # feature tile
        ]
    else:
        raise ValueError(f"unknown weight_mode: {weight_mode!r}")

    bytes_accessed = int(
        sum(a.size * a.dtype.itemsize for a in operands)
        + C_OUT * HW * jnp.dtype(out_dtype).itemsize            # output write
    )

    out2d = pl.pallas_call(
        kernel,
        out_shape=jax.ShapeDtypeStruct((C_OUT, HW), out_dtype),
        grid_spec=pltpu.PrefetchScalarGridSpec(
            num_scalar_prefetch=0,
            grid=grid,
            in_specs=in_specs,
            out_specs=pl.BlockSpec((tc, HW), lambda i: (i, 0)),
        ),
        compiler_params=pltpu.CompilerParams(
            dimension_semantics=("parallel",),                   # shard steps across TCs
            vmem_limit_bytes=32 * 1024 * 1024,
        ),
        cost_estimate=pl.CostEstimate(
            flops=2 * C_OUT * (C_IN + 1) + 2 * C_OUT * HW,
            transcendentals=C_OUT,
            bytes_accessed=bytes_accessed,
        ),
    )(*operands)

    return out2d.reshape(1, C_OUT, H, W)


def reference(x353, x351, weight, bias):
    s = jnp.maximum(x353.reshape(1, C_IN), 0.0)
    g = s @ weight.reshape(C_OUT, C_IN).T + bias[None, :]
    g = jax.nn.sigmoid(g).reshape(1, C_OUT, 1, 1)
    return g * x351


if __name__ == "__main__":
    key = jax.random.PRNGKey(0)
    k1, k2, k3, k4 = jax.random.split(key, 4)

    # Inputs with the shapes the PyTorch module's forward implies.
    x353 = jax.random.normal(k1, (1, C_IN, 1, 1), dtype=jnp.float32)
    x351 = jax.random.normal(k2, (1, C_OUT, H, W), dtype=jnp.float32)

    # Deterministic parameter init matching Conv2d(726, 2904, 1) shapes,
    # roughly PyTorch's default uniform(+/- 1/sqrt(fan_in)) scaling.
    bound = 1.0 / jnp.sqrt(jnp.float32(C_IN))
    weight = jax.random.uniform(k3, (C_OUT, C_IN, 1, 1),
                                minval=-bound, maxval=bound, dtype=jnp.float32)
    bias = jax.random.uniform(k4, (C_OUT,),
                              minval=-bound, maxval=bound, dtype=jnp.float32)

    ref = jax.block_until_ready(reference(x353, x351, weight, bias))

    # Default: exact f32 weight path (matches module numerics).
    out_f32 = jax.block_until_ready(se_gate(x353, x351, weight, bias))
    assert out_f32.shape == (1, C_OUT, H, W)
    assert jnp.allclose(out_f32, ref, atol=1e-5, rtol=1e-5)

    # Opt-in fast path: bf16 weight stream (~35% fewer HBM bytes).
    out_bf16 = jax.block_until_ready(
        se_gate(x353, x351, weight, bias, weight_mode="bf16"))
    assert out_bf16.shape == (1, C_OUT, H, W)
    assert jnp.allclose(out_bf16, ref, atol=1e-2, rtol=1e-2)

    # Opt-in fastest path: int8 weight stream with per-channel dequant scale.
    out_i8 = jax.block_until_ready(
        se_gate(x353, x351, weight, bias, weight_mode="int8"))
    assert out_i8.shape == (1, C_OUT, H, W)
    assert jnp.allclose(out_i8, ref, atol=5e-2, rtol=5e-2)

    print("KERNEL_OK")
</pallas_src>

<mosaic_0001>
module attributes {stable_mosaic.version = 11 : i64} {
  func.func @_se_gate_kernel_float(%arg0: i32, %arg1: memref<1x727xf32, #tpu.memory_space<vmem>>, %arg2: memref<968x727xf32, #tpu.memory_space<vmem>>, %arg3: memref<968x196xf32, #tpu.memory_space<vmem>>, %arg4: memref<968x196xf32, #tpu.memory_space<vmem>>) attributes {dimension_semantics = [#tpu.dimension_semantics<parallel>], iteration_bounds = array<i64: 3>, scalar_prefetch = 0 : i64, scratch_operands = 0 : i64, tpu.core_type = #tpu.core_type<tc>, window_params = [{pipeline_mode = #tpu.pipeline_mode<synchronous>, transform_indices = @transform_0, window_bounds = array<i64: 1, 727>}, {transform_indices = @transform_1, window_bounds = array<i64: 968, 727>}, {transform_indices = @transform_2, window_bounds = array<i64: 968, 196>}, {transform_indices = @transform_3, window_bounds = array<i64: 968, 196>}]} {
    %c0 = arith.constant 0 : index
    %c0_0 = arith.constant 0 : index
    %0 = vector.load %arg1[%c0, %c0_0] : memref<1x727xf32, #tpu.memory_space<vmem>>, vector<1x727xf32>
    %cst = arith.constant 0.000000e+00 : f32
    %1 = vector.broadcast %cst : f32 to vector<1x727xf32>
    %2 = arith.maximumf %0, %1 : vector<1x727xf32>
    %c0_1 = arith.constant 0 : index
    %c0_2 = arith.constant 0 : index
    %3 = vector.load %arg2[%c0_1, %c0_2] : memref<968x727xf32, #tpu.memory_space<vmem>>, vector<968x727xf32>
    %cst_3 = arith.constant dense<0.000000e+00> : vector<968x1xf32>
    %4 = tpu.matmul %3, %2, %cst_3 {dimension_numbers = #tpu.dot_dimension_numbers<[1], [1], [0], [0], [0, 0, 1, 0], [], []>} : vector<968x727xf32>, vector<1x727xf32>, vector<968x1xf32> -> vector<968x1xf32>
    %5 = arith.negf %4 : vector<968x1xf32>
    %6 = math.exp %5 : vector<968x1xf32>
    %cst_4 = arith.constant 1.000000e+00 : f32
    %7 = vector.broadcast %cst_4 : f32 to vector<968x1xf32>
    %8 = arith.addf %7, %6 : vector<968x1xf32>
    %9 = arith.divf %7, %8 : vector<968x1xf32>
    %c0_5 = arith.constant 0 : index
    %c0_6 = arith.constant 0 : index
    %10 = vector.load %arg3[%c0_5, %c0_6] : memref<968x196xf32, #tpu.memory_space<vmem>>, vector<968x196xf32>
    %11 = vector.broadcast %9 : vector<968x1xf32> to vector<968x196xf32>
    %12 = arith.mulf %10, %11 : vector<968x196xf32>
    %c0_7 = arith.constant 0 : index
    %c0_8 = arith.constant 0 : index
    %13 = vector.load %arg4[%c0_7, %c0_8] : memref<968x196xf32, #tpu.memory_space<vmem>>, vector<968x196xf32>
    tpu.vector_store %arg4[%c0_7, %c0_8], %12 {strides = array<i32>} : memref<968x196xf32, #tpu.memory_space<vmem>>, vector<968x196xf32>,
    return
  }
  func.func @transform_0(%arg0: i32) -> (i32, i32) {
    %c0_i32 = arith.constant 0 : i32
    %c0_i32_0 = arith.constant 0 : i32
    %c0_i32_1 = arith.constant 0 : i32
    return %c0_i32, %c0_i32_0 : i32, i32
  }
  func.func @transform_1(%arg0: i32) -> (i32, i32) {
    %c0_i32 = arith.constant 0 : i32
    %c0_i32_0 = arith.constant 0 : i32
    return %arg0, %c0_i32 : i32, i32
  }
  func.func @transform_2(%arg0: i32) -> (i32, i32) {
    %c0_i32 = arith.constant 0 : i32
    %c0_i32_0 = arith.constant 0 : i32
    return %arg0, %c0_i32 : i32, i32
  }
  func.func @transform_3(%arg0: i32) -> (i32, i32) {
    %c0_i32 = arith.constant 0 : i32
    %c0_i32_0 = arith.constant 0 : i32
    return %arg0, %c0_i32 : i32, i32
  }
}

</mosaic_0001>

<bundles_post_ra>
// kernel: tpu_custom_call.1
= control target key start
LH: loop header
LB: loop body
LE: loop exit
PB: predicated region body
PF: predicated region fallthrough
CT: control target
= control target key end

     0   :  { %s4837_s12 = smov 0   ;;  %s7364_s0 = inlined_call_operand.vmem [shape: f32[1,727], index: 0, kind: input, shape index: {}]   ;;  %s7365_s1 = inlined_call_operand.vmem [shape: f32[2904,727], index: 1, kind: input, shape index: {}]   ;;  %s7366_s2 = inlined_call_operand.vmem [shape: f32[2904,196], index: 2, kind: input, shape index: {}]   ;;  %s7367_s3 = inlined_call_operand.vmem [shape: f32[2904,196], index: 3, kind: output, shape index: {}]  }
   0x1 LB: > { %s4181_s13 = sadd.s32 4294967295, %s4815_s12   ;;  %p4185_p0 = scmp.ge.s32.totalorder %s4815_s12, 1  ;;  %s4815_s12 = sphi %s4837_s12, %s13_s12  }
   0x2   : > { %p151_p1 = scmp.lt.s32.totalorder %s4815_s12, 4 }
   0x4   : > { %p152_p2 = pnand %p4185_p0, %p151_p1 }
   0x5   : > { %s183_s14 = smul.u32 (!%p152_p2), 121, %s4181_s13  ;;  %v204_v0 = vld [vmem:[%s7364_s0] sm:$0x3f] (!%p152_p2)  ;;  %v933_v1 = vlaneseq (!%p152_p2)  ;;  %vm1693_vm0 = vcmask (!%p152_p2), 711680   ;;  %vm3869_vm1 = vcmask (!%p152_p2), 556032  }
   0x6   : > { %155 = sbr.rel (%p152_p2) target bundleno = 629 (0x275), region = 32  ;;  %v205_v2 = vmax.f32 (!%p152_p2), %v204_v0, 0.0 }
   0x7   : > { %p184_p3 = scmp.lt.s32.totalorder (!%p152_p2), %s183_s14, 362  ;;  %v934_v3 = vshrl.u32 (!%p152_p2), %v933_v1, 7 }
   0x9   : > { %v935_v4 = vsub.s32 (!%p152_p2), 0, %v934_v3  ;;  %v939_v5 = vsub.s32 (!%p152_p2), 1, %v934_v3  ;;  %v943_v6 = vsub.s32 (!%p152_p2), 2, %v934_v3  ;;  %v947_v7 = vsub.s32 (!%p152_p2), 3, %v934_v3 }
   0xa   : > { %v951_v8 = vsub.s32 (!%p152_p2), 4, %v934_v3  ;;  %v955_v9 = vsub.s32 (!%p152_p2), 5, %v934_v3 }
   0xb   : > { %v4851_v10 = vrot.slane (!%p152_p2), %v205_v2, %v935_v4  ;;  %v4853_v11 = vrot.slane (!%p152_p2), %v205_v2, %v939_v5  ;;  %v4855_v12 = vrot.slane (!%p152_p2), %v205_v2, %v943_v6  ;;  %v4857_v13 = vrot.slane (!%p152_p2), %v205_v2, %v947_v7 }
   0xc   : > { %v4859_v14 = vrot.slane (!%p152_p2), %v205_v2, %v955_v9  ;;  %v4869_v18 = vrot.slane (!%p152_p2), %v205_v2, %v951_v8 }
   0xd   : > { %s7369_s14 = smov (!%p184_p3, %s183_s14), 362 }
   0xe   : > { %s4316_s17 = smul.u32 48, %s7369_s14  ;;  %s4314_s21 = sshll.u32 %s7369_s14, 4 }
   0xf   : > { %s5869_s24 = scalar_lea.vmem %s7366_s2, %s4314_s21  ;;  %s5892_s27 = scalar_lea.vmem %s7367_s3, %s4314_s21 }
  0x10   : > { %s4864_s20 = scalar_lea.vmem %s7365_s1, %s4316_s17 }
  0x11   : > { %v206_v15 = vld [vmem:[%s4864_s20] sm:$0xff]  ;;  %v207_v16 = vld [vmem:[%s4864_s20 + $0x8] sm:$0xff]  ;;  %v208_v17 = vld [vmem:[%s4864_s20 + $0x10] sm:$0xff] }
  0x12   : > { %v209_v19 = vld [vmem:[%s4864_s20 + $0x18] sm:$0xff]  ;;  %v210_v20 = vld [vmem:[%s4864_s20 + $0x20] sm:$0xff]  ;;  %v211_v21 = vld [vmem:[%s4864_s20 + $0x28] sm:$0xff]  ;;  %v963_v22 = vmul.f32 %v4851_v10, %v206_v15  ;;  %v964_v23 = vmul.f32 %v4853_v11, %v207_v16  ;;  %v965_v24 = vmul.f32 %v4855_v12, %v208_v17 }
  0x13   : > { %v966_v25 = vmul.f32 %v4857_v13, %v209_v19  ;;  %v968_v26 = vmul.f32 %v4859_v14, %v211_v21  ;;  %v218_v27 = vld [vmem:[%s4864_s20 + $0x60] sm:$0xff]  ;;  %v219_v28 = vld [vmem:[%s4864_s20 + $0x68] sm:$0xff]  ;;  %v220_v29 = vld [vmem:[%s4864_s20 + $0x70] sm:$0xff]  ;;  %v967_v37 = vmul.f32 %v4869_v18, %v210_v20 }
  0x14   : > { %v1689_v30 = vadd.f32 %v964_v23, %v963_v22  ;;  %v221_v31 = vld [vmem:[%s4864_s20 + $0x78] sm:$0xff]  ;;  %v222_v32 = vld [vmem:[%s4864_s20 + $0x80] sm:$0xff]  ;;  %v223_v33 = vld [vmem:[%s4864_s20 + $0x88] sm:$0xff]  ;;  %v975_v34 = vmul.f32 %v4851_v10, %v218_v27  ;;  %v976_v35 = vmul.f32 %v4853_v11, %v219_v28  ;;  %v977_v36 = vmul.f32 %v4855_v12, %v220_v29 }
  0x15   : > { %v978_v38 = vmul.f32 %v4857_v13, %v221_v31  ;;  %v980_v39 = vmul.f32 %v4859_v14, %v223_v33  ;;  %v212_v40 = vld [vmem:[%s4864_s20 + $0x30] sm:$0xff]  ;;  %v213_v41 = vld [vmem:[%s4864_s20 + $0x38] sm:$0xff]  ;;  %v214_v42 = vld [vmem:[%s4864_s20 + $0x40] sm:$0xff]  ;;  %v1694_v50 = vsel %vm1693_vm0, %v968_v26, 0.0  ;;  %v979_v51 = vmul.f32 %v4869_v18, %v222_v32 }
  0x16   : > { %v1690_v43 = vadd.f32 %v1689_v30, %v965_v24  ;;  %v1706_v44 = vadd.f32 %v976_v35, %v975_v34  ;;  %v215_v45 = vld [vmem:[%s4864_s20 + $0x48] sm:$0xff]  ;;  %v216_v46 = vld [vmem:[%s4864_s20 + $0x50] sm:$0xff]  ;;  %v217_v47 = vld [vmem:[%s4864_s20 + $0x58] sm:$0xff]  ;;  %v969_v48 = vmul.f32 %v4851_v10, %v212_v40  ;;  %v970_v49 = vmul.f32 %v4853_v11, %v213_v41 }
  0x17   : > { %v1710_v52 = vsel %vm1693_vm0, %v980_v39, 0.0  ;;  %v971_v53 = vmul.f32 %v4855_v12, %v214_v42  ;;  %v224_v54 = vld [vmem:[%s4864_s20 + $0x90] sm:$0xff]  ;;  %v225_v55 = vld [vmem:[%s4864_s20 + $0x98] sm:$0xff]  ;;  %v226_v56 = vld [vmem:[%s4864_s20 + $0xa0] sm:$0xff]  ;;  %v972_v59 = vmul.f32 %v4857_v13, %v215_v45  ;;  %v974_v63 = vmul.f32 %v4859_v14, %v217_v47 }
  0x18   : > { %v1691_v57 = vadd.f32 %v1690_v43, %v966_v25  ;;  %v1707_v58 = vadd.f32 %v1706_v44, %v977_v36  ;;  %v1698_v60 = vadd.f32 %v970_v49, %v969_v48  ;;  %v227_v61 = vld [vmem:[%s4864_s20 + $0xa8] sm:$0xff]  ;;  %v229_v62 = vld [vmem:[%s4864_s20 + $0xb8] sm:$0xff]  ;;  %v981_v0 = vmul.f32 %v4851_v10, %v224_v54  ;;  %v230_v3 = vld [vmem:[%s4864_s20 + $0xc0] sm:$0xff] }
  0x19   : > { %v982_v1 = vmul.f32 %v4853_v11, %v225_v55  ;;  %v983_v2 = vmul.f32 %v4855_v12, %v226_v56  ;;  %v231_v4 = vld [vmem:[%s4864_s20 + $0xc8] sm:$0xff]  ;;  %v973_v7 = vmul.f32 %v4869_v18, %v216_v46  ;;  %v228_v9 = vld [vmem:[%s4864_s20 + $0xb0] sm:$0xff]  ;;  %v984_v16 = vmul.f32 %v4857_v13, %v227_v61  ;;  %v233_v20 = vld [vmem:[%s4864_s20 + $0xd8] sm:$0xff] }
  0x1a   : > { %v1692_v5 = vadd.f32 %v1691_v57, %v967_v37  ;;  %v1708_v6 = vadd.f32 %v1707_v58, %v978_v38  ;;  %v1699_v8 = vadd.f32 %v1698_v60, %v971_v53  ;;  %v232_v15 = vld [vmem:[%s4864_s20 + $0xd0] sm:$0xff]  ;;  %v986_v17 = vmul.f32 %v4859_v14, %v229_v62  ;;  %v235_v21 = vld [vmem:[%s4864_s20 + $0xe8] sm:$0xff]  ;;  %v237_v28 = vld [vmem:[%s4864_s20 + $0xf8] sm:$0xff] }
  0x1b   : > { %v1714_v19 = vadd.f32 %v982_v1, %v981_v0  ;;  %v987_v22 = vmul.f32 %v4851_v10, %v230_v3  ;;  %v988_v26 = vmul.f32 %v4853_v11, %v231_v4  ;;  %v236_v27 = vld [vmem:[%s4864_s20 + $0xf0] sm:$0xff]  ;;  %v1702_v29 = vsel %vm1693_vm0, %v974_v63, 0.0  ;;  %v234_v32 = vld [vmem:[%s4864_s20 + $0xe0] sm:$0xff]  ;;  %v239_v39 = vld [vmem:[%s4864_s20 + $0x108] sm:$0xff] }
  0x1c   : > { %v1695_v23 = vadd.f32 %v1694_v50, %v1692_v5  ;;  %v1709_v24 = vadd.f32 %v1708_v6, %v979_v51  ;;  %v1700_v25 = vadd.f32 %v1699_v8, %v972_v59  ;;  %v985_v30 = vmul.f32 %v4869_v18, %v228_v9  ;;  %v238_v34 = vld [vmem:[%s4864_s20 + $0x100] sm:$0xff]  ;;  %v241_v40 = vld [vmem:[%s4864_s20 + $0x118] sm:$0xff]  ;;  %v243_v46 = vld [vmem:[%s4864_s20 + $0x128] sm:$0xff] }
  0x1d   : > { %v1715_v31 = vadd.f32 %v1714_v19, %v983_v2  ;;  %v989_v33 = vmul.f32 %v4855_v12, %v232_v15  ;;  %v990_v37 = vmul.f32 %v4857_v13, %v233_v20  ;;  %v992_v38 = vmul.f32 %v4859_v14, %v235_v21  ;;  %v242_v45 = vld [vmem:[%s4864_s20 + $0x120] sm:$0xff]  ;;  %v244_v47 = vld [vmem:[%s4864_s20 + $0x130] sm:$0xff]  ;;  %v245_v57 = vld [vmem:[%s4864_s20 + $0x138] sm:$0xff] }
  0x1e   : > { %1696 = vadd.xlane.f32.xlu0 %v1695_v23  ;;  %v1711_v35 = vadd.f32 %v1710_v52, %v1709_v24  ;;  %v1701_v36 = vadd.f32 %v1700_v25, %v973_v7  ;;  %v1722_v42 = vadd.f32 %v988_v26, %v987_v22  ;;  %v993_v43 = vmul.f32 %v4851_v10, %v236_v27  ;;  %v240_v51 = vld [vmem:[%s4864_s20 + $0x110] sm:$0xff]  ;;  %v247_v58 = vld [vmem:[%s4864_s20 + $0x148] sm:$0xff]  ;;  %v249_v0 = vld [vmem:[%s4864_s20 + $0x158] sm:$0xff] }
  0x1f   : > { %v1716_v41 = vadd.f32 %v1715_v31, %v984_v16  ;;  %v994_v44 = vmul.f32 %v4853_v11, %v237_v28  ;;  %v1718_v49 = vsel %vm1693_vm0, %v986_v17, 0.0  ;;  %v991_v50 = vmul.f32 %v4869_v18, %v234_v32  ;;  %v248_v63 = vld [vmem:[%s4864_s20 + $0x150] sm:$0xff]  ;;  %v250_v1 = vld [vmem:[%s4864_s20 + $0x160] sm:$0xff]  ;;  %v251_v16 = vld [vmem:[%s4864_s20 + $0x168] sm:$0xff] }
  0x20   : > { %1712 = vadd.xlane.f32.xlu1 %v1711_v35  ;;  %v1703_v48 = vadd.f32 %v1702_v29, %v1701_v36  ;;  %v995_v52 = vmul.f32 %v4855_v12, %v238_v34  ;;  %v1723_v54 = vadd.f32 %v1722_v42, %v989_v33  ;;  %v996_v55 = vmul.f32 %v4857_v13, %v239_v39  ;;  %v246_v6 = vld [vmem:[%s4864_s20 + $0x140] sm:$0xff]  ;;  %v253_v17 = vld [vmem:[%s4864_s20 + $0x178] sm:$0xff]  ;;  %v255_v24 = vld [vmem:[%s4864_s20 + $0x188] sm:$0xff] }
  0x21   : > { %v1717_v53 = vadd.f32 %v1716_v41, %v985_v30  ;;  %v998_v56 = vmul.f32 %v4859_v14, %v241_v40  ;;  %v1730_v59 = vadd.f32 %v994_v44, %v993_v43  ;;  %v999_v60 = vmul.f32 %v4851_v10, %v242_v45  ;;  %v254_v23 = vld [vmem:[%s4864_s20 + $0x180] sm:$0xff]  ;;  %v252_v29 = vld [vmem:[%s4864_s20 + $0x170] sm:$0xff]  ;;  %v257_v35 = vld [vmem:[%s4864_s20 + $0x198] sm:$0xff] }
  0x22   : > { %1704 = vadd.xlane.f32.xlu0 %v1703_v48  ;;  %v1000_v61 = vmul.f32 %v4853_v11, %v243_v46  ;;  %v1001_v62 = vmul.f32 %v4855_v12, %v244_v47  ;;  %v1724_v3 = vadd.f32 %v1723_v54, %v990_v37  ;;  %v1726_v4 = vsel %vm1693_vm0, %v992_v38, 0.0  ;;  %v256_v30 = vld [vmem:[%s4864_s20 + $0x190] sm:$0xff]  ;;  %v259_v36 = vld [vmem:[%s4864_s20 + $0x1a8] sm:$0xff]  ;;  %v261_v42 = vld [vmem:[%s4864_s20 + $0x1b8] sm:$0xff] }
  0x23   : > { %v1719_v2 = vadd.f32 %v1718_v49, %v1717_v53  ;;  %v997_v5 = vmul.f32 %v4869_v18, %v240_v51  ;;  %v1731_v7 = vadd.f32 %v1730_v59, %v995_v52  ;;  %v1002_v8 = vmul.f32 %v4857_v13, %v245_v57  ;;  %v260_v41 = vld [vmem:[%s4864_s20 + $0x1b0] sm:$0xff]  ;;  %v258_v46 = vld [vmem:[%s4864_s20 + $0x1a0] sm:$0xff]  ;;  %v263_v53 = vld [vmem:[%s4864_s20 + $0x1c8] sm:$0xff] }
  0x24   : > { %v1004_v9 = vmul.f32 %v4859_v14, %v247_v58  ;;  %v1738_v15 = vadd.f32 %v1000_v61, %v999_v60  ;;  %v1725_v19 = vadd.f32 %v1724_v3, %v991_v50  ;;  %v1005_v20 = vmul.f32 %v4851_v10, %v248_v63  ;;  %v262_v48 = vld [vmem:[%s4864_s20 + $0x1c0] sm:$0xff]  ;;  %v265_v54 = vld [vmem:[%s4864_s20 + $0x1d8] sm:$0xff]  ;;  %v267_v60 = vld [vmem:[%s4864_s20 + $0x1e8] sm:$0xff] }
  0x25   : > { %1720 = vadd.xlane.f32.xlu1 %v1719_v2  ;;  %v1006_v21 = vmul.f32 %v4853_v11, %v249_v0  ;;  %v1007_v22 = vmul.f32 %v4855_v12, %v250_v1  ;;  %v1732_v25 = vadd.f32 %v1731_v7, %v996_v55  ;;  %v1734_v26 = vsel %vm1693_vm0, %v998_v56, 0.0  ;;  %v266_v59 = vld [vmem:[%s4864_s20 + $0x1e0] sm:$0xff]  ;;  %v268_v61 = vld [vmem:[%s4864_s20 + $0x1f0] sm:$0xff]  ;;  %v269_v7 = vld [vmem:[%s4864_s20 + $0x1f8] sm:$0xff] }
  0x26   : > { %v1003_v27 = vmul.f32 %v4869_v18, %v246_v6  ;;  %v1739_v28 = vadd.f32 %v1738_v15, %v1001_v62  ;;  %v1727_v31 = vadd.f32 %v1726_v4, %v1725_v19  ;;  %v1008_v32 = vmul.f32 %v4857_v13, %v251_v16  ;;  %v264_v1 = vld [vmem:[%s4864_s20 + $0x1d0] sm:$0xff] }
  0x27   : > { %v1010_v33 = vmul.f32 %v4859_v14, %v253_v17  ;;  %v1746_v34 = vadd.f32 %v1006_v21, %v1005_v20  ;;  %v1733_v37 = vadd.f32 %v1732_v25, %v997_v5  ;;  %v1011_v39 = vmul.f32 %v4851_v10, %v254_v23  ;;  %v272_v19 = vld [vmem:[%s4864_s20 + $0x210] sm:$0xff]  ;;  %v273_v20 = vld [vmem:[%s4864_s20 + $0x218] sm:$0xff]  ;;  %v274_v21 = vld [vmem:[%s4864_s20 + $0x220] sm:$0xff] }
  0x28   : > { %v1740_v38 = vadd.f32 %v1739_v28, %v1002_v8  ;;  %v1012_v40 = vmul.f32 %v4853_v11, %v255_v24  ;;  %1728 = vadd.xlane.f32.xlu0 %v1727_v31  ;;  %v1742_v43 = vsel %vm1693_vm0, %v1004_v9, 0.0  ;;  %v1009_v44 = vmul.f32 %v4869_v18, %v252_v29  ;;  %v271_v8 = vld [vmem:[%s4864_s20 + $0x208] sm:$0xff] }
  0x29   : > { %v1747_v45 = vadd.f32 %v1746_v34, %v1007_v22  ;;  %v1013_v47 = vmul.f32 %v4855_v12, %v256_v30  ;;  %v1735_v49 = vadd.f32 %v1734_v26, %v1733_v37  ;;  %v1014_v51 = vmul.f32 %v4857_v13, %v257_v35  ;;  %v270_v26 = vld [vmem:[%s4864_s20 + $0x200] sm:$0xff]  ;;  %v275_v31 = vld [vmem:[%s4864_s20 + $0x228] sm:$0xff] }
  0x2a   : > { %v1741_v50 = vadd.f32 %v1740_v38, %v1003_v27  ;;  %v1016_v52 = vmul.f32 %v4859_v14, %v259_v36  ;;  %v1754_v56 = vadd.f32 %v1012_v40, %v1011_v39  ;;  %v1017_v57 = vmul.f32 %v4851_v10, %v260_v41  ;;  %v278_v37 = vld [vmem:[%s4864_s20 + $0x240] sm:$0xff]  ;;  %v279_v38 = vld [vmem:[%s4864_s20 + $0x248] sm:$0xff] }
  0x2b   : > { %v1748_v55 = vadd.f32 %v1747_v45, %v1008_v32  ;;  %v1018_v58 = vmul.f32 %v4853_v11, %v261_v42  ;;  %1736 = vadd.xlane.f32.xlu1 %v1735_v49  ;;  %v1750_v63 = vsel %vm1693_vm0, %v1010_v33, 0.0  ;;  %v1015_v0 = vmul.f32 %v4869_v18, %v258_v46  ;;  %v277_v32 = vld [vmem:[%s4864_s20 + $0x238] sm:$0xff] }
  0x2c   : > { %v1743_v62 = vadd.f32 %v1742_v43, %v1741_v50  ;;  %v1019_v2 = vmul.f32 %v4855_v12, %v262_v48  ;;  %v1755_v4 = vadd.f32 %v1754_v56, %v1013_v47  ;;  %v1020_v5 = vmul.f32 %v4857_v13, %v263_v53  ;;  %v276_v43 = vld [vmem:[%s4864_s20 + $0x230] sm:$0xff]  ;;  %v281_v49 = vld [vmem:[%s4864_s20 + $0x258] sm:$0xff]  ;;  %v283_v50 = vld [vmem:[%s4864_s20 + $0x268] sm:$0xff] }
  0x2d   : > { %v1749_v3 = vadd.f32 %v1748_v55, %v1009_v44  ;;  %v1022_v6 = vmul.f32 %v4859_v14, %v265_v54  ;;  %v1762_v9 = vadd.f32 %v1018_v58, %v1017_v57  ;;  %v1023_v15 = vmul.f32 %v4851_v10, %v266_v59  ;;  %v280_v44 = vld [vmem:[%s4864_s20 + $0x250] sm:$0xff]  ;;  %v285_v56 = vld [vmem:[%s4864_s20 + $0x278] sm:$0xff] }
  0x2e   : > { %1744 = vadd.xlane.f32.xlu0 %v1743_v62  ;;  %v1024_v16 = vmul.f32 %v4853_v11, %v267_v60  ;;  %v1025_v17 = vmul.f32 %v4855_v12, %v268_v61  ;;  %v1756_v23 = vadd.f32 %v1755_v4, %v1014_v51  ;;  %v1758_v24 = vsel %vm1693_vm0, %v1016_v52, 0.0  ;;  %v284_v55 = vld [vmem:[%s4864_s20 + $0x270] sm:$0xff]  ;;  %v282_v60 = vld [vmem:[%s4864_s20 + $0x260] sm:$0xff]  ;;  %v289_v4 = vld [vmem:[%s4864_s20 + $0x298] sm:$0xff] }
  0x2f   : > { %v1751_v22 = vadd.f32 %v1750_v63, %v1749_v3  ;;  %v1021_v25 = vmul.f32 %v4869_v18, %v264_v1  ;;  %v1763_v27 = vadd.f32 %v1762_v9, %v1019_v2  ;;  %v1026_v28 = vmul.f32 %v4857_v13, %v269_v7  ;;  %v286_v62 = vld [vmem:[%s4864_s20 + $0x280] sm:$0xff]  ;;  %v287_v3 = vld [vmem:[%s4864_s20 + $0x288] sm:$0xff] }
  0x30   : > { %v1028_v29 = vmul.f32 %v4859_v14, %v271_v8  ;;  %v1770_v30 = vadd.f32 %v1024_v16, %v1023_v15  ;;  %v1757_v33 = vadd.f32 %v1756_v23, %v1015_v0  ;;  %v1029_v34 = vmul.f32 %v4851_v10, %v272_v19  ;;  %v290_v9 = vld [vmem:[%s4864_s20 + $0x2a0] sm:$0xff]  ;;  %v291_v15 = vld [vmem:[%s4864_s20 + $0x2a8] sm:$0xff]  ;;  %v292_v16 = vld [vmem:[%s4864_s20 + $0x2b0] sm:$0xff] }
  0x31   : > { %1752 = vadd.xlane.f32.xlu1 %v1751_v22  ;;  %v1030_v35 = vmul.f32 %v4853_v11, %v273_v20  ;;  %v1031_v36 = vmul.f32 %v4855_v12, %v274_v21  ;;  %v1764_v39 = vadd.f32 %v1763_v27, %v1020_v5  ;;  %v1766_v40 = vsel %vm1693_vm0, %v1022_v6, 0.0  ;;  %v288_v21 = vld [vmem:[%s4864_s20 + $0x290] sm:$0xff]  ;;  %v293_v27 = vld [vmem:[%s4864_s20 + $0x2b8] sm:$0xff] }
  0x32   : > { %v1027_v41 = vmul.f32 %v4869_v18, %v270_v26  ;;  %v1771_v42 = vadd.f32 %v1770_v30, %v1025_v17  ;;  %v1759_v45 = vadd.f32 %v1758_v24, %v1757_v33  ;;  %v1032_v46 = vmul.f32 %v4857_v13, %v275_v31  ;;  %v296_v33 = vld [vmem:[%s4864_s20 + $0x2d0] sm:$0xff] }
  0x33   : > { %v1034_v47 = vmul.f32 %v4859_v14, %v277_v32  ;;  %v1778_v48 = vadd.f32 %v1030_v35, %v1029_v34  ;;  %v1765_v51 = vadd.f32 %v1764_v39, %v1021_v25  ;;  %v1035_v53 = vmul.f32 %v4851_v10, %v278_v37  ;;  %v297_v34 = vld [vmem:[%s4864_s20 + $0x2d8] sm:$0xff]  ;;  %v298_v35 = vld [vmem:[%s4864_s20 + $0x2e0] sm:$0xff] }
  0x34   : > { %v1772_v52 = vadd.f32 %v1771_v42, %v1026_v28  ;;  %v1036_v54 = vmul.f32 %v4853_v11, %v279_v38  ;;  %1760 = vadd.xlane.f32.xlu0 %v1759_v45  ;;  %v1774_v57 = vsel %vm1693_vm0, %v1028_v29, 0.0  ;;  %v1033_v58 = vmul.f32 %v4869_v18, %v276_v43  ;;  %v295_v28 = vld [vmem:[%s4864_s20 + $0x2c8] sm:$0xff] }
  0x35   : > { %v1779_v59 = vadd.f32 %v1778_v48, %v1031_v36  ;;  %v1037_v61 = vmul.f32 %v4855_v12, %v280_v44  ;;  %v1767_v63 = vadd.f32 %v1766_v40, %v1765_v51  ;;  %v1038_v1 = vmul.f32 %v4857_v13, %v281_v49  ;;  %v294_v40 = vld [vmem:[%s4864_s20 + $0x2c0] sm:$0xff]  ;;  %v299_v45 = vld [vmem:[%s4864_s20 + $0x2e8] sm:$0xff] }
  0x36   : > { %v1773_v0 = vadd.f32 %v1772_v52, %v1027_v41  ;;  %v1040_v2 = vmul.f32 %v4859_v14, %v283_v50  ;;  %v1786_v6 = vadd.f32 %v1036_v54, %v1035_v53  ;;  %v1041_v7 = vmul.f32 %v4851_v10, %v284_v55  ;;  %v302_v51 = vld [vmem:[%s4864_s20 + $0x300] sm:$0xff]  ;;  %v303_v52 = vld [vmem:[%s4864_s20 + $0x308] sm:$0xff] }
  0x37   : > { %v1780_v5 = vadd.f32 %v1779_v59, %v1032_v46  ;;  %v1042_v8 = vmul.f32 %v4853_v11, %v285_v56  ;;  %1768 = vadd.xlane.f32.xlu1 %v1767_v63  ;;  %v1782_v19 = vsel %vm1693_vm0, %v1034_v47, 0.0  ;;  %v1039_v20 = vmul.f32 %v4869_v18, %v282_v60  ;;  %v301_v46 = vld [vmem:[%s4864_s20 + $0x2f8] sm:$0xff] }
  0x38   : > { %v1775_v17 = vadd.f32 %v1774_v57, %v1773_v0  ;;  %v1043_v22 = vmul.f32 %v4855_v12, %v286_v62  ;;  %v1787_v24 = vadd.f32 %v1786_v6, %v1037_v61  ;;  %v1044_v25 = vmul.f32 %v4857_v13, %v287_v3  ;;  %v300_v57 = vld [vmem:[%s4864_s20 + $0x2f0] sm:$0xff]  ;;  %v305_v63 = vld [vmem:[%s4864_s20 + $0x318] sm:$0xff]  ;;  %v307_v0 = vld [vmem:[%s4864_s20 + $0x328] sm:$0xff] }
  0x39   : > { %v1781_v23 = vadd.f32 %v1780_v5, %v1033_v58  ;;  %v1046_v26 = vmul.f32 %v4859_v14, %v289_v4  ;;  %v1794_v29 = vadd.f32 %v1042_v8, %v1041_v7  ;;  %v1047_v30 = vmul.f32 %v4851_v10, %v290_v9  ;;  %v304_v58 = vld [vmem:[%s4864_s20 + $0x310] sm:$0xff]  ;;  %v309_v6 = vld [vmem:[%s4864_s20 + $0x338] sm:$0xff] }
  0x3a   : > { %1776 = vadd.xlane.f32.xlu0 %v1775_v17  ;;  %v1048_v31 = vmul.f32 %v4853_v11, %v291_v15  ;;  %v1049_v32 = vmul.f32 %v4855_v12, %v292_v16  ;;  %v1788_v37 = vadd.f32 %v1787_v24, %v1038_v1  ;;  %v1790_v38 = vsel %vm1693_vm0, %v1040_v2, 0.0  ;;  %v308_v5 = vld [vmem:[%s4864_s20 + $0x330] sm:$0xff]  ;;  %v306_v15 = vld [vmem:[%s4864_s20 + $0x320] sm:$0xff]  ;;  %v313_v24 = vld [vmem:[%s4864_s20 + $0x358] sm:$0xff] }
  0x3b   : > { %v1783_v36 = vadd.f32 %v1782_v19, %v1781_v23  ;;  %v1045_v39 = vmul.f32 %v4869_v18, %v288_v21  ;;  %v1795_v41 = vadd.f32 %v1794_v29, %v1043_v22  ;;  %v1050_v42 = vmul.f32 %v4857_v13, %v293_v27  ;;  %v310_v17 = vld [vmem:[%s4864_s20 + $0x340] sm:$0xff]  ;;  %v311_v23 = vld [vmem:[%s4864_s20 + $0x348] sm:$0xff] }
  0x3c   : > { %v1052_v43 = vmul.f32 %v4859_v14, %v295_v28  ;;  %v1802_v44 = vadd.f32 %v1048_v31, %v1047_v30  ;;  %v1789_v47 = vadd.f32 %v1788_v37, %v1039_v20  ;;  %v1053_v48 = vmul.f32 %v4851_v10, %v296_v33  ;;  %v314_v29 = vld [vmem:[%s4864_s20 + $0x360] sm:$0xff]  ;;  %v315_v30 = vld [vmem:[%s4864_s20 + $0x368] sm:$0xff]  ;;  %v316_v31 = vld [vmem:[%s4864_s20 + $0x370] sm:$0xff] }
  0x3d   : > { %1784 = vadd.xlane.f32.xlu1 %v1783_v36  ;;  %v1054_v49 = vmul.f32 %v4853_v11, %v297_v34  ;;  %v1055_v50 = vmul.f32 %v4855_v12, %v298_v35  ;;  %v1796_v53 = vadd.f32 %v1795_v41, %v1044_v25  ;;  %v1798_v54 = vsel %vm1693_vm0, %v1046_v26, 0.0  ;;  %v312_v35 = vld [vmem:[%s4864_s20 + $0x350] sm:$0xff]  ;;  %v317_v41 = vld [vmem:[%s4864_s20 + $0x378] sm:$0xff] }
  0x3e   : > { %v1051_v55 = vmul.f32 %v4869_v18, %v294_v40  ;;  %v1803_v56 = vadd.f32 %v1802_v44, %v1049_v32  ;;  %v1791_v59 = vadd.f32 %v1790_v38, %v1789_v47  ;;  %v1056_v60 = vmul.f32 %v4857_v13, %v299_v45  ;;  %v320_v47 = vld [vmem:[%s4864_s20 + $0x390] sm:$0xff] }
  0x3f   : > { %v1058_v61 = vmul.f32 %v4859_v14, %v301_v46  ;;  %v1810_v62 = vadd.f32 %v1054_v49, %v1053_v48  ;;  %v1797_v1 = vadd.f32 %v1796_v53, %v1045_v39  ;;  %v1059_v3 = vmul.f32 %v4851_v10, %v302_v51  ;;  %v321_v48 = vld [vmem:[%s4864_s20 + $0x398] sm:$0xff]  ;;  %v322_v49 = vld [vmem:[%s4864_s20 + $0x3a0] sm:$0xff] }
  0x40   : > { %v1804_v2 = vadd.f32 %v1803_v56, %v1050_v42  ;;  %v1060_v4 = vmul.f32 %v4853_v11, %v303_v52  ;;  %1792 = vadd.xlane.f32.xlu0 %v1791_v59  ;;  %v1806_v7 = vsel %vm1693_vm0, %v1052_v43, 0.0  ;;  %v1057_v8 = vmul.f32 %v4869_v18, %v300_v57  ;;  %v319_v42 = vld [vmem:[%s4864_s20 + $0x388] sm:$0xff] }
  0x41   : > { %v1811_v9 = vadd.f32 %v1810_v62, %v1055_v50  ;;  %v1061_v16 = vmul.f32 %v4855_v12, %v304_v58  ;;  %v1799_v19 = vadd.f32 %v1798_v54, %v1797_v1  ;;  %v1062_v21 = vmul.f32 %v4857_v13, %v305_v63  ;;  %v318_v54 = vld [vmem:[%s4864_s20 + $0x380] sm:$0xff]  ;;  %v323_v59 = vld [vmem:[%s4864_s20 + $0x3a8] sm:$0xff] }
  0x42   : > { %v1805_v20 = vadd.f32 %v1804_v2, %v1051_v55  ;;  %v1064_v22 = vmul.f32 %v4859_v14, %v307_v0  ;;  %v1818_v26 = vadd.f32 %v1060_v4, %v1059_v3  ;;  %v1065_v27 = vmul.f32 %v4851_v10, %v308_v5  ;;  %v326_v1 = vld [vmem:[%s4864_s20 + $0x3c0] sm:$0xff]  ;;  %v327_v2 = vld [vmem:[%s4864_s20 + $0x3c8] sm:$0xff] }
  0x43   : > { %v1812_v25 = vadd.f32 %v1811_v9, %v1056_v60  ;;  %v1066_v28 = vmul.f32 %v4853_v11, %v309_v6  ;;  %1800 = vadd.xlane.f32.xlu1 %v1799_v19  ;;  %v1814_v33 = vsel %vm1693_vm0, %v1058_v61, 0.0  ;;  %v1063_v34 = vmul.f32 %v4869_v18, %v306_v15  ;;  %v325_v60 = vld [vmem:[%s4864_s20 + $0x3b8] sm:$0xff] }
  0x44   : > { %v1807_v32 = vadd.f32 %v1806_v7, %v1805_v20  ;;  %v1067_v36 = vmul.f32 %v4855_v12, %v310_v17  ;;  %v1819_v38 = vadd.f32 %v1818_v26, %v1061_v16  ;;  %v1068_v39 = vmul.f32 %v4857_v13, %v311_v23  ;;  %v324_v7 = vld [vmem:[%s4864_s20 + $0x3b0] sm:$0xff]  ;;  %v329_v19 = vld [vmem:[%s4864_s20 + $0x3d8] sm:$0xff]  ;;  %v331_v20 = vld [vmem:[%s4864_s20 + $0x3e8] sm:$0xff] }
  0x45   : > { %v1813_v37 = vadd.f32 %v1812_v25, %v1057_v8  ;;  %v1070_v40 = vmul.f32 %v4859_v14, %v313_v24  ;;  %v1826_v43 = vadd.f32 %v1066_v28, %v1065_v27  ;;  %v1071_v44 = vmul.f32 %v4851_v10, %v314_v29  ;;  %v328_v8 = vld [vmem:[%s4864_s20 + $0x3d0] sm:$0xff]  ;;  %v333_v26 = vld [vmem:[%s4864_s20 + $0x3f8] sm:$0xff] }
  0x46   : > { %1808 = vadd.xlane.f32.xlu0 %v1807_v32  ;;  %v1072_v45 = vmul.f32 %v4853_v11, %v315_v30  ;;  %v1073_v46 = vmul.f32 %v4855_v12, %v316_v31  ;;  %v1820_v51 = vadd.f32 %v1819_v38, %v1062_v21  ;;  %v1822_v52 = vsel %vm1693_vm0, %v1064_v22, 0.0  ;;  %v332_v25 = vld [vmem:[%s4864_s20 + $0x3f0] sm:$0xff]  ;;  %v330_v30 = vld [vmem:[%s4864_s20 + $0x3e0] sm:$0xff]  ;;  %v337_v38 = vld [vmem:[%s4864_s20 + $0x418] sm:$0xff] }
  0x47   : > { %v1815_v50 = vadd.f32 %v1814_v33, %v1813_v37  ;;  %v1069_v53 = vmul.f32 %v4869_v18, %v312_v35  ;;  %v1827_v55 = vadd.f32 %v1826_v43, %v1067_v36  ;;  %v1074_v56 = vmul.f32 %v4857_v13, %v317_v41  ;;  %v334_v32 = vld [vmem:[%s4864_s20 + $0x400] sm:$0xff]  ;;  %v335_v37 = vld [vmem:[%s4864_s20 + $0x408] sm:$0xff] }
  0x48   : > { %v1076_v57 = vmul.f32 %v4859_v14, %v319_v42  ;;  %v1834_v58 = vadd.f32 %v1072_v45, %v1071_v44  ;;  %v1821_v61 = vadd.f32 %v1820_v51, %v1063_v34  ;;  %v1077_v62 = vmul.f32 %v4851_v10, %v320_v47  ;;  %v338_v43 = vld [vmem:[%s4864_s20 + $0x420] sm:$0xff]  ;;  %v339_v44 = vld [vmem:[%s4864_s20 + $0x428] sm:$0xff]  ;;  %v340_v45 = vld [vmem:[%s4864_s20 + $0x430] sm:$0xff] }
  0x49   : > { %1816 = vadd.xlane.f32.xlu1 %v1815_v50  ;;  %v1078_v63 = vmul.f32 %v4853_v11, %v321_v48  ;;  %v1079_v0 = vmul.f32 %v4855_v12, %v322_v49  ;;  %v1828_v3 = vadd.f32 %v1827_v55, %v1068_v39  ;;  %v1830_v4 = vsel %vm1693_vm0, %v1070_v40, 0.0  ;;  %v336_v49 = vld [vmem:[%s4864_s20 + $0x410] sm:$0xff]  ;;  %v341_v55 = vld [vmem:[%s4864_s20 + $0x438] sm:$0xff] }
  0x4a   : > { %v1075_v5 = vmul.f32 %v4869_v18, %v318_v54  ;;  %v1835_v6 = vadd.f32 %v1834_v58, %v1073_v46  ;;  %v1823_v9 = vadd.f32 %v1822_v52, %v1821_v61  ;;  %v1080_v15 = vmul.f32 %v4857_v13, %v323_v59  ;;  %v344_v61 = vld [vmem:[%s4864_s20 + $0x450] sm:$0xff] }
  0x4b   : > { %v1082_v16 = vmul.f32 %v4859_v14, %v325_v60  ;;  %v1842_v17 = vadd.f32 %v1078_v63, %v1077_v62  ;;  %v1829_v21 = vadd.f32 %v1828_v3, %v1069_v53  ;;  %v1083_v23 = vmul.f32 %v4851_v10, %v326_v1  ;;  %v345_v62 = vld [vmem:[%s4864_s20 + $0x458] sm:$0xff]  ;;  %v346_v63 = vld [vmem:[%s4864_s20 + $0x460] sm:$0xff] }
  0x4c   : > { %v1836_v22 = vadd.f32 %v1835_v6, %v1074_v56  ;;  %v1084_v24 = vmul.f32 %v4853_v11, %v327_v2  ;;  %1824 = vadd.xlane.f32.xlu0 %v1823_v9  ;;  %v1838_v27 = vsel %vm1693_vm0, %v1076_v57, 0.0  ;;  %v1081_v28 = vmul.f32 %v4869_v18, %v324_v7  ;;  %v343_v56 = vld [vmem:[%s4864_s20 + $0x448] sm:$0xff] }
  0x4d   : > { %v1843_v29 = vadd.f32 %v1842_v17, %v1079_v0  ;;  %v1085_v31 = vmul.f32 %v4855_v12, %v328_v8  ;;  %v1831_v33 = vadd.f32 %v1830_v4, %v1829_v21  ;;  %v1086_v35 = vmul.f32 %v4857_v13, %v329_v19  ;;  %v342_v4 = vld [vmem:[%s4864_s20 + $0x440] sm:$0xff]  ;;  %v347_v9 = vld [vmem:[%s4864_s20 + $0x468] sm:$0xff] }
  0x4e   : > { %v1837_v34 = vadd.f32 %v1836_v22, %v1075_v5  ;;  %v1088_v36 = vmul.f32 %v4859_v14, %v331_v20  ;;  %v1850_v40 = vadd.f32 %v1084_v24, %v1083_v23  ;;  %v1089_v41 = vmul.f32 %v4851_v10, %v332_v25  ;;  %v350_v21 = vld [vmem:[%s4864_s20 + $0x480] sm:$0xff]  ;;  %v351_v22 = vld [vmem:[%s4864_s20 + $0x488] sm:$0xff] }
  0x4f   : > { %v1844_v39 = vadd.f32 %v1843_v29, %v1080_v15  ;;  %v1090_v42 = vmul.f32 %v4853_v11, %v333_v26  ;;  %1832 = vadd.xlane.f32.xlu1 %v1831_v33  ;;  %v1846_v47 = vsel %vm1693_vm0, %v1082_v16, 0.0  ;;  %v1087_v48 = vmul.f32 %v4869_v18, %v330_v30  ;;  %v349_v15 = vld [vmem:[%s4864_s20 + $0x478] sm:$0xff] }
  0x50   : > { %v1839_v46 = vadd.f32 %v1838_v27, %v1837_v34  ;;  %v1091_v50 = vmul.f32 %v4855_v12, %v334_v32  ;;  %v1851_v52 = vadd.f32 %v1850_v40, %v1085_v31  ;;  %v1092_v53 = vmul.f32 %v4857_v13, %v335_v37  ;;  %v348_v27 = vld [vmem:[%s4864_s20 + $0x470] sm:$0xff]  ;;  %v353_v33 = vld [vmem:[%s4864_s20 + $0x498] sm:$0xff]  ;;  %v355_v34 = vld [vmem:[%s4864_s20 + $0x4a8] sm:$0xff] }
  0x51   : > { %v1845_v51 = vadd.f32 %v1844_v39, %v1081_v28  ;;  %v1094_v54 = vmul.f32 %v4859_v14, %v337_v38  ;;  %v1858_v57 = vadd.f32 %v1090_v42, %v1089_v41  ;;  %v1095_v58 = vmul.f32 %v4851_v10, %v338_v43  ;;  %v352_v28 = vld [vmem:[%s4864_s20 + $0x490] sm:$0xff]  ;;  %v357_v40 = vld [vmem:[%s4864_s20 + $0x4b8] sm:$0xff] }
  0x52   : > { %1840 = vadd.xlane.f32.xlu0 %v1839_v46  ;;  %v1096_v59 = vmul.f32 %v4853_v11, %v339_v44  ;;  %v1097_v60 = vmul.f32 %v4855_v12, %v340_v45  ;;  %v1852_v1 = vadd.f32 %v1851_v52, %v1086_v35  ;;  %v1854_v2 = vsel %vm1693_vm0, %v1088_v36, 0.0  ;;  %v356_v39 = vld [vmem:[%s4864_s20 + $0x4b0] sm:$0xff]  ;;  %v354_v44 = vld [vmem:[%s4864_s20 + $0x4a0] sm:$0xff]  ;;  %v361_v52 = vld [vmem:[%s4864_s20 + $0x4d8] sm:$0xff] }
  0x53   : > { %v1847_v0 = vadd.f32 %v1846_v47, %v1845_v51  ;;  %v1093_v3 = vmul.f32 %v4869_v18, %v336_v49  ;;  %v1859_v5 = vadd.f32 %v1858_v57, %v1091_v50  ;;  %v1098_v6 = vmul.f32 %v4857_v13, %v341_v55  ;;  %v358_v46 = vld [vmem:[%s4864_s20 + $0x4c0] sm:$0xff]  ;;  %v359_v51 = vld [vmem:[%s4864_s20 + $0x4c8] sm:$0xff] }
  0x54   : > { %v1100_v7 = vmul.f32 %v4859_v14, %v343_v56  ;;  %v1866_v8 = vadd.f32 %v1096_v59, %v1095_v58  ;;  %v1853_v16 = vadd.f32 %v1852_v1, %v1087_v48  ;;  %v1101_v17 = vmul.f32 %v4851_v10, %v344_v61  ;;  %v362_v57 = vld [vmem:[%s4864_s20 + $0x4e0] sm:$0xff]  ;;  %v363_v58 = vld [vmem:[%s4864_s20 + $0x4e8] sm:$0xff]  ;;  %v364_v59 = vld [vmem:[%s4864_s20 + $0x4f0] sm:$0xff] }
  0x55   : > { %1848 = vadd.xlane.f32.xlu1 %v1847_v0  ;;  %v1102_v19 = vmul.f32 %v4853_v11, %v345_v62  ;;  %v1103_v20 = vmul.f32 %v4855_v12, %v346_v63  ;;  %v1860_v23 = vadd.f32 %v1859_v5, %v1092_v53  ;;  %v1862_v24 = vsel %vm1693_vm0, %v1094_v54, 0.0  ;;  %v360_v63 = vld [vmem:[%s4864_s20 + $0x4d0] sm:$0xff]  ;;  %v365_v5 = vld [vmem:[%s4864_s20 + $0x4f8] sm:$0xff] }
  0x56   : > { %v1099_v25 = vmul.f32 %v4869_v18, %v342_v4  ;;  %v1867_v26 = vadd.f32 %v1866_v8, %v1097_v60  ;;  %v1855_v29 = vadd.f32 %v1854_v2, %v1853_v16  ;;  %v1104_v30 = vmul.f32 %v4857_v13, %v347_v9  ;;  %v368_v16 = vld [vmem:[%s4864_s20 + $0x510] sm:$0xff] }
  0x57   : > { %v1106_v31 = vmul.f32 %v4859_v14, %v349_v15  ;;  %v1874_v32 = vadd.f32 %v1102_v19, %v1101_v17  ;;  %v1861_v35 = vadd.f32 %v1860_v23, %v1093_v3  ;;  %v1107_v37 = vmul.f32 %v4851_v10, %v350_v21  ;;  %v369_v17 = vld [vmem:[%s4864_s20 + $0x518] sm:$0xff]  ;;  %v370_v19 = vld [vmem:[%s4864_s20 + $0x520] sm:$0xff] }
  0x58   : > { %v1868_v36 = vadd.f32 %v1867_v26, %v1098_v6  ;;  %v1108_v38 = vmul.f32 %v4853_v11, %v351_v22  ;;  %1856 = vadd.xlane.f32.xlu0 %v1855_v29  ;;  %v1870_v41 = vsel %vm1693_vm0, %v1100_v7, 0.0  ;;  %v1105_v42 = vmul.f32 %v4869_v18, %v348_v27  ;;  %v367_v6 = vld [vmem:[%s4864_s20 + $0x508] sm:$0xff] }
  0x59   : > { %v1875_v43 = vadd.f32 %v1874_v32, %v1103_v20  ;;  %v1109_v45 = vmul.f32 %v4855_v12, %v352_v28  ;;  %v1863_v47 = vadd.f32 %v1862_v24, %v1861_v35  ;;  %v1110_v49 = vmul.f32 %v4857_v13, %v353_v33  ;;  %v366_v24 = vld [vmem:[%s4864_s20 + $0x500] sm:$0xff]  ;;  %v371_v29 = vld [vmem:[%s4864_s20 + $0x528] sm:$0xff] }
  0x5a   : > { %v1869_v48 = vadd.f32 %v1868_v36, %v1099_v25  ;;  %v1112_v50 = vmul.f32 %v4859_v14, %v355_v34  ;;  %v1882_v54 = vadd.f32 %v1108_v38, %v1107_v37  ;;  %v1113_v55 = vmul.f32 %v4851_v10, %v356_v39  ;;  %v374_v35 = vld [vmem:[%s4864_s20 + $0x540] sm:$0xff]  ;;  %v375_v36 = vld [vmem:[%s4864_s20 + $0x548] sm:$0xff] }
  0x5b   : > { %v1876_v53 = vadd.f32 %v1875_v43, %v1104_v30  ;;  %v1114_v56 = vmul.f32 %v4853_v11, %v357_v40  ;;  %1864 = vadd.xlane.f32.xlu1 %v1863_v47  ;;  %v1878_v61 = vsel %vm1693_vm0, %v1106_v31, 0.0  ;;  %v1111_v62 = vmul.f32 %v4869_v18, %v354_v44  ;;  %v373_v30 = vld [vmem:[%s4864_s20 + $0x538] sm:$0xff] }
  0x5c   : > { %v1871_v60 = vadd.f32 %v1870_v41, %v1869_v48  ;;  %v1115_v0 = vmul.f32 %v4855_v12, %v358_v46  ;;  %v1883_v2 = vadd.f32 %v1882_v54, %v1109_v45  ;;  %v1116_v3 = vmul.f32 %v4857_v13, %v359_v51  ;;  %v372_v41 = vld [vmem:[%s4864_s20 + $0x530] sm:$0xff]  ;;  %v377_v47 = vld [vmem:[%s4864_s20 + $0x558] sm:$0xff]  ;;  %v379_v48 = vld [vmem:[%s4864_s20 + $0x568] sm:$0xff] }
  0x5d   : > { %v1877_v1 = vadd.f32 %v1876_v53, %v1105_v42  ;;  %v1118_v4 = vmul.f32 %v4859_v14, %v361_v52  ;;  %v1890_v7 = vadd.f32 %v1114_v56, %v1113_v55  ;;  %v1119_v8 = vmul.f32 %v4851_v10, %v362_v57  ;;  %v376_v42 = vld [vmem:[%s4864_s20 + $0x550] sm:$0xff]  ;;  %v381_v54 = vld [vmem:[%s4864_s20 + $0x578] sm:$0xff] }
  0x5e   : > { %1872 = vadd.xlane.f32.xlu0 %v1871_v60  ;;  %v1120_v9 = vmul.f32 %v4853_v11, %v363_v58  ;;  %v1121_v15 = vmul.f32 %v4855_v12, %v364_v59  ;;  %v1884_v21 = vadd.f32 %v1883_v2, %v1110_v49  ;;  %v1886_v22 = vsel %vm1693_vm0, %v1112_v50, 0.0  ;;  %v380_v53 = vld [vmem:[%s4864_s20 + $0x570] sm:$0xff]  ;;  %v378_v58 = vld [vmem:[%s4864_s20 + $0x560] sm:$0xff]  ;;  %v385_v2 = vld [vmem:[%s4864_s20 + $0x598] sm:$0xff] }
  0x5f   : > { %v1879_v20 = vadd.f32 %v1878_v61, %v1877_v1  ;;  %v1117_v23 = vmul.f32 %v4869_v18, %v360_v63  ;;  %v1891_v25 = vadd.f32 %v1890_v7, %v1115_v0  ;;  %v1122_v26 = vmul.f32 %v4857_v13, %v365_v5  ;;  %v382_v60 = vld [vmem:[%s4864_s20 + $0x580] sm:$0xff]  ;;  %v383_v1 = vld [vmem:[%s4864_s20 + $0x588] sm:$0xff] }
  0x60   : > { %v1124_v27 = vmul.f32 %v4859_v14, %v367_v6  ;;  %v1898_v28 = vadd.f32 %v1120_v9, %v1119_v8  ;;  %v1885_v31 = vadd.f32 %v1884_v21, %v1111_v62  ;;  %v1125_v32 = vmul.f32 %v4851_v10, %v368_v16  ;;  %v386_v7 = vld [vmem:[%s4864_s20 + $0x5a0] sm:$0xff]  ;;  %v387_v8 = vld [vmem:[%s4864_s20 + $0x5a8] sm:$0xff]  ;;  %v388_v9 = vld [vmem:[%s4864_s20 + $0x5b0] sm:$0xff] }
  0x61   : > { %1880 = vadd.xlane.f32.xlu1 %v1879_v20  ;;  %v1126_v33 = vmul.f32 %v4853_v11, %v369_v17  ;;  %v1127_v34 = vmul.f32 %v4855_v12, %v370_v19  ;;  %v1892_v37 = vadd.f32 %v1891_v25, %v1116_v3  ;;  %v1894_v38 = vsel %vm1693_vm0, %v1118_v4, 0.0  ;;  %v384_v19 = vld [vmem:[%s4864_s20 + $0x590] sm:$0xff]  ;;  %v389_v25 = vld [vmem:[%s4864_s20 + $0x5b8] sm:$0xff] }
  0x62   : > { %v1123_v39 = vmul.f32 %v4869_v18, %v366_v24  ;;  %v1899_v40 = vadd.f32 %v1898_v28, %v1121_v15  ;;  %v1887_v43 = vadd.f32 %v1886_v22, %v1885_v31  ;;  %v1128_v44 = vmul.f32 %v4857_v13, %v371_v29  ;;  %v392_v31 = vld [vmem:[%s4864_s20 + $0x5d0] sm:$0xff] }
  0x63   : > { %v1130_v45 = vmul.f32 %v4859_v14, %v373_v30  ;;  %v1906_v46 = vadd.f32 %v1126_v33, %v1125_v32  ;;  %v1893_v49 = vadd.f32 %v1892_v37, %v1117_v23  ;;  %v1131_v51 = vmul.f32 %v4851_v10, %v374_v35  ;;  %v393_v32 = vld [vmem:[%s4864_s20 + $0x5d8] sm:$0xff]  ;;  %v394_v33 = vld [vmem:[%s4864_s20 + $0x5e0] sm:$0xff] }
  0x64   : > { %v1900_v50 = vadd.f32 %v1899_v40, %v1122_v26  ;;  %v1132_v52 = vmul.f32 %v4853_v11, %v375_v36  ;;  %1888 = vadd.xlane.f32.xlu0 %v1887_v43  ;;  %v1902_v55 = vsel %vm1693_vm0, %v1124_v27, 0.0  ;;  %v1129_v56 = vmul.f32 %v4869_v18, %v372_v41  ;;  %v391_v26 = vld [vmem:[%s4864_s20 + $0x5c8] sm:$0xff] }
  0x65   : > { %v1907_v57 = vadd.f32 %v1906_v46, %v1127_v34  ;;  %v1133_v59 = vmul.f32 %v4855_v12, %v376_v42  ;;  %v1895_v61 = vadd.f32 %v1894_v38, %v1893_v49  ;;  %v1134_v63 = vmul.f32 %v4857_v13, %v377_v47  ;;  %v390_v38 = vld [vmem:[%s4864_s20 + $0x5c0] sm:$0xff]  ;;  %v395_v43 = vld [vmem:[%s4864_s20 + $0x5e8] sm:$0xff] }
  0x66   : > { %v1901_v62 = vadd.f32 %v1900_v50, %v1123_v39  ;;  %v1136_v0 = vmul.f32 %v4859_v14, %v379_v48  ;;  %v1914_v4 = vadd.f32 %v1132_v52, %v1131_v51  ;;  %v1137_v5 = vmul.f32 %v4851_v10, %v380_v53  ;;  %v398_v49 = vld [vmem:[%s4864_s20 + $0x600] sm:$0xff]  ;;  %v399_v50 = vld [vmem:[%s4864_s20 + $0x608] sm:$0xff] }
  0x67   : > { %v1908_v3 = vadd.f32 %v1907_v57, %v1128_v44  ;;  %v1138_v6 = vmul.f32 %v4853_v11, %v381_v54  ;;  %1896 = vadd.xlane.f32.xlu1 %v1895_v61  ;;  %v1910_v16 = vsel %vm1693_vm0, %v1130_v45, 0.0  ;;  %v1135_v17 = vmul.f32 %v4869_v18, %v378_v58  ;;  %v397_v44 = vld [vmem:[%s4864_s20 + $0x5f8] sm:$0xff] }
  0x68   : > { %v1903_v15 = vadd.f32 %v1902_v55, %v1901_v62  ;;  %v1139_v20 = vmul.f32 %v4855_v12, %v382_v60  ;;  %v1915_v22 = vadd.f32 %v1914_v4, %v1133_v59  ;;  %v1140_v23 = vmul.f32 %v4857_v13, %v383_v1  ;;  %v396_v55 = vld [vmem:[%s4864_s20 + $0x5f0] sm:$0xff]  ;;  %v401_v61 = vld [vmem:[%s4864_s20 + $0x618] sm:$0xff]  ;;  %v403_v62 = vld [vmem:[%s4864_s20 + $0x628] sm:$0xff] }
  0x69   : > { %v1909_v21 = vadd.f32 %v1908_v3, %v1129_v56  ;;  %v1142_v24 = vmul.f32 %v4859_v14, %v385_v2  ;;  %v1922_v27 = vadd.f32 %v1138_v6, %v1137_v5  ;;  %v1143_v28 = vmul.f32 %v4851_v10, %v386_v7  ;;  %v400_v56 = vld [vmem:[%s4864_s20 + $0x610] sm:$0xff]  ;;  %v405_v4 = vld [vmem:[%s4864_s20 + $0x638] sm:$0xff] }
  0x6a   : > { %1904 = vadd.xlane.f32.xlu0 %v1903_v15  ;;  %v1144_v29 = vmul.f32 %v4853_v11, %v387_v8  ;;  %v1145_v30 = vmul.f32 %v4855_v12, %v388_v9  ;;  %v1916_v35 = vadd.f32 %v1915_v22, %v1134_v63  ;;  %v1918_v36 = vsel %vm1693_vm0, %v1136_v0, 0.0  ;;  %v404_v3 = vld [vmem:[%s4864_s20 + $0x630] sm:$0xff]  ;;  %v402_v8 = vld [vmem:[%s4864_s20 + $0x620] sm:$0xff]  ;;  %v409_v22 = vld [vmem:[%s4864_s20 + $0x658] sm:$0xff] }
  0x6b   : > { %v1911_v34 = vadd.f32 %v1910_v16, %v1909_v21  ;;  %v1141_v37 = vmul.f32 %v4869_v18, %v384_v19  ;;  %v1923_v39 = vadd.f32 %v1922_v27, %v1139_v20  ;;  %v1146_v40 = vmul.f32 %v4857_v13, %v389_v25  ;;  %v406_v15 = vld [vmem:[%s4864_s20 + $0x640] sm:$0xff]  ;;  %v407_v21 = vld [vmem:[%s4864_s20 + $0x648] sm:$0xff] }
  0x6c   : > { %v1148_v41 = vmul.f32 %v4859_v14, %v391_v26  ;;  %v1930_v42 = vadd.f32 %v1144_v29, %v1143_v28  ;;  %v1917_v45 = vadd.f32 %v1916_v35, %v1135_v17  ;;  %v1149_v46 = vmul.f32 %v4851_v10, %v392_v31  ;;  %v410_v27 = vld [vmem:[%s4864_s20 + $0x660] sm:$0xff]  ;;  %v411_v28 = vld [vmem:[%s4864_s20 + $0x668] sm:$0xff]  ;;  %v412_v29 = vld [vmem:[%s4864_s20 + $0x670] sm:$0xff] }
  0x6d   : > { %1912 = vadd.xlane.f32.xlu1 %v1911_v34  ;;  %v1150_v47 = vmul.f32 %v4853_v11, %v393_v32  ;;  %v1151_v48 = vmul.f32 %v4855_v12, %v394_v33  ;;  %v1924_v51 = vadd.f32 %v1923_v39, %v1140_v23  ;;  %v1926_v52 = vsel %vm1693_vm0, %v1142_v24, 0.0  ;;  %v408_v33 = vld [vmem:[%s4864_s20 + $0x650] sm:$0xff]  ;;  %v413_v39 = vld [vmem:[%s4864_s20 + $0x678] sm:$0xff] }
  0x6e   : > { %v1147_v53 = vmul.f32 %v4869_v18, %v390_v38  ;;  %v1931_v54 = vadd.f32 %v1930_v42, %v1145_v30  ;;  %v1919_v57 = vadd.f32 %v1918_v36, %v1917_v45  ;;  %v1152_v58 = vmul.f32 %v4857_v13, %v395_v43  ;;  %v416_v45 = vld [vmem:[%s4864_s20 + $0x690] sm:$0xff] }
  0x6f   : > { %v1154_v59 = vmul.f32 %v4859_v14, %v397_v44  ;;  %v1938_v60 = vadd.f32 %v1150_v47, %v1149_v46  ;;  %v1925_v63 = vadd.f32 %v1924_v51, %v1141_v37  ;;  %v1155_v1 = vmul.f32 %v4851_v10, %v398_v49  ;;  %v417_v46 = vld [vmem:[%s4864_s20 + $0x698] sm:$0xff]  ;;  %v418_v47 = vld [vmem:[%s4864_s20 + $0x6a0] sm:$0xff] }
  0x70   : > { %v1932_v0 = vadd.f32 %v1931_v54, %v1146_v40  ;;  %v1156_v2 = vmul.f32 %v4853_v11, %v399_v50  ;;  %1920 = vadd.xlane.f32.xlu0 %v1919_v57  ;;  %v1934_v5 = vsel %vm1693_vm0, %v1148_v41, 0.0  ;;  %v1153_v6 = vmul.f32 %v4869_v18, %v396_v55  ;;  %v415_v40 = vld [vmem:[%s4864_s20 + $0x688] sm:$0xff] }
  0x71   : > { %v1939_v7 = vadd.f32 %v1938_v60, %v1151_v48  ;;  %v1157_v9 = vmul.f32 %v4855_v12, %v400_v56  ;;  %v1927_v16 = vadd.f32 %v1926_v52, %v1925_v63  ;;  %v1158_v19 = vmul.f32 %v4857_v13, %v401_v61  ;;  %v414_v52 = vld [vmem:[%s4864_s20 + $0x680] sm:$0xff]  ;;  %v419_v57 = vld [vmem:[%s4864_s20 + $0x6a8] sm:$0xff] }
  0x72   : > { %v1933_v17 = vadd.f32 %v1932_v0, %v1147_v53  ;;  %v1160_v20 = vmul.f32 %v4859_v14, %v403_v62  ;;  %v1946_v24 = vadd.f32 %v1156_v2, %v1155_v1  ;;  %v1161_v25 = vmul.f32 %v4851_v10, %v404_v3  ;;  %v422_v63 = vld [vmem:[%s4864_s20 + $0x6c0] sm:$0xff]  ;;  %v423_v0 = vld [vmem:[%s4864_s20 + $0x6c8] sm:$0xff] }
  0x73   : > { %v1940_v23 = vadd.f32 %v1939_v7, %v1152_v58  ;;  %v1162_v26 = vmul.f32 %v4853_v11, %v405_v4  ;;  %1928 = vadd.xlane.f32.xlu1 %v1927_v16  ;;  %v1942_v31 = vsel %vm1693_vm0, %v1154_v59, 0.0  ;;  %v1159_v32 = vmul.f32 %v4869_v18, %v402_v8  ;;  %v421_v58 = vld [vmem:[%s4864_s20 + $0x6b8] sm:$0xff] }
  0x74   : > { %v1935_v30 = vadd.f32 %v1934_v5, %v1933_v17  ;;  %v1163_v34 = vmul.f32 %v4855_v12, %v406_v15  ;;  %v1947_v36 = vadd.f32 %v1946_v24, %v1157_v9  ;;  %v1164_v37 = vmul.f32 %v4857_v13, %v407_v21  ;;  %v420_v5 = vld [vmem:[%s4864_s20 + $0x6b0] sm:$0xff]  ;;  %v425_v16 = vld [vmem:[%s4864_s20 + $0x6d8] sm:$0xff]  ;;  %v427_v17 = vld [vmem:[%s4864_s20 + $0x6e8] sm:$0xff] }
  0x75   : > { %v1941_v35 = vadd.f32 %v1940_v23, %v1153_v6  ;;  %v1166_v38 = vmul.f32 %v4859_v14, %v409_v22  ;;  %v1954_v41 = vadd.f32 %v1162_v26, %v1161_v25  ;;  %v1167_v42 = vmul.f32 %v4851_v10, %v410_v27  ;;  %v424_v6 = vld [vmem:[%s4864_s20 + $0x6d0] sm:$0xff]  ;;  %v429_v24 = vld [vmem:[%s4864_s20 + $0x6f8] sm:$0xff] }
  0x76   : > { %1936 = vadd.xlane.f32.xlu0 %v1935_v30  ;;  %v1168_v43 = vmul.f32 %v4853_v11, %v411_v28  ;;  %v1169_v44 = vmul.f32 %v4855_v12, %v412_v29  ;;  %v1948_v49 = vadd.f32 %v1947_v36, %v1158_v19  ;;  %v1950_v50 = vsel %vm1693_vm0, %v1160_v20, 0.0  ;;  %v428_v23 = vld [vmem:[%s4864_s20 + $0x6f0] sm:$0xff]  ;;  %v426_v28 = vld [vmem:[%s4864_s20 + $0x6e0] sm:$0xff]  ;;  %v433_v36 = vld [vmem:[%s4864_s20 + $0x718] sm:$0xff] }
  0x77   : > { %v1943_v48 = vadd.f32 %v1942_v31, %v1941_v35  ;;  %v1165_v51 = vmul.f32 %v4869_v18, %v408_v33  ;;  %v1955_v53 = vadd.f32 %v1954_v41, %v1163_v34  ;;  %v1170_v54 = vmul.f32 %v4857_v13, %v413_v39  ;;  %v430_v30 = vld [vmem:[%s4864_s20 + $0x700] sm:$0xff]  ;;  %v431_v35 = vld [vmem:[%s4864_s20 + $0x708] sm:$0xff] }
  0x78   : > { %v1172_v55 = vmul.f32 %v4859_v14, %v415_v40  ;;  %v1962_v56 = vadd.f32 %v1168_v43, %v1167_v42  ;;  %v1949_v59 = vadd.f32 %v1948_v49, %v1159_v32  ;;  %v1173_v60 = vmul.f32 %v4851_v10, %v416_v45  ;;  %v434_v41 = vld [vmem:[%s4864_s20 + $0x720] sm:$0xff]  ;;  %v435_v42 = vld [vmem:[%s4864_s20 + $0x728] sm:$0xff]  ;;  %v436_v43 = vld [vmem:[%s4864_s20 + $0x730] sm:$0xff] }
  0x79   : > { %1944 = vadd.xlane.f32.xlu1 %v1943_v48  ;;  %v1174_v61 = vmul.f32 %v4853_v11, %v417_v46  ;;  %v1175_v62 = vmul.f32 %v4855_v12, %v418_v47  ;;  %v1956_v1 = vadd.f32 %v1955_v53, %v1164_v37  ;;  %v1958_v2 = vsel %vm1693_vm0, %v1166_v38, 0.0  ;;  %v432_v47 = vld [vmem:[%s4864_s20 + $0x710] sm:$0xff]  ;;  %v437_v53 = vld [vmem:[%s4864_s20 + $0x738] sm:$0xff] }
  0x7a   : > { %v1171_v3 = vmul.f32 %v4869_v18, %v414_v52  ;;  %v1963_v4 = vadd.f32 %v1962_v56, %v1169_v44  ;;  %v1951_v7 = vadd.f32 %v1950_v50, %v1949_v59  ;;  %v1176_v8 = vmul.f32 %v4857_v13, %v419_v57  ;;  %v440_v59 = vld [vmem:[%s4864_s20 + $0x750] sm:$0xff] }
  0x7b   : > { %v1178_v9 = vmul.f32 %v4859_v14, %v421_v58  ;;  %v1970_v15 = vadd.f32 %v1174_v61, %v1173_v60  ;;  %v1957_v19 = vadd.f32 %v1956_v1, %v1165_v51  ;;  %v1179_v21 = vmul.f32 %v4851_v10, %v422_v63  ;;  %v441_v60 = vld [vmem:[%s4864_s20 + $0x758] sm:$0xff]  ;;  %v442_v61 = vld [vmem:[%s4864_s20 + $0x760] sm:$0xff] }
  0x7c   : > { %v1964_v20 = vadd.f32 %v1963_v4, %v1170_v54  ;;  %v1180_v22 = vmul.f32 %v4853_v11, %v423_v0  ;;  %1952 = vadd.xlane.f32.xlu0 %v1951_v7  ;;  %v1966_v25 = vsel %vm1693_vm0, %v1172_v55, 0.0  ;;  %v1177_v26 = vmul.f32 %v4869_v18, %v420_v5  ;;  %v439_v54 = vld [vmem:[%s4864_s20 + $0x748] sm:$0xff] }
  0x7d   : > { %v1971_v27 = vadd.f32 %v1970_v15, %v1175_v62  ;;  %v1181_v29 = vmul.f32 %v4855_v12, %v424_v6  ;;  %v1959_v31 = vadd.f32 %v1958_v2, %v1957_v19  ;;  %v1182_v33 = vmul.f32 %v4857_v13, %v425_v16  ;;  %v438_v2 = vld [vmem:[%s4864_s20 + $0x740] sm:$0xff]  ;;  %v443_v7 = vld [vmem:[%s4864_s20 + $0x768] sm:$0xff] }
  0x7e   : > { %v1965_v32 = vadd.f32 %v1964_v20, %v1171_v3  ;;  %v1184_v34 = vmul.f32 %v4859_v14, %v427_v17  ;;  %v1978_v38 = vadd.f32 %v1180_v22, %v1179_v21  ;;  %v1185_v39 = vmul.f32 %v4851_v10, %v428_v23  ;;  %v446_v19 = vld [vmem:[%s4864_s20 + $0x780] sm:$0xff]  ;;  %v447_v20 = vld [vmem:[%s4864_s20 + $0x788] sm:$0xff] }
  0x7f   : > { %v1972_v37 = vadd.f32 %v1971_v27, %v1176_v8  ;;  %v1186_v40 = vmul.f32 %v4853_v11, %v429_v24  ;;  %1960 = vadd.xlane.f32.xlu1 %v1959_v31  ;;  %v1974_v45 = vsel %vm1693_vm0, %v1178_v9, 0.0  ;;  %v1183_v46 = vmul.f32 %v4869_v18, %v426_v28  ;;  %v445_v8 = vld [vmem:[%s4864_s20 + $0x778] sm:$0xff] }
  0x80   : > { %v1967_v44 = vadd.f32 %v1966_v25, %v1965_v32  ;;  %v1187_v48 = vmul.f32 %v4855_v12, %v430_v30  ;;  %v1979_v50 = vadd.f32 %v1978_v38, %v1181_v29  ;;  %v1188_v51 = vmul.f32 %v4857_v13, %v431_v35  ;;  %v444_v25 = vld [vmem:[%s4864_s20 + $0x770] sm:$0xff]  ;;  %v449_v31 = vld [vmem:[%s4864_s20 + $0x798] sm:$0xff]  ;;  %v451_v32 = vld [vmem:[%s4864_s20 + $0x7a8] sm:$0xff] }
  0x81   : > { %v1973_v49 = vadd.f32 %v1972_v37, %v1177_v26  ;;  %v1190_v52 = vmul.f32 %v4859_v14, %v433_v36  ;;  %v1986_v55 = vadd.f32 %v1186_v40, %v1185_v39  ;;  %v1191_v56 = vmul.f32 %v4851_v10, %v434_v41  ;;  %v448_v26 = vld [vmem:[%s4864_s20 + $0x790] sm:$0xff]  ;;  %v453_v38 = vld [vmem:[%s4864_s20 + $0x7b8] sm:$0xff] }
  0x82   : > { %1968 = vadd.xlane.f32.xlu0 %v1967_v44  ;;  %v1192_v57 = vmul.f32 %v4853_v11, %v435_v42  ;;  %v1193_v58 = vmul.f32 %v4855_v12, %v436_v43  ;;  %v1980_v63 = vadd.f32 %v1979_v50, %v1182_v33  ;;  %v1982_v0 = vsel %vm1693_vm0, %v1184_v34, 0.0  ;;  %v452_v37 = vld [vmem:[%s4864_s20 + $0x7b0] sm:$0xff]  ;;  %v450_v42 = vld [vmem:[%s4864_s20 + $0x7a0] sm:$0xff]  ;;  %v457_v50 = vld [vmem:[%s4864_s20 + $0x7d8] sm:$0xff] }
  0x83   : > { %v1975_v62 = vadd.f32 %v1974_v45, %v1973_v49  ;;  %v1189_v1 = vmul.f32 %v4869_v18, %v432_v47  ;;  %v1987_v3 = vadd.f32 %v1986_v55, %v1187_v48  ;;  %v1194_v4 = vmul.f32 %v4857_v13, %v437_v53  ;;  %v454_v44 = vld [vmem:[%s4864_s20 + $0x7c0] sm:$0xff]  ;;  %v455_v49 = vld [vmem:[%s4864_s20 + $0x7c8] sm:$0xff] }
  0x84   : > { %v1196_v5 = vmul.f32 %v4859_v14, %v439_v54  ;;  %v1994_v6 = vadd.f32 %v1192_v57, %v1191_v56  ;;  %v1981_v9 = vadd.f32 %v1980_v63, %v1183_v46  ;;  %v1197_v15 = vmul.f32 %v4851_v10, %v440_v59  ;;  %v458_v55 = vld [vmem:[%s4864_s20 + $0x7e0] sm:$0xff]  ;;  %v459_v56 = vld [vmem:[%s4864_s20 + $0x7e8] sm:$0xff]  ;;  %v460_v57 = vld [vmem:[%s4864_s20 + $0x7f0] sm:$0xff] }
  0x85   : > { %1976 = vadd.xlane.f32.xlu1 %v1975_v62  ;;  %v1198_v16 = vmul.f32 %v4853_v11, %v441_v60  ;;  %v1199_v17 = vmul.f32 %v4855_v12, %v442_v61  ;;  %v1988_v21 = vadd.f32 %v1987_v3, %v1188_v51  ;;  %v1990_v22 = vsel %vm1693_vm0, %v1190_v52, 0.0  ;;  %v456_v61 = vld [vmem:[%s4864_s20 + $0x7d0] sm:$0xff]  ;;  %v461_v3 = vld [vmem:[%s4864_s20 + $0x7f8] sm:$0xff] }
  0x86   : > { %v1195_v23 = vmul.f32 %v4869_v18, %v438_v2  ;;  %v1995_v24 = vadd.f32 %v1994_v6, %v1193_v58  ;;  %v1983_v27 = vadd.f32 %v1982_v0, %v1981_v9  ;;  %v1200_v28 = vmul.f32 %v4857_v13, %v443_v7  ;;  %v464_v9 = vld [vmem:[%s4864_s20 + $0x810] sm:$0xff] }
  0x87   : > { %v1202_v29 = vmul.f32 %v4859_v14, %v445_v8  ;;  %v2002_v30 = vadd.f32 %v1198_v16, %v1197_v15  ;;  %v1989_v33 = vadd.f32 %v1988_v21, %v1189_v1  ;;  %v1203_v35 = vmul.f32 %v4851_v10, %v446_v19  ;;  %v465_v15 = vld [vmem:[%s4864_s20 + $0x818] sm:$0xff]  ;;  %v466_v16 = vld [vmem:[%s4864_s20 + $0x820] sm:$0xff] }
  0x88   : > { %v1996_v34 = vadd.f32 %v1995_v24, %v1194_v4  ;;  %v1204_v36 = vmul.f32 %v4853_v11, %v447_v20  ;;  %1984 = vadd.xlane.f32.xlu0 %v1983_v27  ;;  %v1998_v39 = vsel %vm1693_vm0, %v1196_v5, 0.0  ;;  %v1201_v40 = vmul.f32 %v4869_v18, %v444_v25  ;;  %v463_v4 = vld [vmem:[%s4864_s20 + $0x808] sm:$0xff] }
  0x89   : > { %v2003_v41 = vadd.f32 %v2002_v30, %v1199_v17  ;;  %v1205_v43 = vmul.f32 %v4855_v12, %v448_v26  ;;  %v1991_v45 = vadd.f32 %v1990_v22, %v1989_v33  ;;  %v1206_v47 = vmul.f32 %v4857_v13, %v449_v31  ;;  %v462_v22 = vld [vmem:[%s4864_s20 + $0x800] sm:$0xff]  ;;  %v467_v27 = vld [vmem:[%s4864_s20 + $0x828] sm:$0xff] }
  0x8a   : > { %v1997_v46 = vadd.f32 %v1996_v34, %v1195_v23  ;;  %v1208_v48 = vmul.f32 %v4859_v14, %v451_v32  ;;  %v2010_v52 = vadd.f32 %v1204_v36, %v1203_v35  ;;  %v1209_v53 = vmul.f32 %v4851_v10, %v452_v37  ;;  %v470_v33 = vld [vmem:[%s4864_s20 + $0x840] sm:$0xff]  ;;  %v471_v34 = vld [vmem:[%s4864_s20 + $0x848] sm:$0xff] }
  0x8b   : > { %v2004_v51 = vadd.f32 %v2003_v41, %v1200_v28  ;;  %v1210_v54 = vmul.f32 %v4853_v11, %v453_v38  ;;  %1992 = vadd.xlane.f32.xlu1 %v1991_v45  ;;  %v2006_v59 = vsel %vm1693_vm0, %v1202_v29, 0.0  ;;  %v1207_v60 = vmul.f32 %v4869_v18, %v450_v42  ;;  %v469_v28 = vld [vmem:[%s4864_s20 + $0x838] sm:$0xff] }
  0x8c   : > { %v1999_v58 = vadd.f32 %v1998_v39, %v1997_v46  ;;  %v1211_v62 = vmul.f32 %v4855_v12, %v454_v44  ;;  %v2011_v0 = vadd.f32 %v2010_v52, %v1205_v43  ;;  %v1212_v1 = vmul.f32 %v4857_v13, %v455_v49  ;;  %v468_v39 = vld [vmem:[%s4864_s20 + $0x830] sm:$0xff]  ;;  %v473_v45 = vld [vmem:[%s4864_s20 + $0x858] sm:$0xff]  ;;  %v475_v46 = vld [vmem:[%s4864_s20 + $0x868] sm:$0xff] }
  0x8d   : > { %v2005_v63 = vadd.f32 %v2004_v51, %v1201_v40  ;;  %v1214_v2 = vmul.f32 %v4859_v14, %v457_v50  ;;  %v2018_v5 = vadd.f32 %v1210_v54, %v1209_v53  ;;  %v1215_v6 = vmul.f32 %v4851_v10, %v458_v55  ;;  %v472_v40 = vld [vmem:[%s4864_s20 + $0x850] sm:$0xff]  ;;  %v477_v52 = vld [vmem:[%s4864_s20 + $0x878] sm:$0xff] }
  0x8e   : > { %2000 = vadd.xlane.f32.xlu0 %v1999_v58  ;;  %v1216_v7 = vmul.f32 %v4853_v11, %v459_v56  ;;  %v1217_v8 = vmul.f32 %v4855_v12, %v460_v57  ;;  %v2012_v19 = vadd.f32 %v2011_v0, %v1206_v47  ;;  %v2014_v20 = vsel %vm1693_vm0, %v1208_v48, 0.0  ;;  %v476_v51 = vld [vmem:[%s4864_s20 + $0x870] sm:$0xff]  ;;  %v474_v56 = vld [vmem:[%s4864_s20 + $0x860] sm:$0xff]  ;;  %v481_v0 = vld [vmem:[%s4864_s20 + $0x898] sm:$0xff] }
  0x8f   : > { %v2007_v17 = vadd.f32 %v2006_v59, %v2005_v63  ;;  %v1213_v21 = vmul.f32 %v4869_v18, %v456_v61  ;;  %v2019_v23 = vadd.f32 %v2018_v5, %v1211_v62  ;;  %v1218_v24 = vmul.f32 %v4857_v13, %v461_v3  ;;  %v478_v58 = vld [vmem:[%s4864_s20 + $0x880] sm:$0xff]  ;;  %v479_v63 = vld [vmem:[%s4864_s20 + $0x888] sm:$0xff] }
  0x90   : > { %v1220_v25 = vmul.f32 %v4859_v14, %v463_v4  ;;  %v2026_v26 = vadd.f32 %v1216_v7, %v1215_v6  ;;  %v2013_v29 = vadd.f32 %v2012_v19, %v1207_v60  ;;  %v1221_v30 = vmul.f32 %v4851_v10, %v464_v9  ;;  %v482_v5 = vld [vmem:[%s4864_s20 + $0x8a0] sm:$0xff]  ;;  %v483_v6 = vld [vmem:[%s4864_s20 + $0x8a8] sm:$0xff]  ;;  %v484_v7 = vld [vmem:[%s4864_s20 + $0x8b0] sm:$0xff] }
  0x91   : > { %2008 = vadd.xlane.f32.xlu1 %v2007_v17  ;;  %v1222_v31 = vmul.f32 %v4853_v11, %v465_v15  ;;  %v1223_v32 = vmul.f32 %v4855_v12, %v466_v16  ;;  %v2020_v35 = vadd.f32 %v2019_v23, %v1212_v1  ;;  %v2022_v36 = vsel %vm1693_vm0, %v1214_v2, 0.0  ;;  %v480_v16 = vld [vmem:[%s4864_s20 + $0x890] sm:$0xff]  ;;  %v485_v23 = vld [vmem:[%s4864_s20 + $0x8b8] sm:$0xff] }
  0x92   : > { %v1219_v37 = vmul.f32 %v4869_v18, %v462_v22  ;;  %v2027_v38 = vadd.f32 %v2026_v26, %v1217_v8  ;;  %v2015_v41 = vadd.f32 %v2014_v20, %v2013_v29  ;;  %v1224_v42 = vmul.f32 %v4857_v13, %v467_v27  ;;  %v488_v29 = vld [vmem:[%s4864_s20 + $0x8d0] sm:$0xff] }
  0x93   : > { %v1226_v43 = vmul.f32 %v4859_v14, %v469_v28  ;;  %v2034_v44 = vadd.f32 %v1222_v31, %v1221_v30  ;;  %v2021_v47 = vadd.f32 %v2020_v35, %v1213_v21  ;;  %v1227_v49 = vmul.f32 %v4851_v10, %v470_v33  ;;  %v489_v30 = vld [vmem:[%s4864_s20 + $0x8d8] sm:$0xff]  ;;  %v490_v31 = vld [vmem:[%s4864_s20 + $0x8e0] sm:$0xff] }
  0x94   : > { %v2028_v48 = vadd.f32 %v2027_v38, %v1218_v24  ;;  %v1228_v50 = vmul.f32 %v4853_v11, %v471_v34  ;;  %2016 = vadd.xlane.f32.xlu0 %v2015_v41  ;;  %v2030_v53 = vsel %vm1693_vm0, %v1220_v25, 0.0  ;;  %v1225_v54 = vmul.f32 %v4869_v18, %v468_v39  ;;  %v487_v24 = vld [vmem:[%s4864_s20 + $0x8c8] sm:$0xff] }
  0x95   : > { %v2035_v55 = vadd.f32 %v2034_v44, %v1223_v32  ;;  %v1229_v57 = vmul.f32 %v4855_v12, %v472_v40  ;;  %v2023_v59 = vadd.f32 %v2022_v36, %v2021_v47  ;;  %v1230_v61 = vmul.f32 %v4857_v13, %v473_v45  ;;  %v486_v36 = vld [vmem:[%s4864_s20 + $0x8c0] sm:$0xff]  ;;  %v491_v41 = vld [vmem:[%s4864_s20 + $0x8e8] sm:$0xff] }
  0x96   : > { %v2029_v60 = vadd.f32 %v2028_v48, %v1219_v37  ;;  %v1232_v62 = vmul.f32 %v4859_v14, %v475_v46  ;;  %v2042_v2 = vadd.f32 %v1228_v50, %v1227_v49  ;;  %v1233_v3 = vmul.f32 %v4851_v10, %v476_v51  ;;  %v494_v47 = vld [vmem:[%s4864_s20 + $0x900] sm:$0xff]  ;;  %v495_v48 = vld [vmem:[%s4864_s20 + $0x908] sm:$0xff] }
  0x97   : > { %v2036_v1 = vadd.f32 %v2035_v55, %v1224_v42  ;;  %v1234_v4 = vmul.f32 %v4853_v11, %v477_v52  ;;  %2024 = vadd.xlane.f32.xlu1 %v2023_v59  ;;  %v2038_v9 = vsel %vm1693_vm0, %v1226_v43, 0.0  ;;  %v1231_v15 = vmul.f32 %v4869_v18, %v474_v56  ;;  %v493_v42 = vld [vmem:[%s4864_s20 + $0x8f8] sm:$0xff] }
  0x98   : > { %v2031_v8 = vadd.f32 %v2030_v53, %v2029_v60  ;;  %v1235_v17 = vmul.f32 %v4855_v12, %v478_v58  ;;  %v2043_v20 = vadd.f32 %v2042_v2, %v1229_v57  ;;  %v1236_v21 = vmul.f32 %v4857_v13, %v479_v63  ;;  %v492_v53 = vld [vmem:[%s4864_s20 + $0x8f0] sm:$0xff]  ;;  %v497_v59 = vld [vmem:[%s4864_s20 + $0x918] sm:$0xff]  ;;  %v499_v60 = vld [vmem:[%s4864_s20 + $0x928] sm:$0xff] }
  0x99   : > { %v2037_v19 = vadd.f32 %v2036_v1, %v1225_v54  ;;  %v1238_v22 = vmul.f32 %v4859_v14, %v481_v0  ;;  %v2050_v25 = vadd.f32 %v1234_v4, %v1233_v3  ;;  %v1239_v26 = vmul.f32 %v4851_v10, %v482_v5  ;;  %v496_v54 = vld [vmem:[%s4864_s20 + $0x910] sm:$0xff]  ;;  %v501_v2 = vld [vmem:[%s4864_s20 + $0x938] sm:$0xff] }
  0x9a   : > { %2032 = vadd.xlane.f32.xlu0 %v2031_v8  ;;  %v1240_v27 = vmul.f32 %v4853_v11, %v483_v6  ;;  %v1241_v28 = vmul.f32 %v4855_v12, %v484_v7  ;;  %v2044_v33 = vadd.f32 %v2043_v20, %v1230_v61  ;;  %v2046_v34 = vsel %vm1693_vm0, %v1232_v62, 0.0  ;;  %v500_v1 = vld [vmem:[%s4864_s20 + $0x930] sm:$0xff]  ;;  %v498_v6 = vld [vmem:[%s4864_s20 + $0x920] sm:$0xff]  ;;  %v505_v20 = vld [vmem:[%s4864_s20 + $0x958] sm:$0xff] }
  0x9b   : > { %v2039_v32 = vadd.f32 %v2038_v9, %v2037_v19  ;;  %v1237_v35 = vmul.f32 %v4869_v18, %v480_v16  ;;  %v2051_v37 = vadd.f32 %v2050_v25, %v1235_v17  ;;  %v1242_v38 = vmul.f32 %v4857_v13, %v485_v23  ;;  %v502_v8 = vld [vmem:[%s4864_s20 + $0x940] sm:$0xff]  ;;  %v503_v19 = vld [vmem:[%s4864_s20 + $0x948] sm:$0xff] }
  0x9c   : > { %v1244_v39 = vmul.f32 %v4859_v14, %v487_v24  ;;  %v2058_v40 = vadd.f32 %v1240_v27, %v1239_v26  ;;  %v2045_v43 = vadd.f32 %v2044_v33, %v1231_v15  ;;  %v1245_v44 = vmul.f32 %v4851_v10, %v488_v29  ;;  %v506_v25 = vld [vmem:[%s4864_s20 + $0x960] sm:$0xff]  ;;  %v507_v26 = vld [vmem:[%s4864_s20 + $0x968] sm:$0xff]  ;;  %v508_v27 = vld [vmem:[%s4864_s20 + $0x970] sm:$0xff] }
  0x9d   : > { %2040 = vadd.xlane.f32.xlu1 %v2039_v32  ;;  %v1246_v45 = vmul.f32 %v4853_v11, %v489_v30  ;;  %v1247_v46 = vmul.f32 %v4855_v12, %v490_v31  ;;  %v2052_v49 = vadd.f32 %v2051_v37, %v1236_v21  ;;  %v2054_v50 = vsel %vm1693_vm0, %v1238_v22, 0.0  ;;  %v504_v31 = vld [vmem:[%s4864_s20 + $0x950] sm:$0xff]  ;;  %v509_v37 = vld [vmem:[%s4864_s20 + $0x978] sm:$0xff] }
  0x9e   : > { %v1243_v51 = vmul.f32 %v4869_v18, %v486_v36  ;;  %v2059_v52 = vadd.f32 %v2058_v40, %v1241_v28  ;;  %v2047_v55 = vadd.f32 %v2046_v34, %v2045_v43  ;;  %v1248_v56 = vmul.f32 %v4857_v13, %v491_v41  ;;  %v512_v43 = vld [vmem:[%s4864_s20 + $0x990] sm:$0xff] }
  0x9f   : > { %v1250_v57 = vmul.f32 %v4859_v14, %v493_v42  ;;  %v2066_v58 = vadd.f32 %v1246_v45, %v1245_v44  ;;  %v2053_v61 = vadd.f32 %v2052_v49, %v1237_v35  ;;  %v1251_v63 = vmul.f32 %v4851_v10, %v494_v47  ;;  %v513_v44 = vld [vmem:[%s4864_s20 + $0x998] sm:$0xff]  ;;  %v514_v45 = vld [vmem:[%s4864_s20 + $0x9a0] sm:$0xff] }
  0xa0   : > { %v2060_v62 = vadd.f32 %v2059_v52, %v1242_v38  ;;  %v1252_v0 = vmul.f32 %v4853_v11, %v495_v48  ;;  %2048 = vadd.xlane.f32.xlu0 %v2047_v55  ;;  %v2062_v3 = vsel %vm1693_vm0, %v1244_v39, 0.0  ;;  %v1249_v4 = vmul.f32 %v4869_v18, %v492_v53  ;;  %v511_v38 = vld [vmem:[%s4864_s20 + $0x988] sm:$0xff] }
  0xa1   : > { %v2067_v5 = vadd.f32 %v2066_v58, %v1247_v46  ;;  %v1253_v7 = vmul.f32 %v4855_v12, %v496_v54  ;;  %v2055_v9 = vadd.f32 %v2054_v50, %v2053_v61  ;;  %v1254_v16 = vmul.f32 %v4857_v13, %v497_v59  ;;  %v510_v50 = vld [vmem:[%s4864_s20 + $0x980] sm:$0xff]  ;;  %v515_v55 = vld [vmem:[%s4864_s20 + $0x9a8] sm:$0xff] }
  0xa2   : > { %v2061_v15 = vadd.f32 %v2060_v62, %v1243_v51  ;;  %v1256_v17 = vmul.f32 %v4859_v14, %v499_v60  ;;  %v2074_v22 = vadd.f32 %v1252_v0, %v1251_v63  ;;  %v1257_v23 = vmul.f32 %v4851_v10, %v500_v1  ;;  %v518_v61 = vld [vmem:[%s4864_s20 + $0x9c0] sm:$0xff]  ;;  %v519_v62 = vld [vmem:[%s4864_s20 + $0x9c8] sm:$0xff] }
  0xa3   : > { %v2068_v21 = vadd.f32 %v2067_v5, %v1248_v56  ;;  %v1258_v24 = vmul.f32 %v4853_v11, %v501_v2  ;;  %2056 = vadd.xlane.f32.xlu1 %v2055_v9  ;;  %v2070_v29 = vsel %vm1693_vm0, %v1250_v57, 0.0  ;;  %v1255_v30 = vmul.f32 %v4869_v18, %v498_v6  ;;  %v517_v56 = vld [vmem:[%s4864_s20 + $0x9b8] sm:$0xff] }
  0xa4   : > { %v2063_v28 = vadd.f32 %v2062_v3, %v2061_v15  ;;  %v1259_v32 = vmul.f32 %v4855_v12, %v502_v8  ;;  %v2075_v34 = vadd.f32 %v2074_v22, %v1253_v7  ;;  %v1260_v35 = vmul.f32 %v4857_v13, %v503_v19  ;;  %v516_v3 = vld [vmem:[%s4864_s20 + $0x9b0] sm:$0xff]  ;;  %v521_v9 = vld [vmem:[%s4864_s20 + $0x9d8] sm:$0xff]  ;;  %v523_v15 = vld [vmem:[%s4864_s20 + $0x9e8] sm:$0xff] }
  0xa5   : > { %v2069_v33 = vadd.f32 %v2068_v21, %v1249_v4  ;;  %v1262_v36 = vmul.f32 %v4859_v14, %v505_v20  ;;  %v2082_v39 = vadd.f32 %v1258_v24, %v1257_v23  ;;  %v1263_v40 = vmul.f32 %v4851_v10, %v506_v25  ;;  %v520_v4 = vld [vmem:[%s4864_s20 + $0x9d0] sm:$0xff]  ;;  %v525_v22 = vld [vmem:[%s4864_s20 + $0x9f8] sm:$0xff] }
  0xa6   : > { %2064 = vadd.xlane.f32.xlu0 %v2063_v28  ;;  %v1264_v41 = vmul.f32 %v4853_v11, %v507_v26  ;;  %v1265_v42 = vmul.f32 %v4855_v12, %v508_v27  ;;  %v2076_v47 = vadd.f32 %v2075_v34, %v1254_v16  ;;  %v2078_v48 = vsel %vm1693_vm0, %v1256_v17, 0.0  ;;  %v524_v21 = vld [vmem:[%s4864_s20 + $0x9f0] sm:$0xff]  ;;  %v522_v26 = vld [vmem:[%s4864_s20 + $0x9e0] sm:$0xff]  ;;  %v529_v34 = vld [vmem:[%s4864_s20 + $0xa18] sm:$0xff] }
  0xa7   : > { %v2071_v46 = vadd.f32 %v2070_v29, %v2069_v33  ;;  %v1261_v49 = vmul.f32 %v4869_v18, %v504_v31  ;;  %v2083_v51 = vadd.f32 %v2082_v39, %v1259_v32  ;;  %v1266_v52 = vmul.f32 %v4857_v13, %v509_v37  ;;  %v526_v28 = vld [vmem:[%s4864_s20 + $0xa00] sm:$0xff]  ;;  %v527_v33 = vld [vmem:[%s4864_s20 + $0xa08] sm:$0xff] }
  0xa8   : > { %v1268_v53 = vmul.f32 %v4859_v14, %v511_v38  ;;  %v2090_v54 = vadd.f32 %v1264_v41, %v1263_v40  ;;  %v2077_v57 = vadd.f32 %v2076_v47, %v1255_v30  ;;  %v1269_v58 = vmul.f32 %v4851_v10, %v512_v43  ;;  %v530_v39 = vld [vmem:[%s4864_s20 + $0xa20] sm:$0xff]  ;;  %v531_v40 = vld [vmem:[%s4864_s20 + $0xa28] sm:$0xff]  ;;  %v532_v41 = vld [vmem:[%s4864_s20 + $0xa30] sm:$0xff] }
  0xa9   : > { %2072 = vadd.xlane.f32.xlu1 %v2071_v46  ;;  %v1270_v59 = vmul.f32 %v4853_v11, %v513_v44  ;;  %v1271_v60 = vmul.f32 %v4855_v12, %v514_v45  ;;  %v2084_v63 = vadd.f32 %v2083_v51, %v1260_v35  ;;  %v2086_v0 = vsel %vm1693_vm0, %v1262_v36, 0.0  ;;  %v528_v45 = vld [vmem:[%s4864_s20 + $0xa10] sm:$0xff]  ;;  %v533_v51 = vld [vmem:[%s4864_s20 + $0xa38] sm:$0xff] }
  0xaa   : > { %v1267_v1 = vmul.f32 %v4869_v18, %v510_v50  ;;  %v2091_v2 = vadd.f32 %v2090_v54, %v1265_v42  ;;  %v2079_v5 = vadd.f32 %v2078_v48, %v2077_v57  ;;  %v1272_v6 = vmul.f32 %v4857_v13, %v515_v55  ;;  %v536_v57 = vld [vmem:[%s4864_s20 + $0xa50] sm:$0xff] }
  0xab   : > { %v1274_v7 = vmul.f32 %v4859_v14, %v517_v56  ;;  %v2098_v8 = vadd.f32 %v1270_v59, %v1269_v58  ;;  %v2085_v16 = vadd.f32 %v2084_v63, %v1261_v49  ;;  %v1275_v19 = vmul.f32 %v4851_v10, %v518_v61  ;;  %v537_v58 = vld [vmem:[%s4864_s20 + $0xa58] sm:$0xff]  ;;  %v538_v59 = vld [vmem:[%s4864_s20 + $0xa60] sm:$0xff] }
  0xac   : > { %v2092_v17 = vadd.f32 %v2091_v2, %v1266_v52  ;;  %v1276_v20 = vmul.f32 %v4853_v11, %v519_v62  ;;  %2080 = vadd.xlane.f32.xlu0 %v2079_v5  ;;  %v2094_v23 = vsel %vm1693_vm0, %v1268_v53, 0.0  ;;  %v1273_v24 = vmul.f32 %v4869_v18, %v516_v3  ;;  %v535_v52 = vld [vmem:[%s4864_s20 + $0xa48] sm:$0xff] }
  0xad   : > { %v2099_v25 = vadd.f32 %v2098_v8, %v1271_v60  ;;  %v1277_v27 = vmul.f32 %v4855_v12, %v520_v4  ;;  %v2087_v29 = vadd.f32 %v2086_v0, %v2085_v16  ;;  %v1278_v31 = vmul.f32 %v4857_v13, %v521_v9  ;;  %v534_v0 = vld [vmem:[%s4864_s20 + $0xa40] sm:$0xff]  ;;  %v539_v5 = vld [vmem:[%s4864_s20 + $0xa68] sm:$0xff] }
  0xae   : > { %v2093_v30 = vadd.f32 %v2092_v17, %v1267_v1  ;;  %v1280_v32 = vmul.f32 %v4859_v14, %v523_v15  ;;  %v2106_v36 = vadd.f32 %v1276_v20, %v1275_v19  ;;  %v1281_v37 = vmul.f32 %v4851_v10, %v524_v21  ;;  %v542_v16 = vld [vmem:[%s4864_s20 + $0xa80] sm:$0xff]  ;;  %v543_v17 = vld [vmem:[%s4864_s20 + $0xa88] sm:$0xff] }
  0xaf   : > { %v2100_v35 = vadd.f32 %v2099_v25, %v1272_v6  ;;  %v1282_v38 = vmul.f32 %v4853_v11, %v525_v22  ;;  %2088 = vadd.xlane.f32.xlu1 %v2087_v29  ;;  %v2102_v43 = vsel %vm1693_vm0, %v1274_v7, 0.0  ;;  %v1279_v44 = vmul.f32 %v4869_v18, %v522_v26  ;;  %v541_v6 = vld [vmem:[%s4864_s20 + $0xa78] sm:$0xff] }
  0xb0   : > { %v2095_v42 = vadd.f32 %v2094_v23, %v2093_v30  ;;  %v1283_v46 = vmul.f32 %v4855_v12, %v526_v28  ;;  %v2107_v48 = vadd.f32 %v2106_v36, %v1277_v27  ;;  %v1284_v49 = vmul.f32 %v4857_v13, %v527_v33  ;;  %v540_v23 = vld [vmem:[%s4864_s20 + $0xa70] sm:$0xff]  ;;  %v545_v29 = vld [vmem:[%s4864_s20 + $0xa98] sm:$0xff]  ;;  %v547_v30 = vld [vmem:[%s4864_s20 + $0xaa8] sm:$0xff] }
  0xb1   : > { %v2101_v47 = vadd.f32 %v2100_v35, %v1273_v24  ;;  %v1286_v50 = vmul.f32 %v4859_v14, %v529_v34  ;;  %v2114_v53 = vadd.f32 %v1282_v38, %v1281_v37  ;;  %v1287_v54 = vmul.f32 %v4851_v10, %v530_v39  ;;  %v544_v24 = vld [vmem:[%s4864_s20 + $0xa90] sm:$0xff]  ;;  %v549_v36 = vld [vmem:[%s4864_s20 + $0xab8] sm:$0xff] }
  0xb2   : > { %2096 = vadd.xlane.f32.xlu0 %v2095_v42  ;;  %v1288_v55 = vmul.f32 %v4853_v11, %v531_v40  ;;  %v1289_v56 = vmul.f32 %v4855_v12, %v532_v41  ;;  %v2108_v61 = vadd.f32 %v2107_v48, %v1278_v31  ;;  %v2110_v62 = vsel %vm1693_vm0, %v1280_v32, 0.0  ;;  %v548_v35 = vld [vmem:[%s4864_s20 + $0xab0] sm:$0xff]  ;;  %v546_v40 = vld [vmem:[%s4864_s20 + $0xaa0] sm:$0xff]  ;;  %v553_v48 = vld [vmem:[%s4864_s20 + $0xad8] sm:$0xff] }
  0xb3   : > { %v2103_v60 = vadd.f32 %v2102_v43, %v2101_v47  ;;  %v1285_v63 = vmul.f32 %v4869_v18, %v528_v45  ;;  %v2115_v1 = vadd.f32 %v2114_v53, %v1283_v46  ;;  %v1290_v2 = vmul.f32 %v4857_v13, %v533_v51  ;;  %v550_v42 = vld [vmem:[%s4864_s20 + $0xac0] sm:$0xff]  ;;  %v551_v47 = vld [vmem:[%s4864_s20 + $0xac8] sm:$0xff] }
  0xb4   : > { %v1292_v3 = vmul.f32 %v4859_v14, %v535_v52  ;;  %v2122_v4 = vadd.f32 %v1288_v55, %v1287_v54  ;;  %v2109_v7 = vadd.f32 %v2108_v61, %v1279_v44  ;;  %v1293_v8 = vmul.f32 %v4851_v10, %v536_v57  ;;  %v554_v53 = vld [vmem:[%s4864_s20 + $0xae0] sm:$0xff]  ;;  %v555_v54 = vld [vmem:[%s4864_s20 + $0xae8] sm:$0xff]  ;;  %v556_v55 = vld [vmem:[%s4864_s20 + $0xaf0] sm:$0xff] }
  0xb5   : > { %2104 = vadd.xlane.f32.xlu1 %v2103_v60  ;;  %v1294_v9 = vmul.f32 %v4853_v11, %v537_v58  ;;  %v1295_v15 = vmul.f32 %v4855_v12, %v538_v59  ;;  %v2116_v19 = vadd.f32 %v2115_v1, %v1284_v49  ;;  %v2118_v20 = vsel %vm1693_vm0, %v1286_v50, 0.0  ;;  %v552_v59 = vld [vmem:[%s4864_s20 + $0xad0] sm:$0xff]  ;;  %v557_v1 = vld [vmem:[%s4864_s20 + $0xaf8] sm:$0xff] }
  0xb6   : > { %v1291_v21 = vmul.f32 %v4869_v18, %v534_v0  ;;  %v2123_v22 = vadd.f32 %v2122_v4, %v1289_v56  ;;  %v2111_v25 = vadd.f32 %v2110_v62, %v2109_v7  ;;  %v1296_v26 = vmul.f32 %v4857_v13, %v539_v5  ;;  %v560_v7 = vld [vmem:[%s4864_s20 + $0xb10] sm:$0xff] }
  0xb7   : > { %v1298_v27 = vmul.f32 %v4859_v14, %v541_v6  ;;  %v2130_v28 = vadd.f32 %v1294_v9, %v1293_v8  ;;  %v2117_v31 = vadd.f32 %v2116_v19, %v1285_v63  ;;  %v1299_v33 = vmul.f32 %v4851_v10, %v542_v16  ;;  %v561_v8 = vld [vmem:[%s4864_s20 + $0xb18] sm:$0xff]  ;;  %v562_v9 = vld [vmem:[%s4864_s20 + $0xb20] sm:$0xff] }
  0xb8   : > { %v2124_v32 = vadd.f32 %v2123_v22, %v1290_v2  ;;  %v1300_v34 = vmul.f32 %v4853_v11, %v543_v17  ;;  %2112 = vadd.xlane.f32.xlu0 %v2111_v25  ;;  %v2126_v37 = vsel %vm1693_vm0, %v1292_v3, 0.0  ;;  %v1297_v38 = vmul.f32 %v4869_v18, %v540_v23  ;;  %v559_v2 = vld [vmem:[%s4864_s20 + $0xb08] sm:$0xff] }
  0xb9   : > { %v2131_v39 = vadd.f32 %v2130_v28, %v1295_v15  ;;  %v1301_v41 = vmul.f32 %v4855_v12, %v544_v24  ;;  %v2119_v43 = vadd.f32 %v2118_v20, %v2117_v31  ;;  %v1302_v45 = vmul.f32 %v4857_v13, %v545_v29  ;;  %v558_v20 = vld [vmem:[%s4864_s20 + $0xb00] sm:$0xff]  ;;  %v563_v25 = vld [vmem:[%s4864_s20 + $0xb28] sm:$0xff] }
  0xba   : > { %v2125_v44 = vadd.f32 %v2124_v32, %v1291_v21  ;;  %v1304_v46 = vmul.f32 %v4859_v14, %v547_v30  ;;  %v2138_v50 = vadd.f32 %v1300_v34, %v1299_v33  ;;  %v1305_v51 = vmul.f32 %v4851_v10, %v548_v35  ;;  %v566_v31 = vld [vmem:[%s4864_s20 + $0xb40] sm:$0xff]  ;;  %v567_v32 = vld [vmem:[%s4864_s20 + $0xb48] sm:$0xff] }
  0xbb   : > { %v2132_v49 = vadd.f32 %v2131_v39, %v1296_v26  ;;  %v1306_v52 = vmul.f32 %v4853_v11, %v549_v36  ;;  %2120 = vadd.xlane.f32.xlu1 %v2119_v43  ;;  %v2134_v57 = vsel %vm1693_vm0, %v1298_v27, 0.0  ;;  %v1303_v58 = vmul.f32 %v4869_v18, %v546_v40  ;;  %v565_v26 = vld [vmem:[%s4864_s20 + $0xb38] sm:$0xff] }
  0xbc   : > { %v2127_v56 = vadd.f32 %v2126_v37, %v2125_v44  ;;  %v1307_v60 = vmul.f32 %v4855_v12, %v550_v42  ;;  %v2139_v62 = vadd.f32 %v2138_v50, %v1301_v41  ;;  %v1308_v63 = vmul.f32 %v4857_v13, %v551_v47  ;;  %v564_v37 = vld [vmem:[%s4864_s20 + $0xb30] sm:$0xff]  ;;  %v569_v43 = vld [vmem:[%s4864_s20 + $0xb58] sm:$0xff]  ;;  %v571_v44 = vld [vmem:[%s4864_s20 + $0xb68] sm:$0xff] }
  0xbd   : > { %v2133_v61 = vadd.f32 %v2132_v49, %v1297_v38  ;;  %v1310_v0 = vmul.f32 %v4859_v14, %v553_v48  ;;  %v2146_v3 = vadd.f32 %v1306_v52, %v1305_v51  ;;  %v1311_v4 = vmul.f32 %v4851_v10, %v554_v53  ;;  %v568_v38 = vld [vmem:[%s4864_s20 + $0xb50] sm:$0xff]  ;;  %v573_v50 = vld [vmem:[%s4864_s20 + $0xb78] sm:$0xff] }
  0xbe   : > { %2128 = vadd.xlane.f32.xlu0 %v2127_v56  ;;  %v1312_v5 = vmul.f32 %v4853_v11, %v555_v54  ;;  %v1313_v6 = vmul.f32 %v4855_v12, %v556_v55  ;;  %v2140_v16 = vadd.f32 %v2139_v62, %v1302_v45  ;;  %v2142_v17 = vsel %vm1693_vm0, %v1304_v46, 0.0  ;;  %v572_v49 = vld [vmem:[%s4864_s20 + $0xb70] sm:$0xff]  ;;  %v570_v54 = vld [vmem:[%s4864_s20 + $0xb60] sm:$0xff]  ;;  %v577_v62 = vld [vmem:[%s4864_s20 + $0xb98] sm:$0xff] }
  0xbf   : > { %v2135_v15 = vadd.f32 %v2134_v57, %v2133_v61  ;;  %v1309_v19 = vmul.f32 %v4869_v18, %v552_v59  ;;  %v2147_v21 = vadd.f32 %v2146_v3, %v1307_v60  ;;  %v1314_v22 = vmul.f32 %v4857_v13, %v557_v1  ;;  %v574_v56 = vld [vmem:[%s4864_s20 + $0xb80] sm:$0xff]  ;;  %v575_v61 = vld [vmem:[%s4864_s20 + $0xb88] sm:$0xff] }
  0xc0   : > { %v1316_v23 = vmul.f32 %v4859_v14, %v559_v2  ;;  %v2154_v24 = vadd.f32 %v1312_v5, %v1311_v4  ;;  %v2141_v27 = vadd.f32 %v2140_v16, %v1303_v58  ;;  %v1317_v28 = vmul.f32 %v4851_v10, %v560_v7  ;;  %v578_v3 = vld [vmem:[%s4864_s20 + $0xba0] sm:$0xff]  ;;  %v579_v4 = vld [vmem:[%s4864_s20 + $0xba8] sm:$0xff]  ;;  %v580_v5 = vld [vmem:[%s4864_s20 + $0xbb0] sm:$0xff] }
  0xc1   : > { %2136 = vadd.xlane.f32.xlu1 %v2135_v15  ;;  %v1318_v29 = vmul.f32 %v4853_v11, %v561_v8  ;;  %v1319_v30 = vmul.f32 %v4855_v12, %v562_v9  ;;  %v2148_v33 = vadd.f32 %v2147_v21, %v1308_v63  ;;  %v2150_v34 = vsel %vm1693_vm0, %v1310_v0, 0.0  ;;  %v576_v9 = vld [vmem:[%s4864_s20 + $0xb90] sm:$0xff]  ;;  %v581_v21 = vld [vmem:[%s4864_s20 + $0xbb8] sm:$0xff] }
  0xc2   : > { %v1315_v35 = vmul.f32 %v4869_v18, %v558_v20  ;;  %v2155_v36 = vadd.f32 %v2154_v24, %v1313_v6  ;;  %v2143_v39 = vadd.f32 %v2142_v17, %v2141_v27  ;;  %v1320_v40 = vmul.f32 %v4857_v13, %v563_v25  ;;  %v584_v27 = vld [vmem:[%s4864_s20 + $0xbd0] sm:$0xff] }
  0xc3   : > { %v1322_v41 = vmul.f32 %v4859_v14, %v565_v26  ;;  %v2162_v42 = vadd.f32 %v1318_v29, %v1317_v28  ;;  %v2149_v45 = vadd.f32 %v2148_v33, %v1309_v19  ;;  %v1323_v47 = vmul.f32 %v4851_v10, %v566_v31  ;;  %v585_v28 = vld [vmem:[%s4864_s20 + $0xbd8] sm:$0xff]  ;;  %v586_v29 = vld [vmem:[%s4864_s20 + $0xbe0] sm:$0xff] }
  0xc4   : > { %v2156_v46 = vadd.f32 %v2155_v36, %v1314_v22  ;;  %v1324_v48 = vmul.f32 %v4853_v11, %v567_v32  ;;  %2144 = vadd.xlane.f32.xlu0 %v2143_v39  ;;  %v2158_v51 = vsel %vm1693_vm0, %v1316_v23, 0.0  ;;  %v1321_v52 = vmul.f32 %v4869_v18, %v564_v37  ;;  %v583_v22 = vld [vmem:[%s4864_s20 + $0xbc8] sm:$0xff] }
  0xc5   : > { %v2163_v53 = vadd.f32 %v2162_v42, %v1319_v30  ;;  %v1325_v55 = vmul.f32 %v4855_v12, %v568_v38  ;;  %v2151_v57 = vadd.f32 %v2150_v34, %v2149_v45  ;;  %v1326_v59 = vmul.f32 %v4857_v13, %v569_v43  ;;  %v582_v34 = vld [vmem:[%s4864_s20 + $0xbc0] sm:$0xff]  ;;  %v587_v39 = vld [vmem:[%s4864_s20 + $0xbe8] sm:$0xff] }
  0xc6   : > { %v2157_v58 = vadd.f32 %v2156_v46, %v1315_v35  ;;  %v1328_v60 = vmul.f32 %v4859_v14, %v571_v44  ;;  %v2170_v0 = vadd.f32 %v1324_v48, %v1323_v47  ;;  %v1329_v1 = vmul.f32 %v4851_v10, %v572_v49  ;;  %v590_v45 = vld [vmem:[%s4864_s20 + $0xc00] sm:$0xff]  ;;  %v591_v46 = vld [vmem:[%s4864_s20 + $0xc08] sm:$0xff] }
  0xc7   : > { %v2164_v63 = vadd.f32 %v2163_v53, %v1320_v40  ;;  %v1330_v2 = vmul.f32 %v4853_v11, %v573_v50  ;;  %2152 = vadd.xlane.f32.xlu1 %v2151_v57  ;;  %v2166_v7 = vsel %vm1693_vm0, %v1322_v41, 0.0  ;;  %v1327_v8 = vmul.f32 %v4869_v18, %v570_v54  ;;  %v589_v40 = vld [vmem:[%s4864_s20 + $0xbf8] sm:$0xff] }
  0xc8   : > { %v2159_v6 = vadd.f32 %v2158_v51, %v2157_v58  ;;  %v1331_v15 = vmul.f32 %v4855_v12, %v574_v56  ;;  %v2171_v17 = vadd.f32 %v2170_v0, %v1325_v55  ;;  %v1332_v19 = vmul.f32 %v4857_v13, %v575_v61  ;;  %v588_v51 = vld [vmem:[%s4864_s20 + $0xbf0] sm:$0xff]  ;;  %v593_v57 = vld [vmem:[%s4864_s20 + $0xc18] sm:$0xff]  ;;  %v595_v58 = vld [vmem:[%s4864_s20 + $0xc28] sm:$0xff] }
  0xc9   : > { %v2165_v16 = vadd.f32 %v2164_v63, %v1321_v52  ;;  %v1334_v20 = vmul.f32 %v4859_v14, %v577_v62  ;;  %v2178_v23 = vadd.f32 %v1330_v2, %v1329_v1  ;;  %v1335_v24 = vmul.f32 %v4851_v10, %v578_v3  ;;  %v592_v52 = vld [vmem:[%s4864_s20 + $0xc10] sm:$0xff]  ;;  %v597_v0 = vld [vmem:[%s4864_s20 + $0xc38] sm:$0xff] }
  0xca   : > { %2160 = vadd.xlane.f32.xlu0 %v2159_v6  ;;  %v1336_v25 = vmul.f32 %v4853_v11, %v579_v4  ;;  %v1337_v26 = vmul.f32 %v4855_v12, %v580_v5  ;;  %v2172_v31 = vadd.f32 %v2171_v17, %v1326_v59  ;;  %v2174_v32 = vsel %vm1693_vm0, %v1328_v60, 0.0  ;;  %v596_v63 = vld [vmem:[%s4864_s20 + $0xc30] sm:$0xff]  ;;  %v594_v4 = vld [vmem:[%s4864_s20 + $0xc20] sm:$0xff]  ;;  %v601_v17 = vld [vmem:[%s4864_s20 + $0xc58] sm:$0xff] }
  0xcb   : > { %v2167_v30 = vadd.f32 %v2166_v7, %v2165_v16  ;;  %v1333_v33 = vmul.f32 %v4869_v18, %v576_v9  ;;  %v2179_v35 = vadd.f32 %v2178_v23, %v1331_v15  ;;  %v1338_v36 = vmul.f32 %v4857_v13, %v581_v21  ;;  %v598_v6 = vld [vmem:[%s4864_s20 + $0xc40] sm:$0xff]  ;;  %v599_v16 = vld [vmem:[%s4864_s20 + $0xc48] sm:$0xff] }
  0xcc   : > { %v1340_v37 = vmul.f32 %v4859_v14, %v583_v22  ;;  %v2186_v38 = vadd.f32 %v1336_v25, %v1335_v24  ;;  %v2173_v41 = vadd.f32 %v2172_v31, %v1327_v8  ;;  %v1341_v42 = vmul.f32 %v4851_v10, %v584_v27  ;;  %v602_v23 = vld [vmem:[%s4864_s20 + $0xc60] sm:$0xff]  ;;  %v603_v24 = vld [vmem:[%s4864_s20 + $0xc68] sm:$0xff]  ;;  %v604_v25 = vld [vmem:[%s4864_s20 + $0xc70] sm:$0xff] }
  0xcd   : > { %2168 = vadd.xlane.f32.xlu1 %v2167_v30  ;;  %v1342_v43 = vmul.f32 %v4853_v11, %v585_v28  ;;  %v1343_v44 = vmul.f32 %v4855_v12, %v586_v29  ;;  %v2180_v47 = vadd.f32 %v2179_v35, %v1332_v19  ;;  %v2182_v48 = vsel %vm1693_vm0, %v1334_v20, 0.0  ;;  %v600_v29 = vld [vmem:[%s4864_s20 + $0xc50] sm:$0xff]  ;;  %v605_v35 = vld [vmem:[%s4864_s20 + $0xc78] sm:$0xff] }
  0xce   : > { %v1339_v49 = vmul.f32 %v4869_v18, %v582_v34  ;;  %v2187_v50 = vadd.f32 %v2186_v38, %v1337_v26  ;;  %v2175_v53 = vadd.f32 %v2174_v32, %v2173_v41  ;;  %v1344_v54 = vmul.f32 %v4857_v13, %v587_v39  ;;  %v608_v41 = vld [vmem:[%s4864_s20 + $0xc90] sm:$0xff] }
  0xcf   : > { %v1346_v55 = vmul.f32 %v4859_v14, %v589_v40  ;;  %v2194_v56 = vadd.f32 %v1342_v43, %v1341_v42  ;;  %v2181_v59 = vadd.f32 %v2180_v47, %v1333_v33  ;;  %v1347_v61 = vmul.f32 %v4851_v10, %v590_v45  ;;  %v609_v42 = vld [vmem:[%s4864_s20 + $0xc98] sm:$0xff]  ;;  %v610_v43 = vld [vmem:[%s4864_s20 + $0xca0] sm:$0xff] }
  0xd0   : > { %v2188_v60 = vadd.f32 %v2187_v50, %v1338_v36  ;;  %v1348_v62 = vmul.f32 %v4853_v11, %v591_v46  ;;  %2176 = vadd.xlane.f32.xlu0 %v2175_v53  ;;  %v2190_v1 = vsel %vm1693_vm0, %v1340_v37, 0.0  ;;  %v1345_v2 = vmul.f32 %v4869_v18, %v588_v51  ;;  %v607_v36 = vld [vmem:[%s4864_s20 + $0xc88] sm:$0xff] }
  0xd1   : > { %v2195_v3 = vadd.f32 %v2194_v56, %v1343_v44  ;;  %v1349_v5 = vmul.f32 %v4855_v12, %v592_v52  ;;  %v2183_v7 = vadd.f32 %v2182_v48, %v2181_v59  ;;  %v1350_v9 = vmul.f32 %v4857_v13, %v593_v57  ;;  %v606_v48 = vld [vmem:[%s4864_s20 + $0xc80] sm:$0xff]  ;;  %v611_v53 = vld [vmem:[%s4864_s20 + $0xca8] sm:$0xff] }
  0xd2   : > { %v2189_v8 = vadd.f32 %v2188_v60, %v1339_v49  ;;  %v1352_v15 = vmul.f32 %v4859_v14, %v595_v58  ;;  %v2202_v20 = vadd.f32 %v1348_v62, %v1347_v61  ;;  %v1353_v21 = vmul.f32 %v4851_v10, %v596_v63  ;;  %v614_v59 = vld [vmem:[%s4864_s20 + $0xcc0] sm:$0xff]  ;;  %v615_v60 = vld [vmem:[%s4864_s20 + $0xcc8] sm:$0xff] }
  0xd3   : > { %v2196_v19 = vadd.f32 %v2195_v3, %v1344_v54  ;;  %v1354_v22 = vmul.f32 %v4853_v11, %v597_v0  ;;  %2184 = vadd.xlane.f32.xlu1 %v2183_v7  ;;  %v2198_v27 = vsel %vm1693_vm0, %v1346_v55, 0.0  ;;  %v1351_v28 = vmul.f32 %v4869_v18, %v594_v4  ;;  %v613_v54 = vld [vmem:[%s4864_s20 + $0xcb8] sm:$0xff] }
  0xd4   : > { %v2191_v26 = vadd.f32 %v2190_v1, %v2189_v8  ;;  %v1355_v30 = vmul.f32 %v4855_v12, %v598_v6  ;;  %v2203_v32 = vadd.f32 %v2202_v20, %v1349_v5  ;;  %v1356_v33 = vmul.f32 %v4857_v13, %v599_v16  ;;  %v612_v1 = vld [vmem:[%s4864_s20 + $0xcb0] sm:$0xff]  ;;  %v617_v7 = vld [vmem:[%s4864_s20 + $0xcd8] sm:$0xff]  ;;  %v619_v8 = vld [vmem:[%s4864_s20 + $0xce8] sm:$0xff] }
  0xd5   : > { %v2197_v31 = vadd.f32 %v2196_v19, %v1345_v2  ;;  %v1358_v34 = vmul.f32 %v4859_v14, %v601_v17  ;;  %v2210_v37 = vadd.f32 %v1354_v22, %v1353_v21  ;;  %v1359_v38 = vmul.f32 %v4851_v10, %v602_v23  ;;  %v616_v2 = vld [vmem:[%s4864_s20 + $0xcd0] sm:$0xff]  ;;  %v621_v20 = vld [vmem:[%s4864_s20 + $0xcf8] sm:$0xff] }
  0xd6   : > { %2192 = vadd.xlane.f32.xlu0 %v2191_v26  ;;  %v1360_v39 = vmul.f32 %v4853_v11, %v603_v24  ;;  %v1361_v40 = vmul.f32 %v4855_v12, %v604_v25  ;;  %v2204_v45 = vadd.f32 %v2203_v32, %v1350_v9  ;;  %v2206_v46 = vsel %vm1693_vm0, %v1352_v15, 0.0  ;;  %v620_v19 = vld [vmem:[%s4864_s20 + $0xcf0] sm:$0xff]  ;;  %v618_v24 = vld [vmem:[%s4864_s20 + $0xce0] sm:$0xff]  ;;  %v625_v32 = vld [vmem:[%s4864_s20 + $0xd18] sm:$0xff] }
  0xd7   : > { %v2199_v44 = vadd.f32 %v2198_v27, %v2197_v31  ;;  %v1357_v47 = vmul.f32 %v4869_v18, %v600_v29  ;;  %v2211_v49 = vadd.f32 %v2210_v37, %v1355_v30  ;;  %v1362_v50 = vmul.f32 %v4857_v13, %v605_v35  ;;  %v622_v26 = vld [vmem:[%s4864_s20 + $0xd00] sm:$0xff]  ;;  %v623_v31 = vld [vmem:[%s4864_s20 + $0xd08] sm:$0xff] }
  0xd8   : > { %v1364_v51 = vmul.f32 %v4859_v14, %v607_v36  ;;  %v2218_v52 = vadd.f32 %v1360_v39, %v1359_v38  ;;  %v2205_v55 = vadd.f32 %v2204_v45, %v1351_v28  ;;  %v1365_v56 = vmul.f32 %v4851_v10, %v608_v41  ;;  %v626_v37 = vld [vmem:[%s4864_s20 + $0xd20] sm:$0xff]  ;;  %v627_v38 = vld [vmem:[%s4864_s20 + $0xd28] sm:$0xff]  ;;  %v628_v39 = vld [vmem:[%s4864_s20 + $0xd30] sm:$0xff] }
  0xd9   : > { %2200 = vadd.xlane.f32.xlu1 %v2199_v44  ;;  %v1366_v57 = vmul.f32 %v4853_v11, %v609_v42  ;;  %v1367_v58 = vmul.f32 %v4855_v12, %v610_v43  ;;  %v2212_v61 = vadd.f32 %v2211_v49, %v1356_v33  ;;  %v2214_v62 = vsel %vm1693_vm0, %v1358_v34, 0.0  ;;  %v624_v43 = vld [vmem:[%s4864_s20 + $0xd10] sm:$0xff]  ;;  %v629_v49 = vld [vmem:[%s4864_s20 + $0xd38] sm:$0xff] }
  0xda   : > { %v1363_v63 = vmul.f32 %v4869_v18, %v606_v48  ;;  %v2219_v0 = vadd.f32 %v2218_v52, %v1361_v40  ;;  %v2207_v3 = vadd.f32 %v2206_v46, %v2205_v55  ;;  %v1368_v4 = vmul.f32 %v4857_v13, %v611_v53  ;;  %v1697_v55 = vpop.xlane.xlu0 %1696 }
  0xdb   : > { %v1370_v5 = vmul.f32 %v4859_v14, %v613_v54  ;;  %v2226_v6 = vadd.f32 %v1366_v57, %v1365_v56  ;;  %v2213_v9 = vadd.f32 %v2212_v61, %v1357_v47  ;;  %v1371_v16 = vmul.f32 %v4851_v10, %v614_v59  ;;  %v632_v56 = vld [vmem:[%s4864_s20 + $0xd50] sm:$0xff]  ;;  %v630_v61 = vld [vmem:[%s4864_s20 + $0xd40] sm:$0xff] }
  0xdc   : > { %v2220_v15 = vadd.f32 %v2219_v0, %v1362_v50  ;;  %v1372_v17 = vmul.f32 %v4853_v11, %v615_v60  ;;  %2208 = vadd.xlane.f32.xlu0 %v2207_v3  ;;  %v2222_v21 = vsel %vm1693_vm0, %v1364_v51, 0.0  ;;  %v1369_v22 = vmul.f32 %v4869_v18, %v612_v1  ;;  %v631_v50 = vld [vmem:[%s4864_s20 + $0xd48] sm:$0xff]  ;;  %v634_v3 = vld [vmem:[%s4864_s20 + $0xd60] sm:$0xff] }
  0xdd   : > { %v2227_v23 = vadd.f32 %v2226_v6, %v1367_v58  ;;  %v1373_v25 = vmul.f32 %v4855_v12, %v616_v2  ;;  %v2215_v27 = vadd.f32 %v2214_v62, %v2213_v9  ;;  %v1374_v29 = vmul.f32 %v4857_v13, %v617_v7  ;;  %v633_v62 = vld [vmem:[%s4864_s20 + $0xd58] sm:$0xff]  ;;  %v635_v7 = vld [vmem:[%s4864_s20 + $0xd68] sm:$0xff] }
  0xde   : > { %v2221_v28 = vadd.f32 %v2220_v15, %v1363_v63  ;;  %v1376_v30 = vmul.f32 %v4859_v14, %v619_v8  ;;  %v2234_v34 = vadd.f32 %v1372_v17, %v1371_v16  ;;  %v1377_v35 = vmul.f32 %v4851_v10, %v620_v19  ;;  %v637_v8 = vld [vmem:[%s4864_s20 + $0xd78] sm:$0xff] }
  0xdf   : > { %v2228_v33 = vadd.f32 %v2227_v23, %v1368_v4  ;;  %v1378_v36 = vmul.f32 %v4853_v11, %v621_v20  ;;  %2216 = vadd.xlane.f32.xlu1 %v2215_v27  ;;  %v2230_v41 = vsel %vm1693_vm0, %v1370_v5, 0.0  ;;  %v1375_v42 = vmul.f32 %v4869_v18, %v618_v24  ;;  %v638_v20 = vld [vmem:[%s4864_s20 + $0xd80] sm:$0xff] }
  0xe0   : > { %v2223_v40 = vadd.f32 %v2222_v21, %v2221_v28  ;;  %v1379_v44 = vmul.f32 %v4855_v12, %v622_v26  ;;  %v2235_v46 = vadd.f32 %v2234_v34, %v1373_v25  ;;  %v1380_v47 = vmul.f32 %v4857_v13, %v623_v31  ;;  %v639_v21 = vld [vmem:[%s4864_s20 + $0xd88] sm:$0xff]  ;;  %v636_v25 = vld [vmem:[%s4864_s20 + $0xd70] sm:$0xff]  ;;  %v641_v31 = vld [vmem:[%s4864_s20 + $0xd98] sm:$0xff] }
  0xe1   : > { %v2229_v45 = vadd.f32 %v2228_v33, %v1369_v22  ;;  %v1382_v48 = vmul.f32 %v4859_v14, %v625_v32  ;;  %v2242_v51 = vadd.f32 %v1378_v36, %v1377_v35  ;;  %v1383_v52 = vmul.f32 %v4851_v10, %v626_v37  ;;  %v640_v22 = vld [vmem:[%s4864_s20 + $0xd90] sm:$0xff]  ;;  %v643_v32 = vld [vmem:[%s4864_s20 + $0xda8] sm:$0xff]  ;;  %v1713_v33 = vpop.xlane.xlu1 %1712 }
  0xe2   : > { %2224 = vadd.xlane.f32.xlu0 %v2223_v40  ;;  %v1384_v53 = vmul.f32 %v4853_v11, %v627_v38  ;;  %v1385_v54 = vmul.f32 %v4855_v12, %v628_v39  ;;  %v2236_v58 = vadd.f32 %v2235_v46, %v1374_v29  ;;  %v2238_v59 = vsel %vm1693_vm0, %v1376_v30, 0.0  ;;  %v1705_v38 = vpop.xlane.xlu0 %1704  ;;  %v644_v39 = vld [vmem:[%s4864_s20 + $0xdb0] sm:$0xff] }
  0xe3   : > { %v2231_v57 = vadd.f32 %v2230_v41, %v2229_v45  ;;  %v1381_v60 = vmul.f32 %v4869_v18, %v624_v43  ;;  %v2243_v63 = vadd.f32 %v2242_v51, %v1379_v44  ;;  %v1386_v0 = vmul.f32 %v4857_v13, %v629_v49  ;;  %v642_v44 = vld [vmem:[%s4864_s20 + $0xda0] sm:$0xff]  ;;  %v645_v45 = vld [vmem:[%s4864_s20 + $0xdb8] sm:$0xff]  ;;  %v647_v51 = vld [vmem:[%s4864_s20 + $0xdc8] sm:$0xff] }
  0xe4   : > { %v1388_v1 = vmul.f32 %v4859_v14, %v631_v50  ;;  %v2250_v2 = vadd.f32 %v1384_v53, %v1383_v52  ;;  %v2237_v4 = vadd.f32 %v2236_v58, %v1375_v42  ;;  %v2246_v5 = vsel %vm1693_vm0, %v1382_v48, 0.0  ;;  %v646_v50 = vld [vmem:[%s4864_s20 + $0xdc0] sm:$0xff] }
  0xe5   : > { %2232 = vadd.xlane.f32.xlu1 %v2231_v57  ;;  %v4191_v6 = vmul.f32 -1.442695, %v1697_v55  ;;  %v1389_v9 = vmul.f32 %v4851_v10, %v632_v56  ;;  %v2244_v15 = vadd.f32 %v2243_v63, %v1380_v47  ;;  %v1387_v16 = vmul.f32 %v4869_v18, %v630_v61  ;;  %v649_v55 = vld [vmem:[%s4864_s20 + $0xdd8] sm:$0xff]  ;;  %v651_v63 = vld [vmem:[%s4864_s20 + $0xde8] sm:$0xff] }
  0xe6   : > { %v2251_v17 = vadd.f32 %v2250_v2, %v1385_v54  ;;  %v1390_v19 = vmul.f32 %v4853_v11, %v633_v62  ;;  %v2239_v23 = vadd.f32 %v2238_v59, %v2237_v4  ;;  %v2254_v24 = vsel %vm1693_vm0, %v1388_v1, 0.0  ;;  %v650_v62 = vld [vmem:[%s4864_s20 + $0xde0] sm:$0xff]  ;;  %v1721_v4 = vpop.xlane.xlu1 %1720 }
  0xe7   : > { %4325 = vpow2.f32 %v4191_v6  ;;  %v1391_v26 = vmul.f32 %v4855_v12, %v634_v3  ;;  %v2245_v27 = vadd.f32 %v2244_v15, %v1381_v60  ;;  %v1392_v29 = vmul.f32 %v4857_v13, %v635_v7  ;;  %v648_v60 = vld [vmem:[%s4864_s20 + $0xdd0] sm:$0xff] }
  0xe8   : > { %v2252_v28 = vadd.f32 %v2251_v17, %v1386_v0  ;;  %v1394_v30 = vmul.f32 %v4859_v14, %v637_v8  ;;  %2240 = vadd.xlane.f32.xlu0 %v2239_v23  ;;  %v2258_v34 = vadd.f32 %v1390_v19, %v1389_v9  ;;  %v1395_v35 = vmul.f32 %v4851_v10, %v638_v20  ;;  %v652_v3 = vld [vmem:[%s4864_s20 + $0xdf0] sm:$0xff]  ;;  %v653_v8 = vld [vmem:[%s4864_s20 + $0xdf8] sm:$0xff]  ;;  %v655_v9 = vld [vmem:[%s4864_s20 + $0xe08] sm:$0xff]  ;;  %v1729_v20 = vpop.xlane.xlu0 %1728 }
  0xe9   : > { %v1396_v36 = vmul.f32 %v4853_v11, %v639_v21  ;;  %v1397_v37 = vmul.f32 %v4855_v12, %v640_v22  ;;  %v2247_v40 = vadd.f32 %v2246_v5, %v2245_v27  ;;  %v1393_v42 = vmul.f32 %v4869_v18, %v636_v25  ;;  %v654_v25 = vld [vmem:[%s4864_s20 + $0xe00] sm:$0xff]  ;;  %v656_v27 = vld [vmem:[%s4864_s20 + $0xe10] sm:$0xff] }
  0xea   : > { %v2253_v41 = vadd.f32 %v2252_v28, %v1387_v16  ;;  %v2262_v43 = vsel %vm1693_vm0, %v1394_v30, 0.0  ;;  %v2259_v46 = vadd.f32 %v2258_v34, %v1391_v26  ;;  %v1398_v47 = vmul.f32 %v4857_v13, %v641_v31 }
  0xeb   : > { %v1400_v48 = vmul.f32 %v4859_v14, %v643_v32  ;;  %v2266_v49 = vadd.f32 %v1396_v36, %v1395_v35  ;;  %2248 = vadd.xlane.f32.xlu1 %v2247_v40  ;;  %v4193_v53 = vmul.f32 -1.442695, %v1713_v33  ;;  %v4192_v54 = vmul.f32 -1.442695, %v1705_v38  ;;  %v657_v32 = vld [vmem:[%s4864_s20 + $0xe18] sm:$0xff]  ;;  %v658_v33 = vld [vmem:[%s4864_s20 + $0xe20] sm:$0xff] }
  0xec   : > { %v2255_v52 = vadd.f32 %v2254_v24, %v2253_v41  ;;  %v1401_v56 = vmul.f32 %v4851_v10, %v644_v39  ;;  %v2260_v57 = vadd.f32 %v2259_v46, %v1392_v29  ;;  %v1399_v58 = vmul.f32 %v4869_v18, %v642_v44  ;;  %v659_v38 = vld [vmem:[%s4864_s20 + $0xe28] sm:$0xff]  ;;  %v661_v41 = vld [vmem:[%s4864_s20 + $0xe38] sm:$0xff]  ;;  %v1737_v44 = vpop.xlane.xlu1 %1736  ;;  %v660_v46 = vld [vmem:[%s4864_s20 + $0xe30] sm:$0xff] }
  0xed   : > { %v2267_v59 = vadd.f32 %v2266_v49, %v1397_v37  ;;  %v1402_v61 = vmul.f32 %v4853_v11, %v645_v45  ;;  %v2270_v0 = vsel %vm1693_vm0, %v1400_v48, 0.0  ;;  %4327 = vpow2.f32 %v4193_v53  ;;  %v663_v49 = vld [vmem:[%s4864_s20 + $0xe48] sm:$0xff] }
  0xee   : > { %2256 = vadd.xlane.f32.xlu0 %v2255_v52  ;;  %v1403_v1 = vmul.f32 %v4855_v12, %v646_v50  ;;  %v1404_v2 = vmul.f32 %v4857_v13, %v647_v51  ;;  %v2261_v5 = vadd.f32 %v2260_v57, %v1393_v42  ;;  %4329 = vpow2.f32 %v4192_v54  ;;  %v664_v50 = vld [vmem:[%s4864_s20 + $0xe50] sm:$0xff]  ;;  %v665_v54 = vld [vmem:[%s4864_s20 + $0xe58] sm:$0xff] }
  0xef   : > { %v2268_v6 = vadd.f32 %v2267_v59, %v1398_v47  ;;  %v1406_v7 = vmul.f32 %v4859_v14, %v649_v55  ;;  %v1405_v15 = vmul.f32 %v4869_v18, %v648_v60  ;;  %v2274_v16 = vadd.f32 %v1402_v61, %v1401_v56 }
  0xf0   : > { %v1407_v17 = vmul.f32 %v4851_v10, %v650_v62  ;;  %v1408_v19 = vmul.f32 %v4853_v11, %v651_v63  ;;  %v2263_v22 = vadd.f32 %v2262_v43, %v2261_v5  ;;  %v1409_v26 = vmul.f32 %v4855_v12, %v652_v3  ;;  %v662_v43 = vld [vmem:[%s4864_s20 + $0xe40] sm:$0xff] }
  0xf1   : > { %v4326_v21 = vpop.eup %4325  ;;  %v2269_v23 = vadd.f32 %v2268_v6, %v1399_v58  ;;  %v2278_v24 = vsel %vm1693_vm0, %v1406_v7, 0.0  ;;  %v2275_v29 = vadd.f32 %v2274_v16, %v1403_v1  ;;  %v1410_v30 = vmul.f32 %v4857_v13, %v653_v8  ;;  %v667_v58 = vld [vmem:[%s4864_s20 + $0xe68] sm:$0xff]  ;;  %v1745_v1 = vpop.xlane.xlu0 %1744  ;;  %v666_v6 = vld [vmem:[%s4864_s20 + $0xe60] sm:$0xff] }
  0xf2   : > { %v3021_v28 = vadd.f32 1.0, %v4326_v21  ;;  %v1412_v31 = vmul.f32 %v4859_v14, %v655_v9  ;;  %2264 = vadd.xlane.f32.xlu1 %v2263_v22  ;;  %v2282_v35 = vadd.f32 %v1408_v19, %v1407_v17  ;;  %v4194_v36 = vmul.f32 -1.442695, %v1721_v4  ;;  %v668_v17 = vld [vmem:[%s4864_s20 + $0xe70] sm:$0xff]  ;;  %v669_v19 = vld [vmem:[%s4864_s20 + $0xe78] sm:$0xff] }
  0xf3   : > { %v2271_v34 = vadd.f32 %v2270_v0, %v2269_v23  ;;  %v4195_v37 = vmul.f32 -1.442695, %v1729_v20  ;;  %v2276_v39 = vadd.f32 %v2275_v29, %v1404_v2  ;;  %v1411_v40 = vmul.f32 %v4869_v18, %v654_v25  ;;  %v5877_v20 = vpop.xlane.xlu1 %1752  ;;  %v3384_v25 = vld [vmem:[%s5869_s24] sm:$0xff] }
  0xf4   : > { %4331 = vrcp.f32 %v3021_v28  ;;  %v1413_v42 = vmul.f32 %v4851_v10, %v656_v27  ;;  %v2283_v45 = vadd.f32 %v2282_v35, %v1409_v26  ;;  %v1414_v47 = vmul.f32 %v4853_v11, %v657_v32  ;;  %v3385_v26 = vld [vmem:[%s5869_s24 + $0x8] sm:$0xff]  ;;  %v673_v32 = vld [vmem:[%s4864_s20 + $0xe98] sm:$0xff] }
  0xf5   : > { %2272 = vadd.xlane.f32.xlu0 %v2271_v34  ;;  %4333 = vpow2.f32 %v4194_v36  ;;  %v1415_v48 = vmul.f32 %v4855_v12, %v658_v33  ;;  %v2277_v51 = vadd.f32 %v2276_v39, %v1405_v15  ;;  %v2286_v52 = vsel %vm1693_vm0, %v1412_v31, 0.0 }
  0xf6   : > { %4335 = vpow2.f32 %v4195_v37  ;;  %v1416_v53 = vmul.f32 %v4857_v13, %v659_v38  ;;  %v2284_v55 = vadd.f32 %v2283_v45, %v1410_v30  ;;  %v1418_v56 = vmul.f32 %v4859_v14, %v661_v41  ;;  %v671_v30 = vld [vmem:[%s4864_s20 + $0xe88] sm:$0xff]  ;;  %v672_v38 = vld [vmem:[%s4864_s20 + $0xe90] sm:$0xff] }
  0xf7   : > { %v2290_v57 = vadd.f32 %v1414_v47, %v1413_v42  ;;  %v1419_v59 = vmul.f32 %v4851_v10, %v662_v43  ;;  %v4328_v60 = vpop.eup %4327  ;;  %v2279_v61 = vadd.f32 %v2278_v24, %v2277_v51  ;;  %v1417_v62 = vmul.f32 %v4869_v18, %v660_v46  ;;  %v670_v24 = vld [vmem:[%s4864_s20 + $0xe80] sm:$0xff]  ;;  %v675_v41 = vld [vmem:[%s4864_s20 + $0xea8] sm:$0xff]  ;;  %v1761_v42 = vpop.xlane.xlu0 %1760 }
  0xf8   : > { %v1420_v63 = vmul.f32 %v4853_v11, %v663_v49  ;;  %v1421_v0 = vmul.f32 %v4855_v12, %v664_v50  ;;  %v4330_v2 = vpop.eup %4329  ;;  %v3023_v3 = vadd.f32 1.0, %v4328_v60  ;;  %v2285_v4 = vadd.f32 %v2284_v55, %v1411_v40  ;;  %v674_v40 = vld [vmem:[%s4864_s20 + $0xea0] sm:$0xff]  ;;  %v679_v55 = vld [vmem:[%s4864_s20 + $0xec8] sm:$0xff] }
  0xf9   : > { %v2291_v5 = vadd.f32 %v2290_v57, %v1415_v48  ;;  %v1422_v7 = vmul.f32 %v4857_v13, %v665_v54  ;;  %v3022_v8 = vadd.f32 1.0, %v4330_v2  ;;  %2280 = vadd.xlane.f32.xlu1 %v2279_v61  ;;  %v2294_v9 = vsel %vm1693_vm0, %v1418_v56, 0.0  ;;  %v676_v48 = vld [vmem:[%s4864_s20 + $0xeb0] sm:$0xff]  ;;  %v677_v54 = vld [vmem:[%s4864_s20 + $0xeb8] sm:$0xff]  ;;  %v5904_v56 = vpop.xlane.xlu1 %1768 }
  0xfa   : > { %v1424_v15 = vmul.f32 %v4859_v14, %v667_v58  ;;  %v2298_v16 = vadd.f32 %v1420_v63, %v1419_v59  ;;  %4337 = vrcp.f32 %v3023_v3  ;;  %v2287_v21 = vadd.f32 %v2286_v52, %v2285_v4  ;;  %v678_v63 = vld [vmem:[%s4864_s20 + $0xec0] sm:$0xff]  ;;  %v681_v2 = vld [vmem:[%s4864_s20 + $0xed8] sm:$0xff]  ;;  %v3389_v4 = vld [vmem:[%s5869_s24 + $0x28] sm:$0xff] }
  0xfb   : > { %v2292_v22 = vadd.f32 %v2291_v5, %v1416_v53  ;;  %v4196_v23 = vmul.f32 -1.442695, %v1737_v44  ;;  %4339 = vrcp.f32 %v3022_v8  ;;  %v1423_v27 = vmul.f32 %v4869_v18, %v666_v6  ;;  %v3388_v3 = vld [vmem:[%s5869_s24 + $0x20] sm:$0xff]  ;;  %v3386_v5 = vld [vmem:[%s5869_s24 + $0x10] sm:$0xff] }
  0xfc   : > { %v2299_v28 = vadd.f32 %v2298_v16, %v1421_v0  ;;  %v4197_v29 = vmul.f32 -1.442695, %v1745_v1  ;;  %2288 = vadd.xlane.f32.xlu0 %v2287_v21  ;;  %v1425_v33 = vmul.f32 %v4851_v10, %v668_v17  ;;  %v1426_v34 = vmul.f32 %v4853_v11, %v669_v19  ;;  %v680_v1 = vld [vmem:[%s4864_s20 + $0xed0] sm:$0xff]  ;;  %v682_v21 = vld [vmem:[%s4864_s20 + $0xee0] sm:$0xff] }
  0xfd   : > { %v2293_v31 = vadd.f32 %v2292_v22, %v1417_v62  ;;  %4341 = vpow2.f32 %v4196_v23  ;;  %v2302_v37 = vsel %vm1693_vm0, %v1424_v15, 0.0  ;;  %v1427_v39 = vmul.f32 %v4855_v12, %v670_v24  ;;  %v5925_v22 = vpop.xlane.xlu0 %1776 }
  0xfe   : > { %v4332_v35 = vpop.eup %4331  ;;  %v2300_v36 = vadd.f32 %v2299_v28, %v1422_v7  ;;  %4343 = vpow2.f32 %v4197_v29  ;;  %v1428_v47 = vmul.f32 %v4857_v13, %v671_v30  ;;  %v1430_v52 = vmul.f32 %v4859_v14, %v673_v32  ;;  %v683_v32 = vld [vmem:[%s4864_s20 + $0xee8] sm:$0xff] }
  0xff   : > { %v4334_v43 = vpop.eup %4333  ;;  %v3626_v44 = vmul.f32 %v4332_v35, %v3384_v25  ;;  %v3627_v45 = vmul.f32 %v4332_v35, %v3385_v26  ;;  %v2295_v46 = vadd.f32 %v2294_v9, %v2293_v31  ;;  %v2306_v53 = vadd.f32 %v1426_v34, %v1425_v33  ;;  %v3387_v9 = vld [vmem:[%s5869_s24 + $0x18] sm:$0xff]  ;;  %v5933_v34 = vpop.xlane.xlu1 %1784 }
 0x100   : > { %v4336_v49 = vpop.eup %4335  ;;  %v3024_v50 = vadd.f32 1.0, %v4334_v43  ;;  %v2301_v51 = vadd.f32 %v2300_v36, %v1423_v27  ;;  %v1429_v58 = vmul.f32 %v4869_v18, %v672_v38  ;;  %v1431_v59 = vmul.f32 %v4851_v10, %v674_v40  ;;  %v685_v33 = vld [vmem:[%s4864_s20 + $0xef8] sm:$0xff]  ;;  %v687_v40 = vld [vmem:[%s4864_s20 + $0xf08] sm:$0xff] }
 0x101   : > { %3868 = vst [vmem:[%s5892_s27] sm:$0xff] %v3626_v44  ;;  %3870 = vst.msk [vmem:[%s5892_s27 + $0x8] sm:$0xff] %vm3869_vm1, %v3627_v45  ;;  %v3025_v57 = vadd.f32 1.0, %v4336_v49  ;;  %2296 = vadd.xlane.f32.xlu1 %v2295_v46  ;;  %v1432_v60 = vmul.f32 %v4853_v11, %v675_v41  ;;  %v2307_v62 = vadd.f32 %v2306_v53, %v1427_v39  ;;  %v2310_v6 = vsel %vm1693_vm0, %v1430_v52, 0.0  ;;  %v686_v39 = vld [vmem:[%s4864_s20 + $0xf00] sm:$0xff]  ;;  %v684_v45 = vld [vmem:[%s4864_s20 + $0xef0] sm:$0xff] }
 0x102   : > { %4345 = vrcp.f32 %v3024_v50  ;;  %v2303_v61 = vadd.f32 %v2302_v37, %v2301_v51  ;;  %v1433_v0 = vmul.f32 %v4855_v12, %v676_v48  ;;  %v1434_v7 = vmul.f32 %v4857_v13, %v677_v54  ;;  %v688_v46 = vld [vmem:[%s4864_s20 + $0xf10] sm:$0xff]  ;;  %v689_v51 = vld [vmem:[%s4864_s20 + $0xf18] sm:$0xff]  ;;  %v691_v52 = vld [vmem:[%s4864_s20 + $0xf28] sm:$0xff] }
 0x103   : > { %4347 = vrcp.f32 %v3025_v57  ;;  %v1436_v8 = vmul.f32 %v4859_v14, %v679_v55  ;;  %v2308_v15 = vadd.f32 %v2307_v62, %v1428_v47  ;;  %v2314_v16 = vadd.f32 %v1432_v60, %v1431_v59  ;;  %v3390_v53 = vld [vmem:[%s5869_s24 + $0x30] sm:$0xff]  ;;  %v3391_v54 = vld [vmem:[%s5869_s24 + $0x38] sm:$0xff]  ;;  %v5954_v59 = vpop.xlane.xlu0 %1792  ;;  %v3392_v60 = vld [vmem:[%s5869_s24 + $0x40] sm:$0xff] }
 0x104   : > { %2304 = vadd.xlane.f32.xlu0 %v2303_v61  ;;  %v4198_v17 = vmul.f32 -1.442695, %v5877_v20  ;;  %v4199_v19 = vmul.f32 -1.442695, %v1761_v42  ;;  %v4338_v23 = vpop.eup %4337  ;;  %v1435_v24 = vmul.f32 %v4869_v18, %v678_v63  ;;  %v1437_v26 = vmul.f32 %v4851_v10, %v680_v1  ;;  %v3393_v61 = vld [vmem:[%s5869_s24 + $0x48] sm:$0xff] }
 0x105   : > { %v2318_v25 = vsel %vm1693_vm0, %v1436_v8, 0.0  ;;  %v1438_v27 = vmul.f32 %v4853_v11, %v681_v2  ;;  %v4340_v28 = vpop.eup %4339  ;;  %v3630_v29 = vmul.f32 %v4338_v23, %v3388_v3  ;;  %v3631_v20 = vmul.f32 %v4338_v23, %v3389_v4  ;;  %v5965_v8 = vpop.xlane.xlu1 %1800  ;;  %v694_v23 = vld [vmem:[%s4864_s20 + $0xf40] sm:$0xff] }
 0x106   : > { %v2309_v30 = vadd.f32 %v2308_v15, %v1429_v58  ;;  %v2315_v31 = vadd.f32 %v2314_v16, %v1433_v0  ;;  %v3628_v36 = vmul.f32 %v4340_v28, %v3386_v5  ;;  %v3629_v37 = vmul.f32 %v4340_v28, %v3387_v9  ;;  %v690_v0 = vld [vmem:[%s4864_s20 + $0xf20] sm:$0xff]  ;;  %v695_v28 = vld [vmem:[%s4864_s20 + $0xf48] sm:$0xff] }
 0x107   : > { %v4342_v35 = vpop.eup %4341  ;;  %4349 = vpow2.f32 %v4198_v17  ;;  %v1439_v38 = vmul.f32 %v4855_v12, %v682_v21  ;;  %3873 = vst [vmem:[%s5892_s27 + $0x20] sm:$0xff] %v3630_v29  ;;  %3874 = vst.msk [vmem:[%s5892_s27 + $0x28] sm:$0xff] %vm3869_vm1, %v3631_v20  ;;  %v1440_v48 = vmul.f32 %v4857_v13, %v683_v32  ;;  %v1442_v49 = vmul.f32 %v4859_v14, %v685_v33  ;;  %v693_v21 = vld [vmem:[%s4864_s20 + $0xf38] sm:$0xff] }
 0x108   : > { %v4344_v41 = vpop.eup %4343  ;;  %v3026_v42 = vadd.f32 1.0, %v4342_v35  ;;  %v2311_v43 = vadd.f32 %v2310_v6, %v2309_v30  ;;  %v2316_v44 = vadd.f32 %v2315_v31, %v1434_v7  ;;  %4351 = vpow2.f32 %v4199_v19  ;;  %3871 = vst [vmem:[%s5892_s27 + $0x10] sm:$0xff] %v3628_v36  ;;  %3872 = vst.msk [vmem:[%s5892_s27 + $0x18] sm:$0xff] %vm3869_vm1, %v3629_v37  ;;  %v692_v7 = vld [vmem:[%s4864_s20 + $0xf30] sm:$0xff]  ;;  %v697_v32 = vld [vmem:[%s4864_s20 + $0xf58] sm:$0xff] }
 0x109   : > { %v3027_v47 = vadd.f32 1.0, %v4344_v41  ;;  %v2322_v50 = vadd.f32 %v1438_v27, %v1437_v26  ;;  %v1443_v57 = vmul.f32 %v4851_v10, %v686_v39  ;;  %v1444_v58 = vmul.f32 %v4853_v11, %v687_v40  ;;  %v696_v31 = vld [vmem:[%s4864_s20 + $0xf50] sm:$0xff]  ;;  %v698_v37 = vld [vmem:[%s4864_s20 + $0xf60] sm:$0xff] }
 0x10a   : > { %4353 = vrcp.f32 %v3026_v42  ;;  %2312 = vadd.xlane.f32.xlu1 %v2311_v43  ;;  %v2317_v55 = vadd.f32 %v2316_v44, %v1435_v24  ;;  %v1441_v62 = vmul.f32 %v4869_v18, %v684_v45  ;;  %v1445_v1 = vmul.f32 %v4855_v12, %v688_v46  ;;  %v700_v43 = vld [vmem:[%s4864_s20 + $0xf70] sm:$0xff]  ;;  %v3395_v46 = vld [vmem:[%s5869_s24 + $0x58] sm:$0xff] }
 0x10b   : > { %4355 = vrcp.f32 %v3027_v47  ;;  %v2323_v63 = vadd.f32 %v2322_v50, %v1439_v38  ;;  %v2326_v4 = vsel %vm1693_vm0, %v1442_v49, 0.0  ;;  %v1446_v5 = vmul.f32 %v4857_v13, %v689_v51  ;;  %v699_v38 = vld [vmem:[%s4864_s20 + $0xf68] sm:$0xff]  ;;  %v3394_v45 = vld [vmem:[%s5869_s24 + $0x50] sm:$0xff]  ;;  %v5995_v51 = vpop.xlane.xlu1 %1816 }
 0x10c   : > { %v4346_v2 = vpop.eup %4345  ;;  %v2319_v3 = vadd.f32 %v2318_v25, %v2317_v55  ;;  %v1448_v6 = vmul.f32 %v4859_v14, %v691_v52  ;;  %v2330_v19 = vadd.f32 %v1444_v58, %v1443_v57  ;;  %v1447_v26 = vmul.f32 %v4869_v18, %v690_v0  ;;  %v3396_v52 = vld [vmem:[%s5869_s24 + $0x60] sm:$0xff]  ;;  %v701_v57 = vld [vmem:[%s4864_s20 + $0xf78] sm:$0xff]  ;;  %v703_v0 = vld [vmem:[%s4864_s20 + $0xf88] sm:$0xff] }
 0x10d   : > { %v4348_v9 = vpop.eup %4347  ;;  %v3632_v15 = vmul.f32 %v4346_v2, %v3390_v53  ;;  %v3633_v16 = vmul.f32 %v4346_v2, %v3391_v54  ;;  %v2324_v17 = vadd.f32 %v2323_v63, %v1440_v48  ;;  %v4200_v27 = vmul.f32 -1.442695, %v5904_v56  ;;  %v3397_v53 = vld [vmem:[%s5869_s24 + $0x68] sm:$0xff] }
 0x10e   : > { %v3634_v24 = vmul.f32 %v4348_v9, %v3392_v60  ;;  %v3635_v25 = vmul.f32 %v4348_v9, %v3393_v61  ;;  %2320 = vadd.xlane.f32.xlu0 %v2319_v3  ;;  %v2331_v20 = vadd.f32 %v2330_v19, %v1445_v1  ;;  %v4201_v30 = vmul.f32 -1.442695, %v5925_v22  ;;  %v5987_v22 = vpop.xlane.xlu0 %1808  ;;  %v705_v9 = vld [vmem:[%s4864_s20 + $0xf98] sm:$0xff] }
 0x10f   : > { %3875 = vst [vmem:[%s5892_s27 + $0x30] sm:$0xff] %v3632_v15  ;;  %3876 = vst.msk [vmem:[%s5892_s27 + $0x38] sm:$0xff] %vm3869_vm1, %v3633_v16  ;;  %v2325_v29 = vadd.f32 %v2324_v17, %v1441_v62  ;;  %v1449_v33 = vmul.f32 %v4851_v10, %v692_v7  ;;  %v2334_v56 = vsel %vm1693_vm0, %v1448_v6, 0.0  ;;  %4357 = vpow2.f32 %v4200_v27  ;;  %v702_v6 = vld [vmem:[%s4864_s20 + $0xf80] sm:$0xff]  ;;  %v704_v7 = vld [vmem:[%s4864_s20 + $0xf90] sm:$0xff] }
 0x110   : > { %3877 = vst [vmem:[%s5892_s27 + $0x40] sm:$0xff] %v3634_v24  ;;  %3878 = vst.msk [vmem:[%s5892_s27 + $0x48] sm:$0xff] %vm3869_vm1, %v3635_v25  ;;  %v1450_v35 = vmul.f32 %v4853_v11, %v693_v21  ;;  %v1451_v36 = vmul.f32 %v4855_v12, %v694_v23  ;;  %v2332_v41 = vadd.f32 %v2331_v20, %v1446_v5  ;;  %4359 = vpow2.f32 %v4201_v30  ;;  %v706_v21 = vld [vmem:[%s4864_s20 + $0xfa0] sm:$0xff] }
 0x111   : > { %v4350_v39 = vpop.eup %4349  ;;  %v2327_v40 = vadd.f32 %v2326_v4, %v2325_v29  ;;  %v1452_v42 = vmul.f32 %v4857_v13, %v695_v28  ;;  %v1453_v48 = vmul.f32 %v4869_v18, %v696_v31  ;;  %v1454_v49 = vmul.f32 %v4859_v14, %v697_v32  ;;  %v707_v28 = vld [vmem:[%s4864_s20 + $0xfa8] sm:$0xff]  ;;  %v709_v29 = vld [vmem:[%s4864_s20 + $0xfb8] sm:$0xff] }
 0x112   : > { %v4352_v44 = vpop.eup %4351  ;;  %v3028_v47 = vadd.f32 1.0, %v4350_v39  ;;  %v2338_v50 = vadd.f32 %v1450_v35, %v1449_v33  ;;  %v2333_v55 = vadd.f32 %v2332_v41, %v1447_v26  ;;  %v1455_v58 = vmul.f32 %v4851_v10, %v698_v37  ;;  %v6010_v23 = vpop.xlane.xlu0 %1824  ;;  %v710_v33 = vld [vmem:[%s4864_s20 + $0xfc0] sm:$0xff]  ;;  %v708_v35 = vld [vmem:[%s4864_s20 + $0xfb0] sm:$0xff]  ;;  %v711_v37 = vld [vmem:[%s4864_s20 + $0xfc8] sm:$0xff] }
 0x113   : > { %v3029_v54 = vadd.f32 1.0, %v4352_v44  ;;  %2328 = vadd.xlane.f32.xlu1 %v2327_v40  ;;  %v1456_v60 = vmul.f32 %v4853_v11, %v699_v38  ;;  %v2342_v63 = vsel %vm1693_vm0, %v1454_v49, 0.0  ;;  %v1457_v1 = vmul.f32 %v4855_v12, %v700_v43  ;;  %v712_v38 = vld [vmem:[%s4864_s20 + $0xfd0] sm:$0xff] }
 0x114   : > { %v4354_v61 = vpop.eup %4353  ;;  %4361 = vrcp.f32 %v3028_v47  ;;  %v2339_v62 = vadd.f32 %v2338_v50, %v1451_v36  ;;  %v2335_v5 = vadd.f32 %v2334_v56, %v2333_v55  ;;  %v1458_v19 = vmul.f32 %v4857_v13, %v701_v57  ;;  %v6027_v56 = vpop.xlane.xlu1 %1832  ;;  %v713_v47 = vld [vmem:[%s4864_s20 + $0xfd8] sm:$0xff]  ;;  %v3398_v50 = vld [vmem:[%s5869_s24 + $0x70] sm:$0xff] }
 0x115   : > { %v4356_v2 = vpop.eup %4355  ;;  %v3636_v3 = vmul.f32 %v4354_v61, %v3394_v45  ;;  %v3637_v4 = vmul.f32 %v4354_v61, %v3395_v46  ;;  %4363 = vrcp.f32 %v3029_v54  ;;  %v1460_v24 = vmul.f32 %v4859_v14, %v703_v0  ;;  %v3401_v61 = vld [vmem:[%s5869_s24 + $0x88] sm:$0xff] }
 0x116   : > { %v3638_v15 = vmul.f32 %v4356_v2, %v3396_v52  ;;  %v3639_v16 = vmul.f32 %v4356_v2, %v3397_v53  ;;  %v2340_v17 = vadd.f32 %v2339_v62, %v1452_v42  ;;  %2336 = vadd.xlane.f32.xlu0 %v2335_v5  ;;  %v2346_v25 = vadd.f32 %v1456_v60, %v1455_v58  ;;  %v3399_v52 = vld [vmem:[%s5869_s24 + $0x78] sm:$0xff]  ;;  %v6044_v58 = vpop.xlane.xlu0 %1840  ;;  %v3400_v60 = vld [vmem:[%s5869_s24 + $0x80] sm:$0xff] }
 0x117   : > { %3879 = vst [vmem:[%s5892_s27 + $0x50] sm:$0xff] %v3636_v3  ;;  %3880 = vst.msk [vmem:[%s5892_s27 + $0x58] sm:$0xff] %vm3869_vm1, %v3637_v4  ;;  %v4202_v26 = vmul.f32 -1.442695, %v5933_v34  ;;  %v4203_v27 = vmul.f32 -1.442695, %v5954_v59  ;;  %v1459_v30 = vmul.f32 %v4869_v18, %v702_v6  ;;  %v1461_v31 = vmul.f32 %v4851_v10, %v704_v7 }
 0x118   : > { %3881 = vst [vmem:[%s5892_s27 + $0x60] sm:$0xff] %v3638_v15  ;;  %3882 = vst.msk [vmem:[%s5892_s27 + $0x68] sm:$0xff] %vm3869_vm1, %v3639_v16  ;;  %v2341_v20 = vadd.f32 %v2340_v17, %v1453_v48  ;;  %v1462_v32 = vmul.f32 %v4853_v11, %v705_v9  ;;  %v2347_v34 = vadd.f32 %v2346_v25, %v1457_v1  ;;  %v2350_v59 = vsel %vm1693_vm0, %v1460_v24, 0.0  ;;  %v715_v48 = vld [vmem:[%s4864_s20 + $0xfe8] sm:$0xff]  ;;  %v714_v1 = vld [vmem:[%s4864_s20 + $0xfe0] sm:$0xff]  ;;  %v6053_v7 = vpop.xlane.xlu1 %1848 }
 0x119   : > { %4365 = vpow2.f32 %v4202_v26  ;;  %v1463_v36 = vmul.f32 %v4855_v12, %v706_v21  ;;  %v4358_v39 = vpop.eup %4357  ;;  %v1464_v41 = vmul.f32 %v4857_v13, %v707_v28  ;;  %v1466_v42 = vmul.f32 %v4859_v14, %v709_v29  ;;  %v716_v6 = vld [vmem:[%s4864_s20 + $0xff0] sm:$0xff]  ;;  %v717_v21 = vld [vmem:[%s4864_s20 + $0xff8] sm:$0xff]  ;;  %v718_v24 = vld [vmem:[%s4864_s20 + $0x1000] sm:$0xff] }
 0x11a   : > { %v2343_v40 = vadd.f32 %v2342_v63, %v2341_v20  ;;  %4367 = vpow2.f32 %v4203_v27  ;;  %v4360_v43 = vpop.eup %4359  ;;  %v3030_v44 = vadd.f32 1.0, %v4358_v39  ;;  %v2348_v45 = vadd.f32 %v2347_v34, %v1458_v19  ;;  %v719_v29 = vld [vmem:[%s4864_s20 + $0x1008] sm:$0xff]  ;;  %v721_v20 = vld [vmem:[%s4864_s20 + $0x1018] sm:$0xff] }
 0x11b   : > { %v2354_v46 = vadd.f32 %v1462_v32, %v1461_v31  ;;  %v1467_v49 = vmul.f32 %v4851_v10, %v710_v33  ;;  %v3031_v53 = vadd.f32 1.0, %v4360_v43  ;;  %v1465_v54 = vmul.f32 %v4869_v18, %v708_v35  ;;  %v720_v35 = vld [vmem:[%s4864_s20 + $0x1010] sm:$0xff] }
 0x11c   : > { %2344 = vadd.xlane.f32.xlu1 %v2343_v40  ;;  %v1468_v55 = vmul.f32 %v4853_v11, %v711_v37  ;;  %v1469_v57 = vmul.f32 %v4855_v12, %v712_v38  ;;  %4369 = vrcp.f32 %v3030_v44  ;;  %v2349_v62 = vadd.f32 %v2348_v45, %v1459_v30  ;;  %v722_v38 = vld [vmem:[%s4864_s20 + $0x1020] sm:$0xff]  ;;  %v724_v43 = vld [vmem:[%s4864_s20 + $0x1030] sm:$0xff] }
 0x11d   : > { %v2355_v63 = vadd.f32 %v2354_v46, %v1463_v36  ;;  %v2358_v0 = vsel %vm1693_vm0, %v1466_v42, 0.0  ;;  %4371 = vrcp.f32 %v3031_v53  ;;  %v1470_v3 = vmul.f32 %v4857_v13, %v713_v47  ;;  %v3403_v53 = vld [vmem:[%s5869_s24 + $0x98] sm:$0xff] }
 0x11e   : > { %v4362_v2 = vpop.eup %4361  ;;  %v1472_v4 = vmul.f32 %v4859_v14, %v715_v48  ;;  %v2362_v5 = vadd.f32 %v1468_v55, %v1467_v49  ;;  %v2351_v17 = vadd.f32 %v2350_v59, %v2349_v62  ;;  %v1471_v27 = vmul.f32 %v4869_v18, %v714_v1  ;;  %v725_v48 = vld [vmem:[%s4864_s20 + $0x1038] sm:$0xff]  ;;  %v727_v49 = vld [vmem:[%s4864_s20 + $0x1048] sm:$0xff]  ;;  %v726_v1 = vld [vmem:[%s4864_s20 + $0x1040] sm:$0xff] }
 0x11f   : > { %v4364_v9 = vpop.eup %4363  ;;  %v3640_v15 = vmul.f32 %v4362_v2, %v3398_v50  ;;  %v3641_v16 = vmul.f32 %v4362_v2, %v3399_v52  ;;  %v2356_v19 = vadd.f32 %v2355_v63, %v1464_v41  ;;  %v4204_v31 = vmul.f32 -1.442695, %v5965_v8  ;;  %v723_v8 = vld [vmem:[%s4864_s20 + $0x1028] sm:$0xff]  ;;  %v6082_v50 = vpop.xlane.xlu1 %1864  ;;  %v3402_v52 = vld [vmem:[%s5869_s24 + $0x90] sm:$0xff] }
 0x120   : > { %v3642_v25 = vmul.f32 %v4364_v9, %v3400_v60  ;;  %v3643_v26 = vmul.f32 %v4364_v9, %v3401_v61  ;;  %v2363_v28 = vadd.f32 %v2362_v5, %v1469_v57  ;;  %2352 = vadd.xlane.f32.xlu0 %v2351_v17  ;;  %v4205_v32 = vmul.f32 -1.442695, %v5987_v22  ;;  %v6075_v22 = vpop.xlane.xlu0 %1856  ;;  %v3404_v61 = vld [vmem:[%s5869_s24 + $0xa0] sm:$0xff]  ;;  %v3405_v62 = vld [vmem:[%s5869_s24 + $0xa8] sm:$0xff]  ;;  %v728_v9 = vld [vmem:[%s4864_s20 + $0x1050] sm:$0xff] }
 0x121   : > { %3883 = vst [vmem:[%s5892_s27 + $0x70] sm:$0xff] %v3640_v15  ;;  %3884 = vst.msk [vmem:[%s5892_s27 + $0x78] sm:$0xff] %vm3869_vm1, %v3641_v16  ;;  %v2357_v30 = vadd.f32 %v2356_v19, %v1465_v54  ;;  %v1473_v33 = vmul.f32 %v4851_v10, %v716_v6  ;;  %v2366_v59 = vsel %vm1693_vm0, %v1472_v4, 0.0  ;;  %v1474_v36 = vmul.f32 %v4853_v11, %v717_v21 }
 0x122   : > { %3885 = vst [vmem:[%s5892_s27 + $0x80] sm:$0xff] %v3642_v25  ;;  %3886 = vst.msk [vmem:[%s5892_s27 + $0x88] sm:$0xff] %vm3869_vm1, %v3643_v26  ;;  %v2364_v34 = vadd.f32 %v2363_v28, %v1470_v3  ;;  %v1475_v37 = vmul.f32 %v4855_v12, %v718_v24  ;;  %4373 = vpow2.f32 %v4204_v31  ;;  %v1476_v41 = vmul.f32 %v4857_v13, %v719_v29  ;;  %v729_v24 = vld [vmem:[%s4864_s20 + $0x1058] sm:$0xff]  ;;  %v730_v25 = vld [vmem:[%s4864_s20 + $0x1060] sm:$0xff] }
 0x123   : > { %v4366_v39 = vpop.eup %4365  ;;  %v2359_v40 = vadd.f32 %v2358_v0, %v2357_v30  ;;  %v1478_v42 = vmul.f32 %v4859_v14, %v721_v20  ;;  %4375 = vpow2.f32 %v4205_v32  ;;  %v2370_v47 = vadd.f32 %v1474_v36, %v1473_v33  ;;  %v731_v30 = vld [vmem:[%s4864_s20 + $0x1068] sm:$0xff] }
 0x124   : > { %v4368_v44 = vpop.eup %4367  ;;  %v3032_v45 = vadd.f32 1.0, %v4366_v39  ;;  %v2365_v46 = vadd.f32 %v2364_v34, %v1471_v27  ;;  %v1477_v55 = vmul.f32 %v4869_v18, %v720_v35  ;;  %v1479_v57 = vmul.f32 %v4851_v10, %v722_v38  ;;  %v6099_v26 = vpop.xlane.xlu0 %1872  ;;  %v733_v34 = vld [vmem:[%s4864_s20 + $0x1078] sm:$0xff]  ;;  %v734_v35 = vld [vmem:[%s4864_s20 + $0x1080] sm:$0xff]  ;;  %v735_v36 = vld [vmem:[%s4864_s20 + $0x1088] sm:$0xff] }
 0x125   : > { %v3033_v54 = vadd.f32 1.0, %v4368_v44  ;;  %2360 = vadd.xlane.f32.xlu1 %v2359_v40  ;;  %v1480_v60 = vmul.f32 %v4853_v11, %v723_v8  ;;  %v2371_v0 = vadd.f32 %v2370_v47, %v1475_v37  ;;  %v1481_v2 = vmul.f32 %v4855_v12, %v724_v43  ;;  %v6112_v37 = vpop.xlane.xlu1 %1880  ;;  %v732_v38 = vld [vmem:[%s4864_s20 + $0x1070] sm:$0xff]  ;;  %v737_v43 = vld [vmem:[%s4864_s20 + $0x1098] sm:$0xff]  ;;  %v739_v47 = vld [vmem:[%s4864_s20 + $0x10a8] sm:$0xff] }
 0x126   : > { %4377 = vrcp.f32 %v3032_v45  ;;  %v2367_v63 = vadd.f32 %v2366_v59, %v2365_v46  ;;  %v4370_v3 = vpop.eup %4369  ;;  %v2374_v4 = vsel %vm1693_vm0, %v1478_v42, 0.0  ;;  %v1482_v5 = vmul.f32 %v4857_v13, %v725_v48  ;;  %v736_v39 = vld [vmem:[%s4864_s20 + $0x1090] sm:$0xff] }
 0x127   : > { %4379 = vrcp.f32 %v3033_v54  ;;  %v1484_v6 = vmul.f32 %v4859_v14, %v727_v49  ;;  %v4372_v15 = vpop.eup %4371  ;;  %v3644_v16 = vmul.f32 %v4370_v3, %v3402_v52  ;;  %v3645_v17 = vmul.f32 %v4370_v3, %v3403_v53  ;;  %v3406_v53 = vld [vmem:[%s5869_s24 + $0xb0] sm:$0xff]  ;;  %v3407_v54 = vld [vmem:[%s5869_s24 + $0xb8] sm:$0xff] }
 0x128   : > { %2368 = vadd.xlane.f32.xlu0 %v2367_v63  ;;  %v2372_v19 = vadd.f32 %v2371_v0, %v1476_v41  ;;  %v2378_v21 = vadd.f32 %v1480_v60, %v1479_v57  ;;  %v3646_v27 = vmul.f32 %v4372_v15, %v3404_v61  ;;  %v3647_v28 = vmul.f32 %v4372_v15, %v3405_v62  ;;  %v6132_v62 = vpop.xlane.xlu0 %1888  ;;  %v3408_v63 = vld [vmem:[%s5869_s24 + $0xc0] sm:$0xff]  ;;  %v3409_v0 = vld [vmem:[%s5869_s24 + $0xc8] sm:$0xff] }
 0x129   : > { %v1483_v29 = vmul.f32 %v4869_v18, %v726_v1  ;;  %v4206_v20 = vmul.f32 -1.442695, %v5995_v51  ;;  %3887 = vst [vmem:[%s5892_s27 + $0x90] sm:$0xff] %v3644_v16  ;;  %3888 = vst.msk [vmem:[%s5892_s27 + $0x98] sm:$0xff] %vm3869_vm1, %v3645_v17  ;;  %v4207_v33 = vmul.f32 -1.442695, %v6010_v23  ;;  %v1485_v59 = vmul.f32 %v4851_v10, %v728_v9 }
 0x12a   : > { %v2373_v31 = vadd.f32 %v2372_v19, %v1477_v55  ;;  %v2379_v32 = vadd.f32 %v2378_v21, %v1481_v2  ;;  %3889 = vst [vmem:[%s5892_s27 + $0xa0] sm:$0xff] %v3646_v27  ;;  %3890 = vst.msk [vmem:[%s5892_s27 + $0xa8] sm:$0xff] %vm3869_vm1, %v3647_v28  ;;  %v2382_v51 = vsel %vm1693_vm0, %v1484_v6, 0.0  ;;  %v1486_v8 = vmul.f32 %v4853_v11, %v729_v24  ;;  %v740_v17 = vld [vmem:[%s4864_s20 + $0x10b0] sm:$0xff]  ;;  %v6141_v19 = vpop.xlane.xlu1 %1896  ;;  %v741_v28 = vld [vmem:[%s4864_s20 + $0x10b8] sm:$0xff] }
 0x12b   : > { %4381 = vpow2.f32 %v4206_v20  ;;  %v1487_v23 = vmul.f32 %v4855_v12, %v730_v25  ;;  %v1488_v42 = vmul.f32 %v4857_v13, %v731_v30  ;;  %v1490_v45 = vmul.f32 %v4859_v14, %v733_v34  ;;  %v745_v34 = vld [vmem:[%s4864_s20 + $0x10d8] sm:$0xff] }
 0x12c   : > { %v2375_v40 = vadd.f32 %v2374_v4, %v2373_v31  ;;  %v2380_v41 = vadd.f32 %v2379_v32, %v1482_v5  ;;  %4383 = vpow2.f32 %v4207_v33  ;;  %v4374_v44 = vpop.eup %4373  ;;  %v2386_v46 = vadd.f32 %v1486_v8, %v1485_v59  ;;  %v738_v4 = vld [vmem:[%s4864_s20 + $0x10a0] sm:$0xff]  ;;  %v743_v33 = vld [vmem:[%s4864_s20 + $0x10c8] sm:$0xff] }
 0x12d   : > { %v1491_v48 = vmul.f32 %v4851_v10, %v734_v35  ;;  %v1492_v49 = vmul.f32 %v4853_v11, %v735_v36  ;;  %v4376_v52 = vpop.eup %4375  ;;  %v3034_v55 = vadd.f32 1.0, %v4374_v44  ;;  %v1489_v60 = vmul.f32 %v4869_v18, %v732_v38 }
 0x12e   : > { %2376 = vadd.xlane.f32.xlu1 %v2375_v40  ;;  %v2381_v57 = vadd.f32 %v2380_v41, %v1483_v29  ;;  %v1493_v61 = vmul.f32 %v4855_v12, %v736_v39  ;;  %v3035_v1 = vadd.f32 1.0, %v4376_v52  ;;  %v2387_v2 = vadd.f32 %v2386_v46, %v1487_v23  ;;  %v742_v29 = vld [vmem:[%s4864_s20 + $0x10c0] sm:$0xff]  ;;  %v744_v23 = vld [vmem:[%s4864_s20 + $0x10d0] sm:$0xff] }
 0x12f   : > { %v2390_v3 = vsel %vm1693_vm0, %v1490_v45, 0.0  ;;  %v1494_v5 = vmul.f32 %v4857_v13, %v737_v43  ;;  %4385 = vrcp.f32 %v3034_v55  ;;  %v1496_v15 = vmul.f32 %v4859_v14, %v739_v47  ;;  %v746_v41 = vld [vmem:[%s4864_s20 + $0x10e0] sm:$0xff]  ;;  %v748_v46 = vld [vmem:[%s4864_s20 + $0x10f0] sm:$0xff]  ;;  %v6170_v55 = vpop.xlane.xlu1 %1912 }
 0x130   : > { %v4378_v6 = vpop.eup %4377  ;;  %v2383_v9 = vadd.f32 %v2382_v51, %v2381_v57  ;;  %v2394_v16 = vadd.f32 %v1492_v49, %v1491_v48  ;;  %4387 = vrcp.f32 %v3035_v1  ;;  %v2388_v27 = vadd.f32 %v2387_v2, %v1488_v42  ;;  %v3410_v57 = vld [vmem:[%s5869_s24 + $0xd0] sm:$0xff]  ;;  %v3411_v1 = vld [vmem:[%s5869_s24 + $0xd8] sm:$0xff] }
 0x131   : > { %v4380_v21 = vpop.eup %4379  ;;  %v3648_v24 = vmul.f32 %v4378_v6, %v3406_v53  ;;  %v3649_v25 = vmul.f32 %v4378_v6, %v3407_v54  ;;  %v1495_v31 = vmul.f32 %v4869_v18, %v738_v4  ;;  %v4208_v35 = vmul.f32 -1.442695, %v6027_v56  ;;  %v747_v56 = vld [vmem:[%s4864_s20 + $0x10e8] sm:$0xff]  ;;  %v749_v53 = vld [vmem:[%s4864_s20 + $0x10f8] sm:$0xff]  ;;  %v750_v4 = vld [vmem:[%s4864_s20 + $0x1100] sm:$0xff] }
 0x132   : > { %v3650_v20 = vmul.f32 %v4380_v21, %v3408_v63  ;;  %v3651_v30 = vmul.f32 %v4380_v21, %v3409_v0  ;;  %2384 = vadd.xlane.f32.xlu0 %v2383_v9  ;;  %v2395_v32 = vadd.f32 %v2394_v16, %v1493_v61  ;;  %v2389_v59 = vadd.f32 %v2388_v27, %v1489_v60  ;;  %v751_v54 = vld [vmem:[%s4864_s20 + $0x1108] sm:$0xff]  ;;  %v752_v6 = vld [vmem:[%s4864_s20 + $0x1110] sm:$0xff]  ;;  %v3412_v9 = vld [vmem:[%s5869_s24 + $0xe0] sm:$0xff] }
 0x133   : > { %3891 = vst [vmem:[%s5892_s27 + $0xb0] sm:$0xff] %v3648_v24  ;;  %3892 = vst.msk [vmem:[%s5892_s27 + $0xb8] sm:$0xff] %vm3869_vm1, %v3649_v25  ;;  %v4209_v36 = vmul.f32 -1.442695, %v6044_v58  ;;  %v1497_v51 = vmul.f32 %v4851_v10, %v740_v17  ;;  %v2398_v8 = vsel %vm1693_vm0, %v1496_v15, 0.0  ;;  %v1498_v39 = vmul.f32 %v4853_v11, %v741_v28  ;;  %v6163_v58 = vpop.xlane.xlu0 %1904  ;;  %v3413_v15 = vld [vmem:[%s5869_s24 + $0xe8] sm:$0xff] }
 0x134   : > { %3893 = vst [vmem:[%s5892_s27 + $0xc0] sm:$0xff] %v3650_v20  ;;  %3894 = vst.msk [vmem:[%s5892_s27 + $0xc8] sm:$0xff] %vm3869_vm1, %v3651_v30  ;;  %v2396_v38 = vadd.f32 %v2395_v32, %v1494_v5  ;;  %v1499_v40 = vmul.f32 %v4855_v12, %v742_v29  ;;  %v2391_v43 = vadd.f32 %v2390_v3, %v2389_v59  ;;  %4389 = vpow2.f32 %v4208_v35  ;;  %v753_v20 = vld [vmem:[%s4864_s20 + $0x1118] sm:$0xff]  ;;  %v754_v30 = vld [vmem:[%s4864_s20 + $0x1120] sm:$0xff] }
 0x135   : > { %v4382_v42 = vpop.eup %4381  ;;  %v1500_v44 = vmul.f32 %v4857_v13, %v743_v33  ;;  %v1502_v45 = vmul.f32 %v4859_v14, %v745_v34  ;;  %4391 = vpow2.f32 %v4209_v36  ;;  %v2402_v52 = vadd.f32 %v1498_v39, %v1497_v51  ;;  %v755_v35 = vld [vmem:[%s4864_s20 + $0x1128] sm:$0xff] }
 0x136   : > { %v4384_v47 = vpop.eup %4383  ;;  %v3036_v48 = vadd.f32 1.0, %v4382_v42  ;;  %v2397_v49 = vadd.f32 %v2396_v38, %v1495_v31  ;;  %2392 = vadd.xlane.f32.xlu1 %v2391_v43  ;;  %v1501_v61 = vmul.f32 %v4869_v18, %v744_v23  ;;  %v1503_v63 = vmul.f32 %v4851_v10, %v746_v41  ;;  %v758_v23 = vld [vmem:[%s4864_s20 + $0x1140] sm:$0xff]  ;;  %v759_v39 = vld [vmem:[%s4864_s20 + $0x1148] sm:$0xff] }
 0x137   : > { %v3037_v60 = vadd.f32 1.0, %v4384_v47  ;;  %v1504_v0 = vmul.f32 %v4853_v11, %v747_v56  ;;  %v2403_v3 = vadd.f32 %v2402_v52, %v1499_v40  ;;  %v1505_v5 = vmul.f32 %v4855_v12, %v748_v46  ;;  %v6189_v31 = vpop.xlane.xlu0 %1920  ;;  %v6197_v40 = vpop.xlane.xlu1 %1928  ;;  %v756_v56 = vld [vmem:[%s4864_s20 + $0x1130] sm:$0xff] }
 0x138   : > { %4393 = vrcp.f32 %v3036_v48  ;;  %v2399_v2 = vadd.f32 %v2398_v8, %v2397_v49  ;;  %v2406_v16 = vsel %vm1693_vm0, %v1502_v45, 0.0  ;;  %v1506_v17 = vmul.f32 %v4857_v13, %v749_v53  ;;  %v757_v8 = vld [vmem:[%s4864_s20 + $0x1138] sm:$0xff] }
 0x139   : > { %4395 = vrcp.f32 %v3037_v60  ;;  %v1508_v21 = vmul.f32 %v4859_v14, %v751_v54  ;;  %v4386_v24 = vpop.eup %4385  ;;  %v2404_v25 = vadd.f32 %v2403_v3, %v1500_v44  ;;  %v2410_v27 = vadd.f32 %v1504_v0, %v1503_v63  ;;  %v760_v44 = vld [vmem:[%s4864_s20 + $0x1150] sm:$0xff]  ;;  %v761_v48 = vld [vmem:[%s4864_s20 + $0x1158] sm:$0xff]  ;;  %v763_v54 = vld [vmem:[%s4864_s20 + $0x1168] sm:$0xff] }
 0x13a   : > { %2400 = vadd.xlane.f32.xlu0 %v2399_v2  ;;  %v4210_v28 = vmul.f32 -1.442695, %v6053_v7  ;;  %v4211_v29 = vmul.f32 -1.442695, %v6075_v22  ;;  %v4388_v32 = vpop.eup %4387  ;;  %v3652_v33 = vmul.f32 %v4386_v24, %v3410_v57  ;;  %v3653_v34 = vmul.f32 %v4386_v24, %v3411_v1  ;;  %v3414_v63 = vld [vmem:[%s5869_s24 + $0xf0] sm:$0xff]  ;;  %v3415_v0 = vld [vmem:[%s5869_s24 + $0xf8] sm:$0xff] }
 0x13b   : > { %v1507_v59 = vmul.f32 %v4869_v18, %v750_v4  ;;  %v1509_v36 = vmul.f32 %v4851_v10, %v752_v6  ;;  %v3654_v7 = vmul.f32 %v4388_v32, %v3412_v9  ;;  %v3655_v22 = vmul.f32 %v4388_v32, %v3413_v15  ;;  %v3416_v6 = vld [vmem:[%s5869_s24 + $0x100] sm:$0xff]  ;;  %v3417_v9 = vld [vmem:[%s5869_s24 + $0x108] sm:$0xff] }
 0x13c   : > { %v2405_v51 = vadd.f32 %v2404_v25, %v1501_v61  ;;  %v2411_v38 = vadd.f32 %v2410_v27, %v1505_v5  ;;  %3895 = vst [vmem:[%s5892_s27 + $0xd0] sm:$0xff] %v3652_v33  ;;  %3896 = vst.msk [vmem:[%s5892_s27 + $0xd8] sm:$0xff] %vm3869_vm1, %v3653_v34  ;;  %v2414_v41 = vsel %vm1693_vm0, %v1508_v21, 0.0  ;;  %4397 = vpow2.f32 %v4210_v28  ;;  %v6220_v5 = vpop.xlane.xlu0 %1936  ;;  %v762_v21 = vld [vmem:[%s4864_s20 + $0x1160] sm:$0xff] }
 0x13d   : > { %v1510_v42 = vmul.f32 %v4853_v11, %v753_v20  ;;  %v1511_v43 = vmul.f32 %v4855_v12, %v754_v30  ;;  %3897 = vst [vmem:[%s5892_s27 + $0xe0] sm:$0xff] %v3654_v7  ;;  %3898 = vst.msk [vmem:[%s5892_s27 + $0xe8] sm:$0xff] %vm3869_vm1, %v3655_v22  ;;  %4399 = vpow2.f32 %v4211_v29  ;;  %v1512_v47 = vmul.f32 %v4857_v13, %v755_v35  ;;  %v764_v20 = vld [vmem:[%s4864_s20 + $0x1170] sm:$0xff]  ;;  %v6229_v30 = vpop.xlane.xlu1 %1944  ;;  %v765_v35 = vld [vmem:[%s4864_s20 + $0x1178] sm:$0xff] }
 0x13e   : > { %v2407_v45 = vadd.f32 %v2406_v16, %v2405_v51  ;;  %v2412_v46 = vadd.f32 %v2411_v38, %v1506_v17  ;;  %v4390_v49 = vpop.eup %4389  ;;  %v1514_v52 = vmul.f32 %v4859_v14, %v757_v8  ;;  %v1515_v57 = vmul.f32 %v4851_v10, %v758_v23  ;;  %v767_v8 = vld [vmem:[%s4864_s20 + $0x1188] sm:$0xff]  ;;  %v769_v23 = vld [vmem:[%s4864_s20 + $0x1198] sm:$0xff] }
 0x13f   : > { %v2418_v53 = vadd.f32 %v1510_v42, %v1509_v36  ;;  %v1516_v60 = vmul.f32 %v4853_v11, %v759_v39  ;;  %v4392_v61 = vpop.eup %4391  ;;  %v3038_v1 = vadd.f32 1.0, %v4390_v49  ;;  %v1513_v3 = vmul.f32 %v4869_v18, %v756_v56  ;;  %v766_v36 = vld [vmem:[%s4864_s20 + $0x1180] sm:$0xff] }
 0x140   : > { %2408 = vadd.xlane.f32.xlu1 %v2407_v45  ;;  %v2413_v2 = vadd.f32 %v2412_v46, %v1507_v59  ;;  %v1517_v4 = vmul.f32 %v4855_v12, %v760_v44  ;;  %v3039_v15 = vadd.f32 1.0, %v4392_v61  ;;  %v2422_v17 = vsel %vm1693_vm0, %v1514_v52, 0.0  ;;  %v768_v45 = vld [vmem:[%s4864_s20 + $0x1190] sm:$0xff] }
 0x141   : > { %v2419_v16 = vadd.f32 %v2418_v53, %v1511_v43  ;;  %v1518_v24 = vmul.f32 %v4857_v13, %v761_v48  ;;  %4401 = vrcp.f32 %v3038_v1  ;;  %v1520_v28 = vmul.f32 %v4859_v14, %v763_v54  ;;  %v770_v48 = vld [vmem:[%s4864_s20 + $0x11a0] sm:$0xff]  ;;  %v773_v1 = vld [vmem:[%s4864_s20 + $0x11b8] sm:$0xff] }
 0x142   : > { %v4394_v25 = vpop.eup %4393  ;;  %v2415_v27 = vadd.f32 %v2414_v41, %v2413_v2  ;;  %v2426_v29 = vadd.f32 %v1516_v60, %v1515_v57  ;;  %4403 = vrcp.f32 %v3039_v15  ;;  %v1519_v51 = vmul.f32 %v4869_v18, %v762_v21  ;;  %v772_v57 = vld [vmem:[%s4864_s20 + $0x11b0] sm:$0xff]  ;;  %v775_v2 = vld [vmem:[%s4864_s20 + $0x11c8] sm:$0xff] }
 0x143   : > { %v4396_v32 = vpop.eup %4395  ;;  %v3656_v33 = vmul.f32 %v4394_v25, %v3414_v63  ;;  %v3657_v34 = vmul.f32 %v4394_v25, %v3415_v0  ;;  %v2420_v59 = vadd.f32 %v2419_v16, %v1512_v47  ;;  %v4212_v41 = vmul.f32 -1.442695, %v6082_v50  ;;  %v771_v50 = vld [vmem:[%s4864_s20 + $0x11a8] sm:$0xff]  ;;  %v774_v25 = vld [vmem:[%s4864_s20 + $0x11c0] sm:$0xff] }
 0x144   : > { %v3658_v7 = vmul.f32 %v4396_v32, %v3416_v6  ;;  %v3659_v22 = vmul.f32 %v4396_v32, %v3417_v9  ;;  %2416 = vadd.xlane.f32.xlu0 %v2415_v27  ;;  %v2427_v38 = vadd.f32 %v2426_v29, %v1517_v4  ;;  %v4213_v56 = vmul.f32 -1.442695, %v6099_v26  ;;  %v6251_v26 = vpop.xlane.xlu0 %1952  ;;  %v3418_v4 = vld [vmem:[%s5869_s24 + $0x110] sm:$0xff]  ;;  %v3420_v29 = vld [vmem:[%s5869_s24 + $0x120] sm:$0xff] }
 0x145   : > { %3899 = vst [vmem:[%s5892_s27 + $0xf0] sm:$0xff] %v3656_v33  ;;  %3900 = vst.msk [vmem:[%s5892_s27 + $0xf8] sm:$0xff] %vm3869_vm1, %v3657_v34  ;;  %v2421_v39 = vadd.f32 %v2420_v59, %v1513_v3  ;;  %v1521_v42 = vmul.f32 %v4851_v10, %v764_v20  ;;  %v2430_v44 = vsel %vm1693_vm0, %v1520_v28, 0.0  ;;  %v1522_v46 = vmul.f32 %v4853_v11, %v765_v35  ;;  %v6258_v3 = vpop.xlane.xlu1 %1960  ;;  %v776_v28 = vld [vmem:[%s4864_s20 + $0x11d0] sm:$0xff]  ;;  %v3421_v20 = vld [vmem:[%s5869_s24 + $0x128] sm:$0xff] }
 0x146   : > { %3901 = vst [vmem:[%s5892_s27 + $0x100] sm:$0xff] %v3658_v7  ;;  %3902 = vst.msk [vmem:[%s5892_s27 + $0x108] sm:$0xff] %vm3869_vm1, %v3659_v22  ;;  %v2428_v43 = vadd.f32 %v2427_v38, %v1518_v24  ;;  %v1523_v47 = vmul.f32 %v4855_v12, %v766_v36  ;;  %v4398_v49 = vpop.eup %4397  ;;  %4405 = vpow2.f32 %v4212_v41  ;;  %v1524_v53 = vmul.f32 %v4857_v13, %v767_v8  ;;  %v778_v38 = vld [vmem:[%s4864_s20 + $0x11e0] sm:$0xff] }
 0x147   : > { %v2423_v52 = vadd.f32 %v2422_v17, %v2421_v39  ;;  %v1526_v54 = vmul.f32 %v4859_v14, %v769_v23  ;;  %v4400_v60 = vpop.eup %4399  ;;  %v3040_v61 = vadd.f32 1.0, %v4398_v49  ;;  %4407 = vpow2.f32 %v4213_v56  ;;  %v3419_v17 = vld [vmem:[%s5869_s24 + $0x118] sm:$0xff] }
 0x148   : > { %v2429_v63 = vadd.f32 %v2428_v43, %v1519_v51  ;;  %v2434_v0 = vadd.f32 %v1522_v46, %v1521_v42  ;;  %v3041_v6 = vadd.f32 1.0, %v4400_v60  ;;  %v1525_v9 = vmul.f32 %v4869_v18, %v768_v45  ;;  %v777_v51 = vld [vmem:[%s4864_s20 + $0x11d8] sm:$0xff]  ;;  %v6277_v8 = vpop.xlane.xlu0 %1968  ;;  %v779_v42 = vld [vmem:[%s4864_s20 + $0x11e8] sm:$0xff] }
 0x149   : > { %2424 = vadd.xlane.f32.xlu1 %v2423_v52  ;;  %v1527_v15 = vmul.f32 %v4851_v10, %v770_v48  ;;  %v1528_v16 = vmul.f32 %v4853_v11, %v771_v50  ;;  %4409 = vrcp.f32 %v3040_v61  ;;  %v1529_v27 = vmul.f32 %v4855_v12, %v772_v57  ;;  %v781_v46 = vld [vmem:[%s4864_s20 + $0x11f8] sm:$0xff]  ;;  %v783_v48 = vld [vmem:[%s4864_s20 + $0x1208] sm:$0xff]  ;;  %v6285_v50 = vpop.xlane.xlu1 %1976  ;;  %v780_v52 = vld [vmem:[%s4864_s20 + $0x11f0] sm:$0xff] }
 0x14a   : > { %v2431_v21 = vadd.f32 %v2430_v44, %v2429_v63  ;;  %v2435_v24 = vadd.f32 %v2434_v0, %v1523_v47  ;;  %4411 = vrcp.f32 %v3041_v6  ;;  %v2438_v32 = vsel %vm1693_vm0, %v1526_v54, 0.0  ;;  %v782_v47 = vld [vmem:[%s4864_s20 + $0x1200] sm:$0xff]  ;;  %v784_v57 = vld [vmem:[%s4864_s20 + $0x1210] sm:$0xff]  ;;  %v785_v0 = vld [vmem:[%s4864_s20 + $0x1218] sm:$0xff] }
 0x14b   : > { %v1530_v33 = vmul.f32 %v4857_v13, %v773_v1  ;;  %v1532_v34 = vmul.f32 %v4859_v14, %v775_v2  ;;  %v4402_v59 = vpop.eup %4401  ;;  %v2442_v36 = vadd.f32 %v1528_v16, %v1527_v15  ;;  %v4214_v7 = vmul.f32 -1.442695, %v6112_v37  ;;  %v787_v6 = vld [vmem:[%s4864_s20 + $0x1228] sm:$0xff] }
 0x14c   : > { %2432 = vadd.xlane.f32.xlu0 %v2431_v21  ;;  %v2436_v35 = vadd.f32 %v2435_v24, %v1524_v53  ;;  %v4215_v22 = vmul.f32 -1.442695, %v6132_v62  ;;  %v4404_v23 = vpop.eup %4403  ;;  %v3660_v39 = vmul.f32 %v4402_v59, %v3418_v4  ;;  %v3661_v41 = vmul.f32 %v4402_v59, %v3419_v17  ;;  %v3422_v17 = vld [vmem:[%s5869_s24 + $0x130] sm:$0xff]  ;;  %v3423_v21 = vld [vmem:[%s5869_s24 + $0x138] sm:$0xff] }
 0x14d   : > { %v1531_v56 = vmul.f32 %v4869_v18, %v774_v25  ;;  %v1533_v43 = vmul.f32 %v4851_v10, %v776_v28  ;;  %v3662_v37 = vmul.f32 %v4404_v23, %v3420_v29  ;;  %v3663_v62 = vmul.f32 %v4404_v23, %v3421_v20  ;;  %v6308_v29 = vpop.xlane.xlu0 %1984  ;;  %v3424_v20 = vld [vmem:[%s5869_s24 + $0x140] sm:$0xff]  ;;  %v788_v23 = vld [vmem:[%s4864_s20 + $0x1230] sm:$0xff] }
 0x14e   : > { %v2437_v44 = vadd.f32 %v2436_v35, %v1525_v9  ;;  %v2443_v45 = vadd.f32 %v2442_v36, %v1529_v27  ;;  %3903 = vst [vmem:[%s5892_s27 + $0x110] sm:$0xff] %v3660_v39  ;;  %3904 = vst.msk [vmem:[%s5892_s27 + $0x118] sm:$0xff] %vm3869_vm1, %v3661_v41  ;;  %v2446_v49 = vsel %vm1693_vm0, %v1532_v34, 0.0  ;;  %4413 = vpow2.f32 %v4214_v7  ;;  %v786_v35 = vld [vmem:[%s4864_s20 + $0x1220] sm:$0xff]  ;;  %v6317_v39 = vpop.xlane.xlu1 %1992 }
 0x14f   : > { %v1534_v53 = vmul.f32 %v4853_v11, %v777_v51  ;;  %v1535_v54 = vmul.f32 %v4855_v12, %v778_v38  ;;  %3905 = vst [vmem:[%s5892_s27 + $0x120] sm:$0xff] %v3662_v37  ;;  %3906 = vst.msk [vmem:[%s5892_s27 + $0x128] sm:$0xff] %vm3869_vm1, %v3663_v62  ;;  %4415 = vpow2.f32 %v4215_v22  ;;  %v1536_v63 = vmul.f32 %v4857_v13, %v779_v42  ;;  %v789_v37 = vld [vmem:[%s4864_s20 + $0x1238] sm:$0xff]  ;;  %v790_v62 = vld [vmem:[%s4864_s20 + $0x1240] sm:$0xff] }
 0x150   : > { %v2439_v60 = vadd.f32 %v2438_v32, %v2437_v44  ;;  %v2444_v61 = vadd.f32 %v2443_v45, %v1530_v33  ;;  %v4406_v1 = vpop.eup %4405  ;;  %v1538_v2 = vmul.f32 %v4859_v14, %v781_v46  ;;  %v1539_v9 = vmul.f32 %v4851_v10, %v782_v47  ;;  %v3425_v32 = vld [vmem:[%s5869_s24 + $0x148] sm:$0xff] }
 0x151   : > { %v2450_v4 = vadd.f32 %v1534_v53, %v1533_v43  ;;  %v1540_v15 = vmul.f32 %v4853_v11, %v783_v48  ;;  %v4408_v16 = vpop.eup %4407  ;;  %v3042_v24 = vadd.f32 1.0, %v4406_v1  ;;  %v1537_v27 = vmul.f32 %v4869_v18, %v780_v52  ;;  %v791_v48 = vld [vmem:[%s4864_s20 + $0x1248] sm:$0xff] }
 0x152   : > { %2440 = vadd.xlane.f32.xlu1 %v2439_v60  ;;  %v2445_v25 = vadd.f32 %v2444_v61, %v1531_v56  ;;  %v1541_v28 = vmul.f32 %v4855_v12, %v784_v57  ;;  %v3043_v33 = vadd.f32 1.0, %v4408_v16  ;;  %v2454_v59 = vsel %vm1693_vm0, %v1538_v2, 0.0  ;;  %v794_v2 = vld [vmem:[%s4864_s20 + $0x1260] sm:$0xff]  ;;  %v796_v16 = vld [vmem:[%s4864_s20 + $0x1270] sm:$0xff] }
 0x153   : > { %v2451_v34 = vadd.f32 %v2450_v4, %v1535_v54  ;;  %v1542_v36 = vmul.f32 %v4857_v13, %v785_v0  ;;  %v4410_v7 = vpop.eup %4409  ;;  %4417 = vrcp.f32 %v3042_v24  ;;  %v1544_v51 = vmul.f32 %v4859_v14, %v787_v6 }
 0x154   : > { %v2447_v22 = vadd.f32 %v2446_v49, %v2445_v25  ;;  %v2458_v38 = vadd.f32 %v1540_v15, %v1539_v9  ;;  %v4412_v41 = vpop.eup %4411  ;;  %v3664_v56 = vmul.f32 %v4410_v7, %v3422_v17  ;;  %v3665_v42 = vmul.f32 %v4410_v7, %v3423_v21  ;;  %v793_v49 = vld [vmem:[%s4864_s20 + $0x1258] sm:$0xff] }
 0x155   : > { %4419 = vrcp.f32 %v3043_v33  ;;  %v2452_v43 = vadd.f32 %v2451_v34, %v1536_v63  ;;  %v3666_v44 = vmul.f32 %v4412_v41, %v3424_v20  ;;  %v3667_v45 = vmul.f32 %v4412_v41, %v3425_v32  ;;  %v792_v63 = vld [vmem:[%s4864_s20 + $0x1250] sm:$0xff]  ;;  %v6346_v20 = vpop.xlane.xlu1 %2008  ;;  %v3428_v41 = vld [vmem:[%s5869_s24 + $0x160] sm:$0xff] }
 0x156   : > { %2448 = vadd.xlane.f32.xlu0 %v2447_v22  ;;  %v1543_v46 = vmul.f32 %v4869_v18, %v786_v35  ;;  %v2459_v47 = vadd.f32 %v2458_v38, %v1541_v28  ;;  %3907 = vst [vmem:[%s5892_s27 + $0x130] sm:$0xff] %v3664_v56  ;;  %3908 = vst.msk [vmem:[%s5892_s27 + $0x138] sm:$0xff] %vm3869_vm1, %v3665_v42  ;;  %v4216_v53 = vmul.f32 -1.442695, %v6141_v19  ;;  %v4217_v54 = vmul.f32 -1.442695, %v6163_v58  ;;  %v6339_v58 = vpop.xlane.xlu0 %2000 }
 0x157   : > { %v2453_v52 = vadd.f32 %v2452_v43, %v1537_v27  ;;  %v1545_v57 = vmul.f32 %v4851_v10, %v788_v23  ;;  %3909 = vst [vmem:[%s5892_s27 + $0x140] sm:$0xff] %v3666_v44  ;;  %3910 = vst.msk [vmem:[%s5892_s27 + $0x148] sm:$0xff] %vm3869_vm1, %v3667_v45  ;;  %v2462_v61 = vsel %vm1693_vm0, %v1544_v51, 0.0  ;;  %v1546_v0 = vmul.f32 %v4853_v11, %v789_v37  ;;  %v795_v19 = vld [vmem:[%s4864_s20 + $0x1268] sm:$0xff]  ;;  %v797_v27 = vld [vmem:[%s4864_s20 + $0x1278] sm:$0xff] }
 0x158   : > { %v2460_v60 = vadd.f32 %v2459_v47, %v1542_v36  ;;  %v1547_v1 = vmul.f32 %v4855_v12, %v790_v62  ;;  %v4414_v4 = vpop.eup %4413  ;;  %4421 = vpow2.f32 %v4216_v53  ;;  %v1548_v9 = vmul.f32 %v4857_v13, %v791_v48  ;;  %v799_v28 = vld [vmem:[%s4864_s20 + $0x1288] sm:$0xff]  ;;  %v3426_v32 = vld [vmem:[%s5869_s24 + $0x150] sm:$0xff]  ;;  %v3427_v36 = vld [vmem:[%s5869_s24 + $0x158] sm:$0xff] }
 0x159   : > { %v2455_v6 = vadd.f32 %v2454_v59, %v2453_v52  ;;  %v1550_v15 = vmul.f32 %v4859_v14, %v793_v49  ;;  %v4416_v17 = vpop.eup %4415  ;;  %v3044_v21 = vadd.f32 1.0, %v4414_v4  ;;  %4423 = vpow2.f32 %v4217_v54  ;;  %v798_v51 = vld [vmem:[%s4864_s20 + $0x1280] sm:$0xff]  ;;  %v800_v23 = vld [vmem:[%s4864_s20 + $0x1290] sm:$0xff]  ;;  %v3429_v56 = vld [vmem:[%s5869_s24 + $0x168] sm:$0xff] }
 0x15a   : > { %v2461_v24 = vadd.f32 %v2460_v60, %v1543_v46  ;;  %v2466_v25 = vadd.f32 %v1546_v0, %v1545_v57  ;;  %v3045_v33 = vadd.f32 1.0, %v4416_v17  ;;  %v1549_v34 = vmul.f32 %v4869_v18, %v792_v63  ;;  %v801_v48 = vld [vmem:[%s4864_s20 + $0x1298] sm:$0xff]  ;;  %v802_v49 = vld [vmem:[%s4864_s20 + $0x12a0] sm:$0xff]  ;;  %v6365_v52 = vpop.xlane.xlu0 %2016  ;;  %v807_v4 = vld [vmem:[%s4864_s20 + $0x12c8] sm:$0xff] }
 0x15b   : > { %2456 = vadd.xlane.f32.xlu1 %v2455_v6  ;;  %v1551_v59 = vmul.f32 %v4851_v10, %v794_v2  ;;  %v1552_v35 = vmul.f32 %v4853_v11, %v795_v19  ;;  %4425 = vrcp.f32 %v3044_v21  ;;  %v1553_v38 = vmul.f32 %v4855_v12, %v796_v16  ;;  %v805_v2 = vld [vmem:[%s4864_s20 + $0x12b8] sm:$0xff]  ;;  %v806_v19 = vld [vmem:[%s4864_s20 + $0x12c0] sm:$0xff]  ;;  %v6373_v6 = vpop.xlane.xlu1 %2024  ;;  %v808_v21 = vld [vmem:[%s4864_s20 + $0x12d0] sm:$0xff] }
 0x15c   : > { %v2463_v7 = vadd.f32 %v2462_v61, %v2461_v24  ;;  %v2467_v22 = vadd.f32 %v2466_v25, %v1547_v1  ;;  %4427 = vrcp.f32 %v3045_v33  ;;  %v2470_v42 = vsel %vm1693_vm0, %v1550_v15, 0.0  ;;  %v803_v61 = vld [vmem:[%s4864_s20 + $0x12a8] sm:$0xff]  ;;  %v804_v15 = vld [vmem:[%s4864_s20 + $0x12b0] sm:$0xff] }
 0x15d   : > { %v1554_v43 = vmul.f32 %v4857_v13, %v797_v27  ;;  %v1556_v37 = vmul.f32 %v4859_v14, %v799_v28  ;;  %v4418_v62 = vpop.eup %4417  ;;  %v2474_v45 = vadd.f32 %v1552_v35, %v1551_v59  ;;  %v4218_v46 = vmul.f32 -1.442695, %v6170_v55  ;;  %v809_v28 = vld [vmem:[%s4864_s20 + $0x12d8] sm:$0xff]  ;;  %v811_v59 = vld [vmem:[%s4864_s20 + $0x12e8] sm:$0xff] }
 0x15e   : > { %2464 = vadd.xlane.f32.xlu0 %v2463_v7  ;;  %v2468_v44 = vadd.f32 %v2467_v22, %v1548_v9  ;;  %v4219_v47 = vmul.f32 -1.442695, %v6189_v31  ;;  %v3668_v54 = vmul.f32 %v4418_v62, %v3426_v32  ;;  %v3669_v57 = vmul.f32 %v4418_v62, %v3427_v36  ;;  %v3430_v22 = vld [vmem:[%s5869_s24 + $0x170] sm:$0xff] }
 0x15f   : > { %v4420_v53 = vpop.eup %4419  ;;  %v1555_v60 = vmul.f32 %v4869_v18, %v798_v51  ;;  %v1557_v63 = vmul.f32 %v4851_v10, %v800_v23  ;;  %v2475_v1 = vadd.f32 %v2474_v45, %v1553_v38  ;;  %v2478_v9 = vsel %vm1693_vm0, %v1556_v37, 0.0  ;;  %v3431_v51 = vld [vmem:[%s5869_s24 + $0x178] sm:$0xff]  ;;  %v3433_v37 = vld [vmem:[%s5869_s24 + $0x188] sm:$0xff] }
 0x160   : > { %v3670_v55 = vmul.f32 %v4420_v53, %v3428_v41  ;;  %v3671_v31 = vmul.f32 %v4420_v53, %v3429_v56  ;;  %v2469_v0 = vadd.f32 %v2468_v44, %v1549_v34  ;;  %3911 = vst [vmem:[%s5892_s27 + $0x150] sm:$0xff] %v3668_v54  ;;  %3912 = vst.msk [vmem:[%s5892_s27 + $0x158] sm:$0xff] %vm3869_vm1, %v3669_v57  ;;  %4429 = vpow2.f32 %v4218_v46  ;;  %v810_v46 = vld [vmem:[%s4864_s20 + $0x12e0] sm:$0xff]  ;;  %v812_v57 = vld [vmem:[%s4864_s20 + $0x12f0] sm:$0xff] }
 0x161   : > { %v1558_v16 = vmul.f32 %v4853_v11, %v801_v48  ;;  %v1559_v17 = vmul.f32 %v4855_v12, %v802_v49  ;;  %v2476_v25 = vadd.f32 %v2475_v1, %v1554_v43  ;;  %4431 = vpow2.f32 %v4219_v47  ;;  %v3432_v43 = vld [vmem:[%s5869_s24 + $0x180] sm:$0xff] }
 0x162   : > { %3913 = vst [vmem:[%s5892_s27 + $0x160] sm:$0xff] %v3670_v55  ;;  %3914 = vst.msk [vmem:[%s5892_s27 + $0x168] sm:$0xff] %vm3869_vm1, %v3671_v31  ;;  %v2471_v24 = vadd.f32 %v2470_v42, %v2469_v0  ;;  %v1560_v27 = vmul.f32 %v4857_v13, %v803_v61  ;;  %v4422_v32 = vpop.eup %4421  ;;  %v1562_v33 = vmul.f32 %v4859_v14, %v805_v2  ;;  %v6396_v42 = vpop.xlane.xlu0 %2032  ;;  %v813_v0 = vld [vmem:[%s4864_s20 + $0x12f8] sm:$0xff]  ;;  %v814_v1 = vld [vmem:[%s4864_s20 + $0x1300] sm:$0xff] }
 0x163   : > { %v2482_v34 = vadd.f32 %v1558_v16, %v1557_v63  ;;  %v1563_v35 = vmul.f32 %v4851_v10, %v806_v19  ;;  %v1564_v36 = vmul.f32 %v4853_v11, %v807_v4  ;;  %v4424_v7 = vpop.eup %4423  ;;  %v3046_v38 = vadd.f32 1.0, %v4422_v32  ;;  %v817_v16 = vld [vmem:[%s4864_s20 + $0x1318] sm:$0xff]  ;;  %v816_v32 = vld [vmem:[%s4864_s20 + $0x1310] sm:$0xff] }
 0x164   : > { %2472 = vadd.xlane.f32.xlu1 %v2471_v24  ;;  %v2477_v23 = vadd.f32 %v2476_v25, %v1555_v60  ;;  %v1561_v41 = vmul.f32 %v4869_v18, %v804_v15  ;;  %v1565_v56 = vmul.f32 %v4855_v12, %v808_v21  ;;  %v3047_v62 = vadd.f32 1.0, %v4424_v7  ;;  %v6405_v60 = vpop.xlane.xlu1 %2040  ;;  %v815_v15 = vld [vmem:[%s4864_s20 + $0x1308] sm:$0xff] }
 0x165   : > { %v2483_v44 = vadd.f32 %v2482_v34, %v1559_v17  ;;  %v2486_v45 = vsel %vm1693_vm0, %v1562_v33, 0.0  ;;  %v1566_v47 = vmul.f32 %v4857_v13, %v809_v28  ;;  %v4426_v48 = vpop.eup %4425  ;;  %4433 = vrcp.f32 %v3046_v38 }
 0x166   : > { %v2479_v49 = vadd.f32 %v2478_v9, %v2477_v23  ;;  %v1568_v53 = vmul.f32 %v4859_v14, %v811_v59  ;;  %v2490_v54 = vadd.f32 %v1564_v36, %v1563_v35  ;;  %v4428_v61 = vpop.eup %4427  ;;  %v3672_v63 = vmul.f32 %v4426_v48, %v3430_v22  ;;  %v818_v59 = vld [vmem:[%s4864_s20 + $0x1320] sm:$0xff] }
 0x167   : > { %v3673_v55 = vmul.f32 %v4426_v48, %v3431_v51  ;;  %4435 = vrcp.f32 %v3047_v62  ;;  %v2484_v31 = vadd.f32 %v2483_v44, %v1560_v27  ;;  %v3674_v2 = vmul.f32 %v4428_v61, %v3432_v43  ;;  %v820_v51 = vld [vmem:[%s4864_s20 + $0x1330] sm:$0xff]  ;;  %v821_v43 = vld [vmem:[%s4864_s20 + $0x1338] sm:$0xff] }
 0x168   : > { %v3675_v19 = vmul.f32 %v4428_v61, %v3433_v37  ;;  %2480 = vadd.xlane.f32.xlu0 %v2479_v49  ;;  %v1567_v4 = vmul.f32 %v4869_v18, %v810_v46  ;;  %v2491_v9 = vadd.f32 %v2490_v54, %v1565_v56  ;;  %3915 = vst [vmem:[%s5892_s27 + $0x170] sm:$0xff] %v3672_v63  ;;  %v4220_v21 = vmul.f32 -1.442695, %v6197_v40  ;;  %v819_v40 = vld [vmem:[%s4864_s20 + $0x1328] sm:$0xff]  ;;  %v6434_v62 = vpop.xlane.xlu1 %2056  ;;  %v3434_v44 = vld [vmem:[%s5869_s24 + $0x190] sm:$0xff]  ;;  %v3435_v49 = vld [vmem:[%s5869_s24 + $0x198] sm:$0xff] }
 0x169   : > { %3916 = vst.msk [vmem:[%s5892_s27 + $0x178] sm:$0xff] %vm3869_vm1, %v3673_v55  ;;  %v2485_v17 = vadd.f32 %v2484_v31, %v1561_v41  ;;  %v4221_v24 = vmul.f32 -1.442695, %v6220_v5  ;;  %v1569_v25 = vmul.f32 %v4851_v10, %v812_v57  ;;  %3917 = vst [vmem:[%s5892_s27 + $0x180] sm:$0xff] %v3674_v2  ;;  %v2494_v28 = vsel %vm1693_vm0, %v1568_v53, 0.0  ;;  %v6427_v5 = vpop.xlane.xlu0 %2048  ;;  %v823_v37 = vld [vmem:[%s4864_s20 + $0x1348] sm:$0xff] }
 0x16a   : > { %3918 = vst.msk [vmem:[%s5892_s27 + $0x188] sm:$0xff] %vm3869_vm1, %v3675_v19  ;;  %v2492_v27 = vadd.f32 %v2491_v9, %v1566_v47  ;;  %v1570_v33 = vmul.f32 %v4853_v11, %v813_v0  ;;  %v1571_v34 = vmul.f32 %v4855_v12, %v814_v1  ;;  %v4430_v35 = vpop.eup %4429  ;;  %4437 = vpow2.f32 %v4220_v21  ;;  %v822_v57 = vld [vmem:[%s4864_s20 + $0x1340] sm:$0xff]  ;;  %v824_v63 = vld [vmem:[%s4864_s20 + $0x1350] sm:$0xff]  ;;  %v3437_v31 = vld [vmem:[%s5869_s24 + $0x1a8] sm:$0xff] }
 0x16b   : > { %v2487_v36 = vadd.f32 %v2486_v45, %v2485_v17  ;;  %v1572_v7 = vmul.f32 %v4857_v13, %v815_v15  ;;  %v1574_v22 = vmul.f32 %v4859_v14, %v817_v16  ;;  %v4432_v38 = vpop.eup %4431  ;;  %v3048_v23 = vadd.f32 1.0, %v4430_v35  ;;  %v3436_v55 = vld [vmem:[%s5869_s24 + $0x1a0] sm:$0xff]  ;;  %v825_v17 = vld [vmem:[%s4864_s20 + $0x1358] sm:$0xff] }
 0x16c   : > { %v2493_v41 = vadd.f32 %v2492_v27, %v1567_v4  ;;  %4439 = vpow2.f32 %v4221_v24  ;;  %v2498_v56 = vadd.f32 %v1570_v33, %v1569_v25  ;;  %v3049_v45 = vadd.f32 1.0, %v4432_v38  ;;  %v826_v21 = vld [vmem:[%s4864_s20 + $0x1360] sm:$0xff]  ;;  %v827_v33 = vld [vmem:[%s4864_s20 + $0x1368] sm:$0xff]  ;;  %v829_v35 = vld [vmem:[%s4864_s20 + $0x1378] sm:$0xff] }
 0x16d   : > { %2488 = vadd.xlane.f32.xlu1 %v2487_v36  ;;  %v1573_v46 = vmul.f32 %v4869_v18, %v816_v32  ;;  %v1575_v47 = vmul.f32 %v4851_v10, %v818_v59  ;;  %v1576_v48 = vmul.f32 %v4853_v11, %v819_v40  ;;  %4441 = vrcp.f32 %v3048_v23  ;;  %v6453_v24 = vpop.xlane.xlu0 %2064  ;;  %v830_v36 = vld [vmem:[%s4864_s20 + $0x1380] sm:$0xff]  ;;  %v828_v38 = vld [vmem:[%s4864_s20 + $0x1370] sm:$0xff] }
 0x16e   : > { %v2495_v53 = vadd.f32 %v2494_v28, %v2493_v41  ;;  %v2499_v54 = vadd.f32 %v2498_v56, %v1571_v34  ;;  %v1577_v61 = vmul.f32 %v4855_v12, %v820_v51  ;;  %4443 = vrcp.f32 %v3049_v45  ;;  %v832_v56 = vld [vmem:[%s4864_s20 + $0x1390] sm:$0xff]  ;;  %v833_v45 = vld [vmem:[%s4864_s20 + $0x1398] sm:$0xff] }
 0x16f   : > { %v2502_v0 = vsel %vm1693_vm0, %v1574_v22, 0.0  ;;  %v1578_v1 = vmul.f32 %v4857_v13, %v821_v43  ;;  %v1580_v2 = vmul.f32 %v4859_v14, %v823_v37  ;;  %v4434_v19 = vpop.eup %4433  ;;  %v2506_v9 = vadd.f32 %v1576_v48, %v1575_v47  ;;  %v6461_v22 = vpop.xlane.xlu1 %2072 }
 0x170   : > { %2496 = vadd.xlane.f32.xlu0 %v2495_v53  ;;  %v2500_v4 = vadd.f32 %v2499_v54, %v1572_v7  ;;  %v4222_v15 = vmul.f32 -1.442695, %v6229_v30  ;;  %v4223_v16 = vmul.f32 -1.442695, %v6251_v26  ;;  %v3676_v27 = vmul.f32 %v4434_v19, %v3434_v44  ;;  %v831_v7 = vld [vmem:[%s4864_s20 + $0x1388] sm:$0xff] }
 0x171   : > { %v4436_v25 = vpop.eup %4435  ;;  %v3677_v28 = vmul.f32 %v4434_v19, %v3435_v49  ;;  %v1579_v32 = vmul.f32 %v4869_v18, %v822_v57  ;;  %v1581_v34 = vmul.f32 %v4851_v10, %v824_v63  ;;  %v2507_v40 = vadd.f32 %v2506_v9, %v1577_v61  ;;  %v835_v49 = vld [vmem:[%s4864_s20 + $0x13a8] sm:$0xff]  ;;  %v3438_v61 = vld [vmem:[%s5869_s24 + $0x1b0] sm:$0xff]  ;;  %v3439_v63 = vld [vmem:[%s5869_s24 + $0x1b8] sm:$0xff] }
 0x172   : > { %v3678_v30 = vmul.f32 %v4436_v25, %v3436_v55  ;;  %v3679_v26 = vmul.f32 %v4436_v25, %v3437_v31  ;;  %v2501_v59 = vadd.f32 %v2500_v4, %v1573_v46  ;;  %3919 = vst [vmem:[%s5892_s27 + $0x190] sm:$0xff] %v3676_v27  ;;  %v2510_v51 = vsel %vm1693_vm0, %v1580_v2, 0.0  ;;  %v6484_v2 = vpop.xlane.xlu0 %2080  ;;  %v3440_v19 = vld [vmem:[%s5869_s24 + $0x1c0] sm:$0xff]  ;;  %v3441_v4 = vld [vmem:[%s5869_s24 + $0x1c8] sm:$0xff] }
 0x173   : > { %3920 = vst.msk [vmem:[%s5892_s27 + $0x198] sm:$0xff] %vm3869_vm1, %v3677_v28  ;;  %4445 = vpow2.f32 %v4222_v15  ;;  %v1582_v23 = vmul.f32 %v4853_v11, %v825_v17  ;;  %v1583_v41 = vmul.f32 %v4855_v12, %v826_v21  ;;  %v2508_v37 = vadd.f32 %v2507_v40, %v1578_v1  ;;  %v834_v17 = vld [vmem:[%s4864_s20 + $0x13a0] sm:$0xff] }
 0x174   : > { %3921 = vst [vmem:[%s5892_s27 + $0x1a0] sm:$0xff] %v3678_v30  ;;  %3922 = vst.msk [vmem:[%s5892_s27 + $0x1a8] sm:$0xff] %vm3869_vm1, %v3679_v26  ;;  %v2503_v43 = vadd.f32 %v2502_v0, %v2501_v59  ;;  %4447 = vpow2.f32 %v4223_v16  ;;  %v1584_v44 = vmul.f32 %v4857_v13, %v827_v33  ;;  %v4438_v46 = vpop.eup %4437  ;;  %v1586_v47 = vmul.f32 %v4859_v14, %v829_v35  ;;  %v836_v33 = vld [vmem:[%s4864_s20 + $0x13b0] sm:$0xff]  ;;  %v837_v35 = vld [vmem:[%s4864_s20 + $0x13b8] sm:$0xff] }
 0x175   : > { %v2514_v48 = vadd.f32 %v1582_v23, %v1581_v34  ;;  %v1587_v53 = vmul.f32 %v4851_v10, %v830_v36  ;;  %v1588_v54 = vmul.f32 %v4853_v11, %v831_v7  ;;  %v3050_v55 = vadd.f32 1.0, %v4438_v46  ;;  %v6493_v34 = vpop.xlane.xlu1 %2088  ;;  %v838_v36 = vld [vmem:[%s4864_s20 + $0x13c0] sm:$0xff] }
 0x176   : > { %v4440_v57 = vpop.eup %4439  ;;  %2504 = vadd.xlane.f32.xlu1 %v2503_v43  ;;  %v2509_v31 = vadd.f32 %v2508_v37, %v1579_v32  ;;  %v1585_v0 = vmul.f32 %v4869_v18, %v828_v38  ;;  %v1589_v1 = vmul.f32 %v4855_v12, %v832_v56  ;;  %v2518_v16 = vsel %vm1693_vm0, %v1586_v47, 0.0  ;;  %v841_v56 = vld [vmem:[%s4864_s20 + $0x13d8] sm:$0xff] }
 0x177   : > { %v3051_v9 = vadd.f32 1.0, %v4440_v57  ;;  %v2515_v15 = vadd.f32 %v2514_v48, %v1583_v41  ;;  %v1590_v21 = vmul.f32 %v4857_v13, %v833_v45  ;;  %v4442_v25 = vpop.eup %4441  ;;  %4449 = vrcp.f32 %v3050_v55  ;;  %v839_v41 = vld [vmem:[%s4864_s20 + $0x13c8] sm:$0xff]  ;;  %v840_v48 = vld [vmem:[%s4864_s20 + $0x13d0] sm:$0xff] }
 0x178   : > { %v2511_v27 = vadd.f32 %v2510_v51, %v2509_v31  ;;  %v1592_v28 = vmul.f32 %v4859_v14, %v835_v49  ;;  %v2522_v32 = vadd.f32 %v1588_v54, %v1587_v53  ;;  %v4444_v30 = vpop.eup %4443  ;;  %v3680_v26 = vmul.f32 %v4442_v25, %v3438_v61  ;;  %v842_v54 = vld [vmem:[%s4864_s20 + $0x13e0] sm:$0xff]  ;;  %v844_v31 = vld [vmem:[%s4864_s20 + $0x13f0] sm:$0xff] }
 0x179   : > { %v3681_v59 = vmul.f32 %v4442_v25, %v3439_v63  ;;  %4451 = vrcp.f32 %v3051_v9  ;;  %v2516_v40 = vadd.f32 %v2515_v15, %v1584_v44  ;;  %v3682_v7 = vmul.f32 %v4444_v30, %v3440_v19  ;;  %v845_v9 = vld [vmem:[%s4864_s20 + $0x13f8] sm:$0xff]  ;;  %v847_v15 = vld [vmem:[%s4864_s20 + $0x1408] sm:$0xff] }
 0x17a   : > { %v3683_v51 = vmul.f32 %v4444_v30, %v3441_v4  ;;  %2512 = vadd.xlane.f32.xlu0 %v2511_v27  ;;  %v1591_v38 = vmul.f32 %v4869_v18, %v834_v17  ;;  %v2523_v23 = vadd.f32 %v2522_v32, %v1589_v1  ;;  %3923 = vst [vmem:[%s5892_s27 + $0x1b0] sm:$0xff] %v3680_v26  ;;  %v4224_v37 = vmul.f32 -1.442695, %v6258_v3  ;;  %v843_v3 = vld [vmem:[%s4864_s20 + $0x13e8] sm:$0xff]  ;;  %v6522_v17 = vpop.xlane.xlu1 %2104  ;;  %v3443_v32 = vld [vmem:[%s5869_s24 + $0x1d8] sm:$0xff]  ;;  %v846_v26 = vld [vmem:[%s4864_s20 + $0x1400] sm:$0xff] }
 0x17b   : > { %3924 = vst.msk [vmem:[%s5892_s27 + $0x1b8] sm:$0xff] %vm3869_vm1, %v3681_v59  ;;  %v2517_v43 = vadd.f32 %v2516_v40, %v1585_v0  ;;  %v4225_v44 = vmul.f32 -1.442695, %v6277_v8  ;;  %v1593_v45 = vmul.f32 %v4851_v10, %v836_v33  ;;  %3925 = vst [vmem:[%s5892_s27 + $0x1c0] sm:$0xff] %v3682_v7  ;;  %v2526_v47 = vsel %vm1693_vm0, %v1592_v28, 0.0  ;;  %v6515_v8 = vpop.xlane.xlu0 %2096  ;;  %v848_v40 = vld [vmem:[%s4864_s20 + $0x1410] sm:$0xff] }
 0x17c   : > { %3926 = vst.msk [vmem:[%s5892_s27 + $0x1c8] sm:$0xff] %vm3869_vm1, %v3683_v51  ;;  %v2524_v46 = vadd.f32 %v2523_v23, %v1590_v21  ;;  %v1594_v49 = vmul.f32 %v4853_v11, %v837_v35  ;;  %v1595_v53 = vmul.f32 %v4855_v12, %v838_v36  ;;  %4453 = vpow2.f32 %v4224_v37  ;;  %v3444_v35 = vld [vmem:[%s5869_s24 + $0x1e0] sm:$0xff]  ;;  %v3445_v36 = vld [vmem:[%s5869_s24 + $0x1e8] sm:$0xff] }
 0x17d   : > { %v4446_v57 = vpop.eup %4445  ;;  %v2519_v61 = vadd.f32 %v2518_v16, %v2517_v43  ;;  %v1596_v63 = vmul.f32 %v4857_v13, %v839_v41  ;;  %v1598_v55 = vmul.f32 %v4859_v14, %v841_v56  ;;  %4455 = vpow2.f32 %v4225_v44  ;;  %v3442_v16 = vld [vmem:[%s5869_s24 + $0x1d0] sm:$0xff]  ;;  %v849_v44 = vld [vmem:[%s4864_s20 + $0x1418] sm:$0xff] }
 0x17e   : > { %v4448_v0 = vpop.eup %4447  ;;  %v3052_v1 = vadd.f32 1.0, %v4446_v57  ;;  %v2525_v19 = vadd.f32 %v2524_v46, %v1591_v38  ;;  %v2530_v4 = vadd.f32 %v1594_v49, %v1593_v45  ;;  %v1597_v25 = vmul.f32 %v4869_v18, %v840_v48  ;;  %v850_v45 = vld [vmem:[%s4864_s20 + $0x1420] sm:$0xff] }
 0x17f   : > { %v3053_v21 = vadd.f32 1.0, %v4448_v0  ;;  %2520 = vadd.xlane.f32.xlu1 %v2519_v61  ;;  %v1599_v27 = vmul.f32 %v4851_v10, %v842_v54  ;;  %v1600_v28 = vmul.f32 %v4853_v11, %v843_v3  ;;  %v1601_v59 = vmul.f32 %v4855_v12, %v844_v31  ;;  %v6541_v46 = vpop.xlane.xlu0 %2112  ;;  %v851_v54 = vld [vmem:[%s4864_s20 + $0x1428] sm:$0xff]  ;;  %v6549_v0 = vpop.xlane.xlu1 %2120 }
 0x180   : > { %4457 = vrcp.f32 %v3052_v1  ;;  %v2527_v33 = vadd.f32 %v2526_v47, %v2525_v19  ;;  %v2531_v30 = vadd.f32 %v2530_v4, %v1595_v53  ;;  %v2534_v7 = vsel %vm1693_vm0, %v1598_v55, 0.0  ;;  %v854_v55 = vld [vmem:[%s4864_s20 + $0x1440] sm:$0xff]  ;;  %v855_v31 = vld [vmem:[%s4864_s20 + $0x1448] sm:$0xff]  ;;  %v852_v19 = vld [vmem:[%s4864_s20 + $0x1430] sm:$0xff] }
 0x181   : > { %4459 = vrcp.f32 %v3053_v21  ;;  %v1602_v51 = vmul.f32 %v4857_v13, %v845_v9  ;;  %v1604_v38 = vmul.f32 %v4859_v14, %v847_v15  ;;  %v4450_v23 = vpop.eup %4449  ;;  %v2538_v56 = vadd.f32 %v1600_v28, %v1599_v27  ;;  %v856_v15 = vld [vmem:[%s4864_s20 + $0x1450] sm:$0xff]  ;;  %v857_v27 = vld [vmem:[%s4864_s20 + $0x1458] sm:$0xff] }
 0x182   : > { %2528 = vadd.xlane.f32.xlu0 %v2527_v33  ;;  %v2532_v41 = vadd.f32 %v2531_v30, %v1596_v63  ;;  %v4226_v43 = vmul.f32 -1.442695, %v6285_v50  ;;  %v4227_v37 = vmul.f32 -1.442695, %v6308_v29  ;;  %v3684_v48 = vmul.f32 %v4450_v23, %v3442_v16  ;;  %v853_v63 = vld [vmem:[%s4864_s20 + $0x1438] sm:$0xff]  ;;  %v859_v30 = vld [vmem:[%s4864_s20 + $0x1468] sm:$0xff] }
 0x183   : > { %v4452_v47 = vpop.eup %4451  ;;  %v3685_v49 = vmul.f32 %v4450_v23, %v3443_v32  ;;  %v1603_v53 = vmul.f32 %v4869_v18, %v846_v26  ;;  %v1605_v3 = vmul.f32 %v4851_v10, %v848_v40  ;;  %v2539_v61 = vadd.f32 %v2538_v56, %v1601_v59  ;;  %v3448_v56 = vld [vmem:[%s5869_s24 + $0x200] sm:$0xff] }
 0x184   : > { %v3686_v50 = vmul.f32 %v4452_v47, %v3444_v35  ;;  %v3687_v29 = vmul.f32 %v4452_v47, %v3445_v36  ;;  %v2533_v57 = vadd.f32 %v2532_v41, %v1597_v25  ;;  %3927 = vst [vmem:[%s5892_s27 + $0x1d0] sm:$0xff] %v3684_v48  ;;  %v2542_v1 = vsel %vm1693_vm0, %v1604_v38, 0.0  ;;  %v3446_v35 = vld [vmem:[%s5869_s24 + $0x1f0] sm:$0xff]  ;;  %v3447_v36 = vld [vmem:[%s5869_s24 + $0x1f8] sm:$0xff]  ;;  %v6572_v41 = vpop.xlane.xlu0 %2128  ;;  %v858_v47 = vld [vmem:[%s4864_s20 + $0x1460] sm:$0xff] }
 0x185   : > { %3928 = vst.msk [vmem:[%s5892_s27 + $0x1d8] sm:$0xff] %vm3869_vm1, %v3685_v49  ;;  %4461 = vpow2.f32 %v4226_v43  ;;  %v1606_v4 = vmul.f32 %v4853_v11, %v849_v44  ;;  %v1607_v9 = vmul.f32 %v4855_v12, %v850_v45  ;;  %v2540_v21 = vadd.f32 %v2539_v61, %v1602_v51  ;;  %v3449_v43 = vld [vmem:[%s5869_s24 + $0x208] sm:$0xff] }
 0x186   : > { %3929 = vst [vmem:[%s5892_s27 + $0x1e0] sm:$0xff] %v3686_v50  ;;  %3930 = vst.msk [vmem:[%s5892_s27 + $0x1e8] sm:$0xff] %vm3869_vm1, %v3687_v29  ;;  %v2535_v16 = vadd.f32 %v2534_v7, %v2533_v57  ;;  %4463 = vpow2.f32 %v4227_v37  ;;  %v1608_v25 = vmul.f32 %v4857_v13, %v851_v54  ;;  %v4454_v28 = vpop.eup %4453  ;;  %v1610_v32 = vmul.f32 %v4859_v14, %v853_v63  ;;  %v860_v50 = vld [vmem:[%s4864_s20 + $0x1470] sm:$0xff]  ;;  %v6581_v29 = vpop.xlane.xlu1 %2136 }
 0x187   : > { %v2546_v33 = vadd.f32 %v1606_v4, %v1605_v3  ;;  %v1611_v26 = vmul.f32 %v4851_v10, %v854_v55  ;;  %v1612_v59 = vmul.f32 %v4853_v11, %v855_v31  ;;  %v4456_v40 = vpop.eup %4455  ;;  %v3054_v7 = vadd.f32 1.0, %v4454_v28  ;;  %v861_v31 = vld [vmem:[%s4864_s20 + $0x1478] sm:$0xff] }
 0x188   : > { %2536 = vadd.xlane.f32.xlu1 %v2535_v16  ;;  %v2541_v51 = vadd.f32 %v2540_v21, %v1603_v53  ;;  %v1609_v38 = vmul.f32 %v4869_v18, %v852_v19  ;;  %v1613_v23 = vmul.f32 %v4855_v12, %v856_v15  ;;  %v3055_v37 = vadd.f32 1.0, %v4456_v40  ;;  %v862_v19 = vld [vmem:[%s4864_s20 + $0x1480] sm:$0xff]  ;;  %v863_v16 = vld [vmem:[%s4864_s20 + $0x1488] sm:$0xff]  ;;  %v865_v21 = vld [vmem:[%s4864_s20 + $0x1498] sm:$0xff] }
 0x189   : > { %v2547_v44 = vadd.f32 %v2546_v33, %v1607_v9  ;;  %v2550_v45 = vsel %vm1693_vm0, %v1610_v32, 0.0  ;;  %v1614_v48 = vmul.f32 %v4857_v13, %v857_v27  ;;  %4465 = vrcp.f32 %v3054_v7 }
 0x18a   : > { %v4458_v49 = vpop.eup %4457  ;;  %v2543_v53 = vadd.f32 %v2542_v1, %v2541_v51  ;;  %v1616_v54 = vmul.f32 %v4859_v14, %v859_v30  ;;  %v2554_v3 = vadd.f32 %v1612_v59, %v1611_v26  ;;  %4467 = vrcp.f32 %v3055_v37  ;;  %v864_v26 = vld [vmem:[%s4864_s20 + $0x1490] sm:$0xff] }
 0x18b   : > { %v4460_v57 = vpop.eup %4459  ;;  %v3688_v61 = vmul.f32 %v4458_v49, %v3446_v35  ;;  %v3689_v63 = vmul.f32 %v4458_v49, %v3447_v36  ;;  %v2548_v55 = vadd.f32 %v2547_v44, %v1608_v25  ;;  %v1615_v9 = vmul.f32 %v4869_v18, %v858_v47  ;;  %v866_v35 = vld [vmem:[%s4864_s20 + $0x14a0] sm:$0xff]  ;;  %v869_v47 = vld [vmem:[%s4864_s20 + $0x14b8] sm:$0xff]  ;;  %v6610_v49 = vpop.xlane.xlu1 %2152 }
 0x18c   : > { %v3690_v1 = vmul.f32 %v4460_v57, %v3448_v56  ;;  %v3691_v4 = vmul.f32 %v4460_v57, %v3449_v43  ;;  %2544 = vadd.xlane.f32.xlu0 %v2543_v53  ;;  %v2555_v15 = vadd.f32 %v2554_v3, %v1613_v23  ;;  %v4228_v25 = vmul.f32 -1.442695, %v6317_v39  ;;  %v867_v39 = vld [vmem:[%s4864_s20 + $0x14a8] sm:$0xff]  ;;  %v868_v23 = vld [vmem:[%s4864_s20 + $0x14b0] sm:$0xff]  ;;  %v3451_v57 = vld [vmem:[%s5869_s24 + $0x218] sm:$0xff] }
 0x18d   : > { %3931 = vst [vmem:[%s5892_s27 + $0x1f0] sm:$0xff] %v3688_v61  ;;  %3932 = vst.msk [vmem:[%s5892_s27 + $0x1f8] sm:$0xff] %vm3869_vm1, %v3689_v63  ;;  %v2549_v27 = vadd.f32 %v2548_v55, %v1609_v38  ;;  %v4229_v28 = vmul.f32 -1.442695, %v6339_v58  ;;  %v1617_v32 = vmul.f32 %v4851_v10, %v860_v50  ;;  %v2558_v30 = vsel %vm1693_vm0, %v1616_v54, 0.0  ;;  %v6603_v58 = vpop.xlane.xlu0 %2144  ;;  %v870_v55 = vld [vmem:[%s4864_s20 + $0x14c0] sm:$0xff] }
 0x18e   : > { %3933 = vst [vmem:[%s5892_s27 + $0x200] sm:$0xff] %v3690_v1  ;;  %3934 = vst.msk [vmem:[%s5892_s27 + $0x208] sm:$0xff] %vm3869_vm1, %v3691_v4  ;;  %v2556_v33 = vadd.f32 %v2555_v15, %v1614_v48  ;;  %v1618_v59 = vmul.f32 %v4853_v11, %v861_v31  ;;  %v1619_v40 = vmul.f32 %v4855_v12, %v862_v19  ;;  %4469 = vpow2.f32 %v4228_v25  ;;  %v871_v48 = vld [vmem:[%s4864_s20 + $0x14c8] sm:$0xff]  ;;  %v872_v19 = vld [vmem:[%s4864_s20 + $0x14d0] sm:$0xff] }
 0x18f   : > { %v4462_v36 = vpop.eup %4461  ;;  %v2551_v7 = vadd.f32 %v2550_v45, %v2549_v27  ;;  %v1620_v51 = vmul.f32 %v4857_v13, %v863_v16  ;;  %v1622_v38 = vmul.f32 %v4859_v14, %v865_v21  ;;  %4471 = vpow2.f32 %v4229_v28  ;;  %v3450_v45 = vld [vmem:[%s5869_s24 + $0x210] sm:$0xff]  ;;  %v3452_v1 = vld [vmem:[%s5869_s24 + $0x220] sm:$0xff]  ;;  %v3453_v4 = vld [vmem:[%s5869_s24 + $0x228] sm:$0xff] }
 0x190   : > { %v4464_v56 = vpop.eup %4463  ;;  %v3056_v43 = vadd.f32 1.0, %v4462_v36  ;;  %v2557_v37 = vadd.f32 %v2556_v33, %v1615_v9  ;;  %v2562_v44 = vadd.f32 %v1618_v59, %v1617_v32  ;;  %v1621_v54 = vmul.f32 %v4869_v18, %v864_v26  ;;  %v873_v33 = vld [vmem:[%s4864_s20 + $0x14d8] sm:$0xff]  ;;  %v875_v36 = vld [vmem:[%s4864_s20 + $0x14e8] sm:$0xff] }
 0x191   : > { %v3057_v53 = vadd.f32 1.0, %v4464_v56  ;;  %2552 = vadd.xlane.f32.xlu1 %v2551_v7  ;;  %v1623_v3 = vmul.f32 %v4851_v10, %v866_v35  ;;  %v1624_v50 = vmul.f32 %v4853_v11, %v867_v39  ;;  %v1625_v31 = vmul.f32 %v4855_v12, %v868_v23  ;;  %v6629_v26 = vpop.xlane.xlu0 %2160  ;;  %v877_v23 = vld [vmem:[%s4864_s20 + $0x14f8] sm:$0xff]  ;;  %v878_v56 = vld [vmem:[%s4864_s20 + $0x1500] sm:$0xff] }
 0x192   : > { %4473 = vrcp.f32 %v3056_v43  ;;  %v2559_v61 = vadd.f32 %v2558_v30, %v2557_v37  ;;  %v2563_v63 = vadd.f32 %v2562_v44, %v1619_v40  ;;  %v2566_v9 = vsel %vm1693_vm0, %v1622_v38, 0.0  ;;  %v874_v30 = vld [vmem:[%s4864_s20 + $0x14e0] sm:$0xff]  ;;  %v879_v43 = vld [vmem:[%s4864_s20 + $0x1508] sm:$0xff]  ;;  %v6637_v37 = vpop.xlane.xlu1 %2168 }
 0x193   : > { %4475 = vrcp.f32 %v3057_v53  ;;  %v1626_v15 = vmul.f32 %v4857_v13, %v869_v47  ;;  %v1628_v16 = vmul.f32 %v4859_v14, %v871_v48  ;;  %v4466_v21 = vpop.eup %4465  ;;  %v2570_v25 = vadd.f32 %v1624_v50, %v1623_v3  ;;  %v876_v47 = vld [vmem:[%s4864_s20 + $0x14f0] sm:$0xff] }
 0x194   : > { %2560 = vadd.xlane.f32.xlu0 %v2559_v61  ;;  %v2564_v27 = vadd.f32 %v2563_v63, %v1620_v51  ;;  %v4230_v28 = vmul.f32 -1.442695, %v6346_v20  ;;  %v4231_v32 = vmul.f32 -1.442695, %v6365_v52  ;;  %v4468_v59 = vpop.eup %4467  ;;  %v3692_v40 = vmul.f32 %v4466_v21, %v3450_v45  ;;  %v880_v53 = vld [vmem:[%s4864_s20 + $0x1510] sm:$0xff] }
 0x195   : > { %v3693_v35 = vmul.f32 %v4466_v21, %v3451_v57  ;;  %v1627_v39 = vmul.f32 %v4869_v18, %v870_v55  ;;  %v1629_v7 = vmul.f32 %v4851_v10, %v872_v19  ;;  %v3694_v20 = vmul.f32 %v4468_v59, %v3452_v1  ;;  %v881_v57 = vld [vmem:[%s4864_s20 + $0x1518] sm:$0xff] }
 0x196   : > { %v3695_v52 = vmul.f32 %v4468_v59, %v3453_v4  ;;  %v2565_v51 = vadd.f32 %v2564_v27, %v1621_v54  ;;  %v2571_v38 = vadd.f32 %v2570_v25, %v1625_v31  ;;  %3935 = vst [vmem:[%s5892_s27 + $0x210] sm:$0xff] %v3692_v40  ;;  %v2574_v44 = vsel %vm1693_vm0, %v1628_v16, 0.0  ;;  %v883_v31 = vld [vmem:[%s4864_s20 + $0x1528] sm:$0xff]  ;;  %v3454_v16 = vld [vmem:[%s5869_s24 + $0x230] sm:$0xff] }
 0x197   : > { %3936 = vst.msk [vmem:[%s5892_s27 + $0x218] sm:$0xff] %vm3869_vm1, %v3693_v35  ;;  %4477 = vpow2.f32 %v4230_v28  ;;  %v1630_v48 = vmul.f32 %v4853_v11, %v873_v33  ;;  %v1631_v45 = vmul.f32 %v4855_v12, %v874_v30  ;;  %3937 = vst [vmem:[%s5892_s27 + $0x220] sm:$0xff] %v3694_v20  ;;  %v1632_v50 = vmul.f32 %v4857_v13, %v875_v36  ;;  %v6660_v28 = vpop.xlane.xlu0 %2176  ;;  %v3457_v33 = vld [vmem:[%s5869_s24 + $0x248] sm:$0xff]  ;;  %v882_v35 = vld [vmem:[%s4864_s20 + $0x1520] sm:$0xff] }
 0x198   : > { %3938 = vst.msk [vmem:[%s5892_s27 + $0x228] sm:$0xff] %vm3869_vm1, %v3695_v52  ;;  %v2567_v54 = vadd.f32 %v2566_v9, %v2565_v51  ;;  %v2572_v3 = vadd.f32 %v2571_v38, %v1626_v15  ;;  %4479 = vpow2.f32 %v4231_v32  ;;  %v4470_v61 = vpop.eup %4469  ;;  %v1634_v63 = vmul.f32 %v4859_v14, %v877_v23  ;;  %v3455_v9 = vld [vmem:[%s5869_s24 + $0x238] sm:$0xff]  ;;  %v3456_v32 = vld [vmem:[%s5869_s24 + $0x240] sm:$0xff]  ;;  %v884_v51 = vld [vmem:[%s4864_s20 + $0x1530] sm:$0xff]  ;;  %v6669_v38 = vpop.xlane.xlu1 %2184 }
 0x199   : > { %v2578_v55 = vadd.f32 %v1630_v48, %v1629_v7  ;;  %v1635_v19 = vmul.f32 %v4851_v10, %v878_v56  ;;  %v1636_v1 = vmul.f32 %v4853_v11, %v879_v43  ;;  %v4472_v4 = vpop.eup %4471  ;;  %v3058_v15 = vadd.f32 1.0, %v4470_v61  ;;  %v885_v48 = vld [vmem:[%s4864_s20 + $0x1538] sm:$0xff] }
 0x19a   : > { %2568 = vadd.xlane.f32.xlu1 %v2567_v54  ;;  %v2573_v21 = vadd.f32 %v2572_v3, %v1627_v39  ;;  %v1633_v27 = vmul.f32 %v4869_v18, %v876_v47  ;;  %v1637_v25 = vmul.f32 %v4855_v12, %v880_v53  ;;  %v3059_v30 = vadd.f32 1.0, %v4472_v4  ;;  %v889_v61 = vld [vmem:[%s4864_s20 + $0x1558] sm:$0xff]  ;;  %v888_v4 = vld [vmem:[%s4864_s20 + $0x1550] sm:$0xff] }
 0x19b   : > { %v2579_v59 = vadd.f32 %v2578_v55, %v1631_v45  ;;  %v2582_v40 = vsel %vm1693_vm0, %v1634_v63, 0.0  ;;  %v1638_v36 = vmul.f32 %v4857_v13, %v881_v57  ;;  %4481 = vrcp.f32 %v3058_v15  ;;  %v886_v45 = vld [vmem:[%s4864_s20 + $0x1540] sm:$0xff]  ;;  %v887_v57 = vld [vmem:[%s4864_s20 + $0x1548] sm:$0xff] }
 0x19c   : > { %v4474_v7 = vpop.eup %4473  ;;  %v2575_v39 = vadd.f32 %v2574_v44, %v2573_v21  ;;  %v1640_v20 = vmul.f32 %v4859_v14, %v883_v31  ;;  %v2586_v52 = vadd.f32 %v1636_v1, %v1635_v19  ;;  %4483 = vrcp.f32 %v3059_v30  ;;  %v890_v15 = vld [vmem:[%s4864_s20 + $0x1560] sm:$0xff] }
 0x19d   : > { %v4476_v23 = vpop.eup %4475  ;;  %v3696_v56 = vmul.f32 %v4474_v7, %v3454_v16  ;;  %v3697_v43 = vmul.f32 %v4474_v7, %v3455_v9  ;;  %v2580_v47 = vadd.f32 %v2579_v59, %v1632_v50  ;;  %v1639_v54 = vmul.f32 %v4869_v18, %v882_v35  ;;  %v893_v7 = vld [vmem:[%s4864_s20 + $0x1578] sm:$0xff] }
 0x19e   : > { %v3698_v44 = vmul.f32 %v4476_v23, %v3456_v32  ;;  %v3699_v53 = vmul.f32 %v4476_v23, %v3457_v33  ;;  %2576 = vadd.xlane.f32.xlu0 %v2575_v39  ;;  %v2587_v3 = vadd.f32 %v2586_v52, %v1637_v25  ;;  %v4232_v50 = vmul.f32 -1.442695, %v6373_v6  ;;  %v891_v6 = vld [vmem:[%s4864_s20 + $0x1568] sm:$0xff]  ;;  %v892_v33 = vld [vmem:[%s4864_s20 + $0x1570] sm:$0xff] }
 0x19f   : > { %3939 = vst [vmem:[%s5892_s27 + $0x230] sm:$0xff] %v3696_v56  ;;  %3940 = vst.msk [vmem:[%s5892_s27 + $0x238] sm:$0xff] %vm3869_vm1, %v3697_v43  ;;  %v2581_v63 = vadd.f32 %v2580_v47, %v1633_v27  ;;  %v4233_v55 = vmul.f32 -1.442695, %v6396_v42  ;;  %v1641_v31 = vmul.f32 %v4851_v10, %v884_v51  ;;  %v2590_v1 = vsel %vm1693_vm0, %v1640_v20, 0.0  ;;  %v6691_v42 = vpop.xlane.xlu0 %2192  ;;  %v895_v39 = vld [vmem:[%s4864_s20 + $0x1588] sm:$0xff]  ;;  %v6698_v20 = vpop.xlane.xlu1 %2200 }
 0x1a0   : > { %3941 = vst [vmem:[%s5892_s27 + $0x240] sm:$0xff] %v3698_v44  ;;  %3942 = vst.msk [vmem:[%s5892_s27 + $0x248] sm:$0xff] %vm3869_vm1, %v3699_v53  ;;  %v2588_v19 = vadd.f32 %v2587_v3, %v1638_v36  ;;  %v1642_v16 = vmul.f32 %v4853_v11, %v885_v48  ;;  %v1643_v9 = vmul.f32 %v4855_v12, %v886_v45  ;;  %4485 = vpow2.f32 %v4232_v50  ;;  %v3459_v43 = vld [vmem:[%s5869_s24 + $0x258] sm:$0xff]  ;;  %v894_v45 = vld [vmem:[%s4864_s20 + $0x1580] sm:$0xff] }
 0x1a1   : > { %v4478_v21 = vpop.eup %4477  ;;  %v2583_v27 = vadd.f32 %v2582_v40, %v2581_v63  ;;  %v1644_v25 = vmul.f32 %v4857_v13, %v887_v57  ;;  %v1646_v32 = vmul.f32 %v4859_v14, %v889_v61  ;;  %4487 = vpow2.f32 %v4233_v55  ;;  %v3458_v40 = vld [vmem:[%s5869_s24 + $0x250] sm:$0xff]  ;;  %v3461_v3 = vld [vmem:[%s5869_s24 + $0x268] sm:$0xff] }
 0x1a2   : > { %v4480_v30 = vpop.eup %4479  ;;  %v3060_v59 = vadd.f32 1.0, %v4478_v21  ;;  %v2589_v35 = vadd.f32 %v2588_v19, %v1639_v54  ;;  %v2594_v36 = vadd.f32 %v1642_v16, %v1641_v31  ;;  %v1645_v51 = vmul.f32 %v4869_v18, %v888_v4  ;;  %v896_v53 = vld [vmem:[%s4864_s20 + $0x1590] sm:$0xff]  ;;  %v3460_v54 = vld [vmem:[%s5869_s24 + $0x260] sm:$0xff]  ;;  %v897_v4 = vld [vmem:[%s4864_s20 + $0x1598] sm:$0xff] }
 0x1a3   : > { %v3061_v52 = vadd.f32 1.0, %v4480_v30  ;;  %2584 = vadd.xlane.f32.xlu1 %v2583_v27  ;;  %v1647_v23 = vmul.f32 %v4851_v10, %v890_v15  ;;  %v1648_v56 = vmul.f32 %v4853_v11, %v891_v6  ;;  %v1649_v44 = vmul.f32 %v4855_v12, %v892_v33  ;;  %v898_v16 = vld [vmem:[%s4864_s20 + $0x15a0] sm:$0xff] }
 0x1a4   : > { %4489 = vrcp.f32 %v3060_v59  ;;  %v2591_v47 = vadd.f32 %v2590_v1, %v2589_v35  ;;  %v2595_v48 = vadd.f32 %v2594_v36, %v1643_v9  ;;  %v2598_v57 = vsel %vm1693_vm0, %v1646_v32, 0.0  ;;  %v6717_v9 = vpop.xlane.xlu0 %2208  ;;  %v901_v59 = vld [vmem:[%s4864_s20 + $0x15b8] sm:$0xff]  ;;  %v902_v35 = vld [vmem:[%s4864_s20 + $0x15c0] sm:$0xff]  ;;  %v903_v36 = vld [vmem:[%s4864_s20 + $0x15c8] sm:$0xff] }
 0x1a5   : > { %4491 = vrcp.f32 %v3061_v52  ;;  %v1650_v61 = vmul.f32 %v4857_v13, %v893_v7  ;;  %v1652_v63 = vmul.f32 %v4859_v14, %v895_v39  ;;  %v4482_v50 = vpop.eup %4481  ;;  %v2602_v31 = vadd.f32 %v1648_v56, %v1647_v23  ;;  %v6725_v7 = vpop.xlane.xlu1 %2216 }
 0x1a6   : > { %2592 = vadd.xlane.f32.xlu0 %v2591_v47  ;;  %v2596_v55 = vadd.f32 %v2595_v48, %v1644_v25  ;;  %v4234_v19 = vmul.f32 -1.442695, %v6405_v60  ;;  %v4235_v1 = vmul.f32 -1.442695, %v6427_v5  ;;  %v4484_v15 = vpop.eup %4483  ;;  %v3700_v6 = vmul.f32 %v4482_v50, %v3458_v40  ;;  %v899_v25 = vld [vmem:[%s4864_s20 + $0x15a8] sm:$0xff]  ;;  %v900_v40 = vld [vmem:[%s4864_s20 + $0x15b0] sm:$0xff] }
 0x1a7   : > { %v3701_v21 = vmul.f32 %v4482_v50, %v3459_v43  ;;  %v1651_v27 = vmul.f32 %v4869_v18, %v894_v45  ;;  %v1653_v32 = vmul.f32 %v4851_v10, %v896_v53  ;;  %v3702_v60 = vmul.f32 %v4484_v15, %v3460_v54  ;;  %v905_v48 = vld [vmem:[%s4864_s20 + $0x15d8] sm:$0xff]  ;;  %v907_v54 = vld [vmem:[%s4864_s20 + $0x15e8] sm:$0xff] }
 0x1a8   : > { %v3703_v5 = vmul.f32 %v4484_v15, %v3461_v3  ;;  %v2597_v33 = vadd.f32 %v2596_v55, %v1645_v51  ;;  %v2603_v30 = vadd.f32 %v2602_v31, %v1649_v44  ;;  %3943 = vst [vmem:[%s5892_s27 + $0x250] sm:$0xff] %v3700_v6  ;;  %v2606_v39 = vsel %vm1693_vm0, %v1652_v63, 0.0  ;;  %v904_v51 = vld [vmem:[%s4864_s20 + $0x15d0] sm:$0xff]  ;;  %v3465_v15 = vld [vmem:[%s5869_s24 + $0x288] sm:$0xff] }
 0x1a9   : > { %3944 = vst.msk [vmem:[%s5892_s27 + $0x258] sm:$0xff] %vm3869_vm1, %v3701_v21  ;;  %4493 = vpow2.f32 %v4234_v19  ;;  %v1654_v52 = vmul.f32 %v4853_v11, %v897_v4  ;;  %v1655_v23 = vmul.f32 %v4855_v12, %v898_v16  ;;  %3945 = vst [vmem:[%s5892_s27 + $0x260] sm:$0xff] %v3702_v60  ;;  %v1656_v47 = vmul.f32 %v4857_v13, %v899_v25  ;;  %v3462_v55 = vld [vmem:[%s5869_s24 + $0x270] sm:$0xff]  ;;  %v6748_v4 = vpop.xlane.xlu0 %2224  ;;  %v3464_v16 = vld [vmem:[%s5869_s24 + $0x280] sm:$0xff] }
 0x1aa   : > { %3946 = vst.msk [vmem:[%s5892_s27 + $0x268] sm:$0xff] %vm3869_vm1, %v3703_v5  ;;  %v2599_v56 = vadd.f32 %v2598_v57, %v2597_v33  ;;  %v2604_v43 = vadd.f32 %v2603_v30, %v1650_v61  ;;  %4495 = vpow2.f32 %v4235_v1  ;;  %v4486_v45 = vpop.eup %4485  ;;  %v1658_v44 = vmul.f32 %v4859_v14, %v901_v59  ;;  %v3463_v57 = vld [vmem:[%s5869_s24 + $0x278] sm:$0xff]  ;;  %v908_v59 = vld [vmem:[%s4864_s20 + $0x15f0] sm:$0xff] }
 0x1ab   : > { %v2610_v53 = vadd.f32 %v1654_v52, %v1653_v32  ;;  %v1659_v3 = vmul.f32 %v4851_v10, %v902_v35  ;;  %v1660_v63 = vmul.f32 %v4853_v11, %v903_v36  ;;  %v4488_v50 = vpop.eup %4487  ;;  %v3062_v61 = vadd.f32 1.0, %v4486_v45  ;;  %v906_v32 = vld [vmem:[%s4864_s20 + $0x15e0] sm:$0xff]  ;;  %v6757_v35 = vpop.xlane.xlu1 %2232 }
 0x1ac   : > { %2600 = vadd.xlane.f32.xlu1 %v2599_v56  ;;  %v2605_v31 = vadd.f32 %v2604_v43, %v1651_v27  ;;  %v1657_v19 = vmul.f32 %v4869_v18, %v900_v40  ;;  %v1661_v1 = vmul.f32 %v4855_v12, %v904_v51  ;;  %v3063_v6 = vadd.f32 1.0, %v4488_v50  ;;  %v909_v51 = vld [vmem:[%s4864_s20 + $0x15f8] sm:$0xff]  ;;  %v910_v56 = vld [vmem:[%s4864_s20 + $0x1600] sm:$0xff] }
 0x1ad   : > { %v2611_v21 = vadd.f32 %v2610_v53, %v1655_v23  ;;  %v2614_v25 = vsel %vm1693_vm0, %v1658_v44, 0.0  ;;  %v1662_v60 = vmul.f32 %v4857_v13, %v905_v48  ;;  %4497 = vrcp.f32 %v3062_v61  ;;  %v911_v44 = vld [vmem:[%s4864_s20 + $0x1608] sm:$0xff]  ;;  %v913_v53 = vld [vmem:[%s4864_s20 + $0x1618] sm:$0xff] }
 0x1ae   : > { %v4490_v5 = vpop.eup %4489  ;;  %v2607_v27 = vadd.f32 %v2606_v39, %v2605_v31  ;;  %v1664_v33 = vmul.f32 %v4859_v14, %v907_v54  ;;  %v2618_v30 = vadd.f32 %v1660_v63, %v1659_v3  ;;  %4499 = vrcp.f32 %v3063_v6 }
 0x1af   : > { %v4492_v36 = vpop.eup %4491  ;;  %v3704_v40 = vmul.f32 %v4490_v5, %v3462_v55  ;;  %v3705_v52 = vmul.f32 %v4490_v5, %v3463_v57  ;;  %v2612_v23 = vadd.f32 %v2611_v21, %v1656_v47  ;;  %v1663_v48 = vmul.f32 %v4869_v18, %v906_v32  ;;  %v912_v57 = vld [vmem:[%s4864_s20 + $0x1610] sm:$0xff] }
 0x1b0   : > { %v3706_v39 = vmul.f32 %v4492_v36, %v3464_v16  ;;  %v3707_v43 = vmul.f32 %v4492_v36, %v3465_v15  ;;  %2608 = vadd.xlane.f32.xlu0 %v2607_v27  ;;  %v2619_v45 = vadd.f32 %v2618_v30, %v1661_v1  ;;  %v4236_v47 = vmul.f32 -1.442695, %v6434_v62  ;;  %v915_v62 = vld [vmem:[%s4864_s20 + $0x1628] sm:$0xff]  ;;  %v916_v21 = vld [vmem:[%s4864_s20 + $0x1630] sm:$0xff] }
 0x1b1   : > { %3947 = vst [vmem:[%s5892_s27 + $0x270] sm:$0xff] %v3704_v40  ;;  %3948 = vst.msk [vmem:[%s5892_s27 + $0x278] sm:$0xff] %vm3869_vm1, %v3705_v52  ;;  %v2613_v54 = vadd.f32 %v2612_v23, %v1657_v19  ;;  %v4237_v3 = vmul.f32 -1.442695, %v6453_v24  ;;  %v1665_v63 = vmul.f32 %v4851_v10, %v908_v59  ;;  %v2622_v55 = vsel %vm1693_vm0, %v1664_v33, 0.0  ;;  %v914_v19 = vld [vmem:[%s4864_s20 + $0x1620] sm:$0xff]  ;;  %v6779_v24 = vpop.xlane.xlu0 %2240  ;;  %v6786_v59 = vpop.xlane.xlu1 %2248 }
 0x1b2   : > { %3949 = vst [vmem:[%s5892_s27 + $0x280] sm:$0xff] %v3706_v39  ;;  %3950 = vst.msk [vmem:[%s5892_s27 + $0x288] sm:$0xff] %vm3869_vm1, %v3707_v43  ;;  %v2620_v50 = vadd.f32 %v2619_v45, %v1662_v60  ;;  %v1666_v61 = vmul.f32 %v4853_v11, %v909_v51  ;;  %v1667_v31 = vmul.f32 %v4855_v12, %v910_v56  ;;  %4501 = vpow2.f32 %v4236_v47  ;;  %v917_v33 = vld [vmem:[%s4864_s20 + $0x1638] sm:$0xff]  ;;  %v919_v30 = vld [vmem:[%s4864_s20 + $0x1648] sm:$0xff] }
 0x1b3   : > { %v4494_v1 = vpop.eup %4493  ;;  %v2615_v16 = vadd.f32 %v2614_v25, %v2613_v54  ;;  %v1668_v15 = vmul.f32 %v4857_v13, %v911_v44  ;;  %v1670_v6 = vmul.f32 %v4859_v14, %v913_v53  ;;  %4503 = vpow2.f32 %v4237_v3  ;;  %v3466_v25 = vld [vmem:[%s5869_s24 + $0x290] sm:$0xff]  ;;  %v3467_v51 = vld [vmem:[%s5869_s24 + $0x298] sm:$0xff]  ;;  %v918_v43 = vld [vmem:[%s4864_s20 + $0x1640] sm:$0xff] }
 0x1b4   : > { %v4496_v32 = vpop.eup %4495  ;;  %v3064_v60 = vadd.f32 1.0, %v4494_v1  ;;  %v2621_v5 = vadd.f32 %v2620_v50, %v1663_v48  ;;  %v2626_v27 = vadd.f32 %v1666_v61, %v1665_v63  ;;  %v1669_v40 = vmul.f32 %v4869_v18, %v912_v57  ;;  %v920_v45 = vld [vmem:[%s4864_s20 + $0x1650] sm:$0xff]  ;;  %v3468_v44 = vld [vmem:[%s5869_s24 + $0x2a0] sm:$0xff]  ;;  %v3469_v53 = vld [vmem:[%s5869_s24 + $0x2a8] sm:$0xff] }
 0x1b5   : > { %v3065_v36 = vadd.f32 1.0, %v4496_v32  ;;  %2616 = vadd.xlane.f32.xlu1 %v2615_v16  ;;  %v1671_v52 = vmul.f32 %v4851_v10, %v914_v19  ;;  %v1672_v23 = vmul.f32 %v4853_v11, %v915_v62  ;;  %v1673_v48 = vmul.f32 %v4855_v12, %v916_v21  ;;  %v922_v19 = vld [vmem:[%s4864_s20 + $0x1660] sm:$0xff]  ;;  %v6805_v62 = vpop.xlane.xlu0 %2256  ;;  %v923_v21 = vld [vmem:[%s4864_s20 + $0x1668] sm:$0xff] }
 0x1b6   : > { %4505 = vrcp.f32 %v3064_v60  ;;  %v2623_v56 = vadd.f32 %v2622_v55, %v2621_v5  ;;  %v2627_v39 = vadd.f32 %v2626_v27, %v1667_v31  ;;  %v2630_v54 = vsel %vm1693_vm0, %v1670_v6, 0.0  ;;  %v921_v31 = vld [vmem:[%s4864_s20 + $0x1658] sm:$0xff] }
 0x1b7   : > { %4507 = vrcp.f32 %v3065_v36  ;;  %v1674_v47 = vmul.f32 %v4857_v13, %v917_v33  ;;  %v1676_v3 = vmul.f32 %v4859_v14, %v919_v30  ;;  %v4498_v63 = vpop.eup %4497  ;;  %v2634_v55 = vadd.f32 %v1672_v23, %v1671_v52  ;;  %v925_v27 = vld [vmem:[%s4864_s20 + $0x1678] sm:$0xff]  ;;  %v926_v33 = vld [vmem:[%s4864_s20 + $0x1680] sm:$0xff]  ;;  %v927_v30 = vld [vmem:[%s4864_s20 + $0x1688] sm:$0xff]  ;;  %v6813_v36 = vpop.xlane.xlu1 %2264 }
 0x1b8   : > { %2624 = vadd.xlane.f32.xlu0 %v2623_v56  ;;  %v2628_v50 = vadd.f32 %v2627_v39, %v1668_v15  ;;  %v4238_v57 = vmul.f32 -1.442695, %v6461_v22  ;;  %v4239_v61 = vmul.f32 -1.442695, %v6484_v2  ;;  %v4500_v1 = vpop.eup %4499  ;;  %v3708_v16 = vmul.f32 %v4498_v63, %v3466_v25  ;;  %v924_v52 = vld [vmem:[%s4864_s20 + $0x1670] sm:$0xff] }
 0x1b9   : > { %v3709_v6 = vmul.f32 %v4498_v63, %v3467_v51  ;;  %v1675_v15 = vmul.f32 %v4869_v18, %v918_v43  ;;  %v1677_v32 = vmul.f32 %v4851_v10, %v920_v45  ;;  %v3710_v22 = vmul.f32 %v4500_v1, %v3468_v44 }
 0x1ba   : > { %v3711_v2 = vmul.f32 %v4500_v1, %v3469_v53  ;;  %v2629_v60 = vadd.f32 %v2628_v50, %v1669_v40  ;;  %v2635_v5 = vadd.f32 %v2634_v55, %v1673_v48  ;;  %3951 = vst [vmem:[%s5892_s27 + $0x290] sm:$0xff] %v3708_v16  ;;  %v2638_v25 = vsel %vm1693_vm0, %v1676_v3, 0.0  ;;  %v928_v40 = vld [vmem:[%s4864_s20 + $0x1690] sm:$0xff]  ;;  %v929_v48 = vld [vmem:[%s4864_s20 + $0x1698] sm:$0xff]  ;;  %v931_v3 = vld [vmem:[%s4864_s20 + $0x16a8] sm:$0xff]  ;;  %v6836_v1 = vpop.xlane.xlu0 %2272 }
 0x1bb   : > { %3952 = vst.msk [vmem:[%s5892_s27 + $0x298] sm:$0xff] %vm3869_vm1, %v3709_v6  ;;  %4509 = vpow2.f32 %v4238_v57  ;;  %v1678_v23 = vmul.f32 %v4853_v11, %v921_v31  ;;  %v1679_v51 = vmul.f32 %v4855_v12, %v922_v19  ;;  %3953 = vst [vmem:[%s5892_s27 + $0x2a0] sm:$0xff] %v3710_v22  ;;  %v1680_v43 = vmul.f32 %v4857_v13, %v923_v21  ;;  %v3470_v57 = vld [vmem:[%s5869_s24 + $0x2b0] sm:$0xff]  ;;  %v3472_v16 = vld [vmem:[%s5869_s24 + $0x2c0] sm:$0xff] }
 0x1bc   : > { %3954 = vst.msk [vmem:[%s5892_s27 + $0x2a8] sm:$0xff] %vm3869_vm1, %v3711_v2  ;;  %v2631_v56 = vadd.f32 %v2630_v54, %v2629_v60  ;;  %v2636_v39 = vadd.f32 %v2635_v5, %v1674_v47  ;;  %4511 = vpow2.f32 %v4239_v61  ;;  %v4502_v45 = vpop.eup %4501  ;;  %v1682_v44 = vmul.f32 %v4859_v14, %v925_v27  ;;  %v3471_v54 = vld [vmem:[%s5869_s24 + $0x2b8] sm:$0xff]  ;;  %v3473_v6 = vld [vmem:[%s5869_s24 + $0x2c8] sm:$0xff]  ;;  %v930_v22 = vld [vmem:[%s4864_s20 + $0x16a0] sm:$0xff] }
 0x1bd   : > { %v2642_v53 = vadd.f32 %v1678_v23, %v1677_v32  ;;  %v1683_v63 = vmul.f32 %v4851_v10, %v926_v33  ;;  %v1684_v50 = vmul.f32 %v4853_v11, %v927_v30  ;;  %v4504_v55 = vpop.eup %4503  ;;  %v3066_v47 = vadd.f32 1.0, %v4502_v45 }
 0x1be   : > { %2632 = vadd.xlane.f32.xlu1 %v2631_v56  ;;  %v2637_v61 = vadd.f32 %v2636_v39, %v1675_v15  ;;  %v1681_v31 = vmul.f32 %v4869_v18, %v924_v52  ;;  %v1685_v19 = vmul.f32 %v4855_v12, %v928_v40  ;;  %v3067_v21 = vadd.f32 1.0, %v4504_v55  ;;  %v6844_v12 = vpop.xlane.xlu1 %2280  ;;  %v3474_v55 = vld [vmem:[%s5869_s24 + $0x2d0] sm:$0xff] }
 0x1bf   : > { %v2643_v32 = vadd.f32 %v2642_v53, %v1679_v51  ;;  %v2646_v10 = vsel %vm1693_vm0, %v1682_v44, 0.0  ;;  %v1686_v11 = vmul.f32 %v4857_v13, %v929_v48  ;;  %4513 = vrcp.f32 %v3066_v47  ;;  %v6856_v48 = vpop.xlane.xlu0 %2288 }
 0x1c0   : > { %v4506_v2 = vpop.eup %4505  ;;  %v2639_v15 = vadd.f32 %v2638_v25, %v2637_v61  ;;  %v1688_v60 = vmul.f32 %v4859_v14, %v931_v3  ;;  %v2650_v5 = vadd.f32 %v1684_v50, %v1683_v63  ;;  %4515 = vrcp.f32 %v3067_v21  ;;  %v3476_v61 = vld [vmem:[%s5869_s24 + $0x2e0] sm:$0xff] }
 0x1c1   : > { %v4508_v27 = vpop.eup %4507  ;;  %v3712_v33 = vmul.f32 %v4506_v2, %v3470_v57  ;;  %v3713_v30 = vmul.f32 %v4506_v2, %v3471_v54  ;;  %v2644_v52 = vadd.f32 %v2643_v32, %v1680_v43  ;;  %v1687_v13 = vmul.f32 %v4869_v18, %v930_v22  ;;  %v3475_v57 = vld [vmem:[%s5869_s24 + $0x2d8] sm:$0xff] }
 0x1c2   : > { %v3714_v23 = vmul.f32 %v4508_v27, %v3472_v16  ;;  %v3715_v51 = vmul.f32 %v4508_v27, %v3473_v6  ;;  %2640 = vadd.xlane.f32.xlu0 %v2639_v15  ;;  %v2651_v40 = vadd.f32 %v2650_v5, %v1685_v19  ;;  %v4240_v25 = vmul.f32 -1.442695, %v6493_v34  ;;  %v6860_v3 = vpop.xlane.xlu1 %2296  ;;  %v3478_v15 = vld [vmem:[%s5869_s24 + $0x2f0] sm:$0xff] }
 0x1c3   : > { %3955 = vst [vmem:[%s5892_s27 + $0x2b0] sm:$0xff] %v3712_v33  ;;  %3956 = vst.msk [vmem:[%s5892_s27 + $0x2b8] sm:$0xff] %vm3869_vm1, %v3713_v30  ;;  %v2645_v14 = vadd.f32 %v2644_v52, %v1681_v31  ;;  %v4241_v56 = vmul.f32 -1.442695, %v6515_v8  ;;  %v4242_v39 = vmul.f32 -1.442695, %v6522_v17 }
 0x1c4   : > { %3957 = vst [vmem:[%s5892_s27 + $0x2c0] sm:$0xff] %v3714_v23  ;;  %3958 = vst.msk [vmem:[%s5892_s27 + $0x2c8] sm:$0xff] %vm3869_vm1, %v3715_v51  ;;  %v2652_v43 = vadd.f32 %v2651_v40, %v1686_v11  ;;  %v2654_v44 = vsel %vm1693_vm0, %v1688_v60, 0.0  ;;  %4517 = vpow2.f32 %v4240_v25  ;;  %v4243_v17 = vmul.f32 -1.442695, %v6541_v46  ;;  %v3477_v31 = vld [vmem:[%s5869_s24 + $0x2e8] sm:$0xff] }
 0x1c5   : > { %v4510_v18 = vpop.eup %4509  ;;  %v2647_v45 = vadd.f32 %v2646_v10, %v2645_v14  ;;  %4519 = vpow2.f32 %v4241_v56  ;;  %v4244_v50 = vmul.f32 -1.442695, %v6549_v0  ;;  %v4245_v47 = vmul.f32 -1.442695, %v6572_v41  ;;  %v6870_v0 = vpop.xlane.xlu0 %2304  ;;  %v3479_v60 = vld [vmem:[%s5869_s24 + $0x2f8] sm:$0xff]  ;;  %v3480_v33 = vld [vmem:[%s5869_s24 + $0x300] sm:$0xff] }
 0x1c6   : > { %v4512_v53 = vpop.eup %4511  ;;  %v3068_v34 = vadd.f32 1.0, %v4510_v18  ;;  %v2653_v8 = vadd.f32 %v2652_v43, %v1687_v13  ;;  %4521 = vpow2.f32 %v4242_v39  ;;  %v4246_v19 = vmul.f32 -1.442695, %v6581_v29  ;;  %v6874_v11 = vpop.xlane.xlu1 %2312  ;;  %v3481_v30 = vld [vmem:[%s5869_s24 + $0x308] sm:$0xff] }
 0x1c7   : > { %v3069_v63 = vadd.f32 1.0, %v4512_v53  ;;  %2648 = vadd.xlane.f32.xlu1 %v2647_v45  ;;  %v4247_v16 = vmul.f32 -1.442695, %v6603_v58  ;;  %v4248_v41 = vmul.f32 -1.442695, %v6610_v49 }
 0x1c8   : > { %4523 = vrcp.f32 %v3068_v34  ;;  %v2655_v54 = vadd.f32 %v2654_v44, %v2653_v8  ;;  %v4249_v22 = vmul.f32 -1.442695, %v6629_v26  ;;  %v4250_v58 = vmul.f32 -1.442695, %v6637_v37 }
 0x1c9   : > { %4525 = vrcp.f32 %v3069_v63  ;;  %v4514_v46 = vpop.eup %4513  ;;  %v6885_v5 = vpop.xlane.xlu0 %2320  ;;  %v4251_v37 = vmul.f32 -1.442695, %v6660_v28  ;;  %v4252_v13 = vmul.f32 -1.442695, %v6669_v38 }
 0x1ca   : > { %2656 = vadd.xlane.f32.xlu0 %v2655_v54  ;;  %4527 = vpow2.f32 %v4243_v17  ;;  %v4516_v6 = vpop.eup %4515  ;;  %v3716_v21 = vmul.f32 %v4514_v46, %v3474_v55  ;;  %v3717_v32 = vmul.f32 %v4514_v46, %v3475_v57  ;;  %v6891_v40 = vpop.xlane.xlu1 %2328  ;;  %v3484_v46 = vld [vmem:[%s5869_s24 + $0x320] sm:$0xff] }
 0x1cb   : > { %4529 = vpow2.f32 %v4244_v50  ;;  %v3718_v10 = vmul.f32 %v4516_v6, %v3476_v61  ;;  %v3719_v29 = vmul.f32 %v4516_v6, %v3477_v31  ;;  %v3483_v61 = vld [vmem:[%s5869_s24 + $0x318] sm:$0xff] }
 0x1cc   : > { %4531 = vpow2.f32 %v4245_v47  ;;  %3959 = vst [vmem:[%s5892_s27 + $0x2d0] sm:$0xff] %v3716_v21  ;;  %3960 = vst.msk [vmem:[%s5892_s27 + $0x2d8] sm:$0xff] %vm3869_vm1, %v3717_v32  ;;  %v3482_v47 = vld [vmem:[%s5869_s24 + $0x310] sm:$0xff]  ;;  %v4253_v21 = vmul.f32 -1.442695, %v6691_v42 }
 0x1cd   : > { %4533 = vpow2.f32 %v4246_v19  ;;  %3961 = vst [vmem:[%s5892_s27 + $0x2e0] sm:$0xff] %v3718_v10  ;;  %3962 = vst.msk [vmem:[%s5892_s27 + $0x2e8] sm:$0xff] %vm3869_vm1, %v3719_v29  ;;  %v6899_v53 = vpop.xlane.xlu0 %2336  ;;  %v3487_v10 = vld [vmem:[%s5869_s24 + $0x338] sm:$0xff]  ;;  %v4255_v42 = vmul.f32 -1.442695, %v6717_v9  ;;  %v3488_v9 = vld [vmem:[%s5869_s24 + $0x340] sm:$0xff] }
 0x1ce   : > { %4535 = vpow2.f32 %v4247_v16  ;;  %v4518_v49 = vpop.eup %4517  ;;  %v6901_v50 = vpop.xlane.xlu1 %2344  ;;  %v3485_v16 = vld [vmem:[%s5869_s24 + $0x328] sm:$0xff] }
 0x1cf   : > { %4537 = vpow2.f32 %v4248_v41  ;;  %v4520_v2 = vpop.eup %4519  ;;  %v3070_v26 = vadd.f32 1.0, %v4518_v49  ;;  %v3486_v41 = vld [vmem:[%s5869_s24 + $0x330] sm:$0xff] }
 0x1d0   : > { %4539 = vpow2.f32 %v4249_v22  ;;  %v4522_v27 = vpop.eup %4521  ;;  %v3071_v52 = vadd.f32 1.0, %v4520_v2  ;;  %v4254_v22 = vmul.f32 -1.442695, %v6698_v20 }
 0x1d1   : > { %4541 = vpow2.f32 %v4250_v58  ;;  %v3072_v51 = vadd.f32 1.0, %v4522_v27  ;;  %v6911_v58 = vpop.xlane.xlu0 %2352 }
 0x1d2   : > { %v4524_v23 = vpop.eup %4523  ;;  %4543 = vrcp.f32 %v3070_v26 }
 0x1d3   : > { %v4526_v14 = vpop.eup %4525  ;;  %v3720_v25 = vmul.f32 %v4524_v23, %v3478_v15  ;;  %v3721_v56 = vmul.f32 %v4524_v23, %v3479_v60  ;;  %4545 = vrcp.f32 %v3071_v52 }
 0x1d4   : > { %v4528_v39 = vpop.eup %4527  ;;  %v3722_v43 = vmul.f32 %v4526_v14, %v3480_v33  ;;  %v3723_v18 = vmul.f32 %v4526_v14, %v3481_v30  ;;  %4547 = vrcp.f32 %v3072_v51  ;;  %v6914_v33 = vpop.xlane.xlu1 %2360  ;;  %v3490_v51 = vld [vmem:[%s5869_s24 + $0x350] sm:$0xff] }
 0x1d5   : > { %v4530_v45 = vpop.eup %4529  ;;  %3963 = vst [vmem:[%s5892_s27 + $0x2f0] sm:$0xff] %v3720_v25  ;;  %3964 = vst.msk [vmem:[%s5892_s27 + $0x2f8] sm:$0xff] %vm3869_vm1, %v3721_v56  ;;  %v3073_v28 = vadd.f32 1.0, %v4528_v39  ;;  %4549 = vpow2.f32 %v4251_v37  ;;  %v3489_v37 = vld [vmem:[%s5869_s24 + $0x348] sm:$0xff]  ;;  %v4256_v25 = vmul.f32 -1.442695, %v6725_v7 }
 0x1d6   : > { %v4532_v44 = vpop.eup %4531  ;;  %3965 = vst [vmem:[%s5892_s27 + $0x300] sm:$0xff] %v3722_v43  ;;  %3966 = vst.msk [vmem:[%s5892_s27 + $0x308] sm:$0xff] %vm3869_vm1, %v3723_v18  ;;  %v3074_v38 = vadd.f32 1.0, %v4530_v45  ;;  %4551 = vpow2.f32 %v4252_v13  ;;  %v3491_v13 = vld [vmem:[%s5869_s24 + $0x358] sm:$0xff]  ;;  %v3492_v39 = vld [vmem:[%s5869_s24 + $0x360] sm:$0xff] }
 0x1d7   : > { %v4534_v34 = vpop.eup %4533  ;;  %4553 = vrcp.f32 %v3073_v28  ;;  %v3075_v8 = vadd.f32 1.0, %v4532_v44  ;;  %v3493_v43 = vld [vmem:[%s5869_s24 + $0x368] sm:$0xff]  ;;  %v4257_v45 = vmul.f32 -1.442695, %v6748_v4  ;;  %v4258_v7 = vmul.f32 -1.442695, %v6757_v35 }
 0x1d8   : > { %v4536_v17 = vpop.eup %4535  ;;  %4555 = vrcp.f32 %v3074_v38  ;;  %v3076_v63 = vadd.f32 1.0, %v4534_v34  ;;  %v3494_v34 = vld [vmem:[%s5869_s24 + $0x370] sm:$0xff]  ;;  %v3497_v4 = vld [vmem:[%s5869_s24 + $0x388] sm:$0xff] }
 0x1d9   : > { %v4538_v55 = vpop.eup %4537  ;;  %4557 = vrcp.f32 %v3075_v8  ;;  %v3077_v57 = vadd.f32 1.0, %v4536_v17  ;;  %v3495_v8 = vld [vmem:[%s5869_s24 + $0x378] sm:$0xff]  ;;  %v6936_v17 = vpop.xlane.xlu0 %2368 }
 0x1da   : > { %v4540_v54 = vpop.eup %4539  ;;  %4559 = vrcp.f32 %v3076_v63  ;;  %v3078_v31 = vadd.f32 1.0, %v4538_v55 }
 0x1db   : > { %v4542_v19 = vpop.eup %4541  ;;  %4561 = vrcp.f32 %v3077_v57  ;;  %v3079_v6 = vadd.f32 1.0, %v4540_v54  ;;  %v3496_v54 = vld [vmem:[%s5869_s24 + $0x380] sm:$0xff] }
 0x1dc   : > { %v4544_v32 = vpop.eup %4543  ;;  %4563 = vrcp.f32 %v3078_v31  ;;  %v3080_v29 = vadd.f32 1.0, %v4542_v19  ;;  %v3498_v19 = vld [vmem:[%s5869_s24 + $0x390] sm:$0xff] }
 0x1dd   : > { %v4546_v49 = vpop.eup %4545  ;;  %v3724_v2 = vmul.f32 %v4544_v32, %v3482_v47  ;;  %v3725_v15 = vmul.f32 %v4544_v32, %v3483_v61  ;;  %4565 = vrcp.f32 %v3079_v6  ;;  %v4259_v47 = vmul.f32 -1.442695, %v6779_v24  ;;  %v6947_v6 = vpop.xlane.xlu1 %2376 }
 0x1de   : > { %v4548_v60 = vpop.eup %4547  ;;  %v3726_v26 = vmul.f32 %v4546_v49, %v3484_v46  ;;  %v3727_v27 = vmul.f32 %v4546_v49, %v3485_v16  ;;  %4567 = vrcp.f32 %v3080_v29  ;;  %v3499_v46 = vld [vmem:[%s5869_s24 + $0x398] sm:$0xff]  ;;  %v4260_v16 = vmul.f32 -1.442695, %v6786_v59 }
 0x1df   : > { %v4550_v20 = vpop.eup %4549  ;;  %3967 = vst [vmem:[%s5892_s27 + $0x310] sm:$0xff] %v3724_v2  ;;  %3968 = vst.msk [vmem:[%s5892_s27 + $0x318] sm:$0xff] %vm3869_vm1, %v3725_v15  ;;  %v3728_v30 = vmul.f32 %v4548_v60, %v3486_v41  ;;  %v3729_v52 = vmul.f32 %v4548_v60, %v3487_v10  ;;  %4569 = vpow2.f32 %v4253_v21  ;;  %v3500_v41 = vld [vmem:[%s5869_s24 + $0x3a0] sm:$0xff]  ;;  %v3501_v10 = vld [vmem:[%s5869_s24 + $0x3a8] sm:$0xff]  ;;  %v4261_v29 = vmul.f32 -1.442695, %v6805_v62 }
 0x1e0   : > { %v4552_v23 = vpop.eup %4551  ;;  %3969 = vst [vmem:[%s5892_s27 + $0x320] sm:$0xff] %v3726_v26  ;;  %3970 = vst.msk [vmem:[%s5892_s27 + $0x328] sm:$0xff] %vm3869_vm1, %v3727_v27  ;;  %v3081_v14 = vadd.f32 1.0, %v4550_v20  ;;  %4571 = vpow2.f32 %v4254_v22  ;;  %v3502_v2 = vld [vmem:[%s5869_s24 + $0x3b0] sm:$0xff]  ;;  %v3503_v15 = vld [vmem:[%s5869_s24 + $0x3b8] sm:$0xff] }
 0x1e1   : > { %v4554_v56 = vpop.eup %4553  ;;  %3971 = vst [vmem:[%s5892_s27 + $0x330] sm:$0xff] %v3728_v30  ;;  %3972 = vst.msk [vmem:[%s5892_s27 + $0x338] sm:$0xff] %vm3869_vm1, %v3729_v52  ;;  %v3082_v18 = vadd.f32 1.0, %v4552_v23  ;;  %4573 = vpow2.f32 %v4255_v42  ;;  %v4262_v42 = vmul.f32 -1.442695, %v6813_v36  ;;  %v6968_v52 = vpop.xlane.xlu0 %2384 }
 0x1e2   : > { %v4556_v28 = vpop.eup %4555  ;;  %v3730_v44 = vmul.f32 %v4554_v56, %v3488_v9  ;;  %v3731_v38 = vmul.f32 %v4554_v56, %v3489_v37  ;;  %4575 = vrcp.f32 %v3081_v14  ;;  %v4263_v27 = vmul.f32 -1.442695, %v6836_v1 }
 0x1e3   : > { %v4558_v63 = vpop.eup %4557  ;;  %v3732_v55 = vmul.f32 %v4556_v28, %v3490_v51  ;;  %v3733_v57 = vmul.f32 %v4556_v28, %v3491_v13  ;;  %4577 = vrcp.f32 %v3082_v18  ;;  %v3504_v51 = vld [vmem:[%s5869_s24 + $0x3c0] sm:$0xff]  ;;  %v3505_v13 = vld [vmem:[%s5869_s24 + $0x3c8] sm:$0xff] }
 0x1e4   : > { %v4560_v61 = vpop.eup %4559  ;;  %3973 = vst [vmem:[%s5892_s27 + $0x340] sm:$0xff] %v3730_v44  ;;  %3974 = vst.msk [vmem:[%s5892_s27 + $0x348] sm:$0xff] %vm3869_vm1, %v3731_v38  ;;  %v3734_v31 = vmul.f32 %v4558_v63, %v3492_v39  ;;  %v3735_v35 = vmul.f32 %v4558_v63, %v3493_v43  ;;  %4579 = vpow2.f32 %v4256_v25  ;;  %v6978_v25 = vpop.xlane.xlu1 %2392  ;;  %v3506_v39 = vld [vmem:[%s5869_s24 + $0x3d0] sm:$0xff]  ;;  %v3507_v43 = vld [vmem:[%s5869_s24 + $0x3d8] sm:$0xff]  ;;  %v4265_v38 = vmul.f32 -1.442695, %v6856_v48 }
 0x1e5   : > { %v4562_v24 = vpop.eup %4561  ;;  %3975 = vst [vmem:[%s5892_s27 + $0x350] sm:$0xff] %v3732_v55  ;;  %3976 = vst.msk [vmem:[%s5892_s27 + $0x358] sm:$0xff] %vm3869_vm1, %v3733_v57  ;;  %v3736_v21 = vmul.f32 %v4560_v61, %v3494_v34  ;;  %v3737_v32 = vmul.f32 %v4560_v61, %v3495_v8  ;;  %4581 = vpow2.f32 %v4257_v45  ;;  %v4264_v45 = vmul.f32 -1.442695, %v6844_v12 }
 0x1e6   : > { %v4564_v22 = vpop.eup %4563  ;;  %3977 = vst [vmem:[%s5892_s27 + $0x360] sm:$0xff] %v3734_v31  ;;  %3978 = vst.msk [vmem:[%s5892_s27 + $0x368] sm:$0xff] %vm3869_vm1, %v3735_v35  ;;  %v3738_v59 = vmul.f32 %v4562_v24, %v3496_v54  ;;  %v3739_v49 = vmul.f32 %v4562_v24, %v3497_v4  ;;  %4583 = vpow2.f32 %v4258_v7  ;;  %v6987_v54 = vpop.xlane.xlu0 %2400 }
 0x1e7   : > { %v4566_v60 = vpop.eup %4565  ;;  %3979 = vst [vmem:[%s5892_s27 + $0x370] sm:$0xff] %v3736_v21  ;;  %3980 = vst.msk [vmem:[%s5892_s27 + $0x378] sm:$0xff] %vm3869_vm1, %v3737_v32  ;;  %v3740_v62 = vmul.f32 %v4564_v22, %v3498_v19  ;;  %v3741_v26 = vmul.f32 %v4564_v22, %v3499_v46  ;;  %4585 = vpow2.f32 %v4259_v47  ;;  %v3508_v32 = vld [vmem:[%s5869_s24 + $0x3e0] sm:$0xff] }
 0x1e8   : > { %v4568_v20 = vpop.eup %4567  ;;  %3981 = vst [vmem:[%s5892_s27 + $0x380] sm:$0xff] %v3738_v59  ;;  %3982 = vst.msk [vmem:[%s5892_s27 + $0x388] sm:$0xff] %vm3869_vm1, %v3739_v49  ;;  %v3742_v36 = vmul.f32 %v4566_v60, %v3500_v41  ;;  %v3743_v30 = vmul.f32 %v4566_v60, %v3501_v10  ;;  %4587 = vpow2.f32 %v4260_v16  ;;  %v6995_v61 = vpop.xlane.xlu1 %2408  ;;  %v3509_v41 = vld [vmem:[%s5869_s24 + $0x3e8] sm:$0xff]  ;;  %v3510_v59 = vld [vmem:[%s5869_s24 + $0x3f0] sm:$0xff] }
 0x1e9   : > { %v4570_v9 = vpop.eup %4569  ;;  %3983 = vst [vmem:[%s5892_s27 + $0x390] sm:$0xff] %v3740_v62  ;;  %3984 = vst.msk [vmem:[%s5892_s27 + $0x398] sm:$0xff] %vm3869_vm1, %v3741_v26  ;;  %v3744_v1 = vmul.f32 %v4568_v20, %v3502_v2  ;;  %v3745_v37 = vmul.f32 %v4568_v20, %v3503_v15  ;;  %4589 = vpow2.f32 %v4261_v29  ;;  %v3511_v49 = vld [vmem:[%s5869_s24 + $0x3f8] sm:$0xff]  ;;  %v4266_v15 = vmul.f32 -1.442695, %v6860_v3  ;;  %v3512_v60 = vld [vmem:[%s5869_s24 + $0x400] sm:$0xff] }
 0x1ea   : > { %v4572_v23 = vpop.eup %4571  ;;  %3985 = vst [vmem:[%s5892_s27 + $0x3a0] sm:$0xff] %v3742_v36  ;;  %3986 = vst.msk [vmem:[%s5892_s27 + $0x3a8] sm:$0xff] %vm3869_vm1, %v3743_v30  ;;  %v3083_v14 = vadd.f32 1.0, %v4570_v9  ;;  %4591 = vpow2.f32 %v4262_v42  ;;  %v6999_v29 = vpop.xlane.xlu0 %2416  ;;  %v3513_v62 = vld [vmem:[%s5869_s24 + $0x408] sm:$0xff]  ;;  %v4268_v3 = vmul.f32 -1.442695, %v6874_v11 }
 0x1eb   : > { %v4574_v56 = vpop.eup %4573  ;;  %3987 = vst [vmem:[%s5892_s27 + $0x3b0] sm:$0xff] %v3744_v1  ;;  %3988 = vst.msk [vmem:[%s5892_s27 + $0x3b8] sm:$0xff] %vm3869_vm1, %v3745_v37  ;;  %v3084_v18 = vadd.f32 1.0, %v4572_v23  ;;  %4593 = vpow2.f32 %v4263_v27  ;;  %v4267_v27 = vmul.f32 -1.442695, %v6870_v0 }
 0x1ec   : > { %v4576_v28 = vpop.eup %4575  ;;  %4595 = vrcp.f32 %v3083_v14  ;;  %v3085_v44 = vadd.f32 1.0, %v4574_v56  ;;  %v7007_v20 = vpop.xlane.xlu1 %2424  ;;  %v3514_v14 = vld [vmem:[%s5869_s24 + $0x410] sm:$0xff]  ;;  %v3515_v56 = vld [vmem:[%s5869_s24 + $0x418] sm:$0xff] }
 0x1ed   : > { %v4578_v34 = vpop.eup %4577  ;;  %v3746_v8 = vmul.f32 %v4576_v28, %v3504_v51  ;;  %v3747_v7 = vmul.f32 %v4576_v28, %v3505_v13  ;;  %4597 = vrcp.f32 %v3084_v18 }
 0x1ee   : > { %v4580_v63 = vpop.eup %4579  ;;  %v3748_v55 = vmul.f32 %v4578_v34, %v3506_v39  ;;  %v3749_v57 = vmul.f32 %v4578_v34, %v3507_v43  ;;  %4599 = vrcp.f32 %v3085_v44  ;;  %v3516_v39 = vld [vmem:[%s5869_s24 + $0x420] sm:$0xff]  ;;  %v3517_v43 = vld [vmem:[%s5869_s24 + $0x428] sm:$0xff]  ;;  %v7021_v28 = vpop.xlane.xlu0 %2432  ;;  %v3519_v34 = vld [vmem:[%s5869_s24 + $0x438] sm:$0xff] }
 0x1ef   : > { %v4582_v4 = vpop.eup %4581  ;;  %3989 = vst [vmem:[%s5892_s27 + $0x3c0] sm:$0xff] %v3746_v8  ;;  %3990 = vst.msk [vmem:[%s5892_s27 + $0x3c8] sm:$0xff] %vm3869_vm1, %v3747_v7  ;;  %v3086_v12 = vadd.f32 1.0, %v4580_v63  ;;  %4601 = vpow2.f32 %v4264_v45  ;;  %v4269_v45 = vmul.f32 -1.442695, %v6885_v5  ;;  %v3520_v5 = vld [vmem:[%s5869_s24 + $0x440] sm:$0xff] }
 0x1f0   : > { %v4584_v47 = vpop.eup %4583  ;;  %3991 = vst [vmem:[%s5892_s27 + $0x3d0] sm:$0xff] %v3748_v55  ;;  %3992 = vst.msk [vmem:[%s5892_s27 + $0x3d8] sm:$0xff] %vm3869_vm1, %v3749_v57  ;;  %v3087_v48 = vadd.f32 1.0, %v4582_v4  ;;  %4603 = vpow2.f32 %v4265_v38  ;;  %v3518_v38 = vld [vmem:[%s5869_s24 + $0x430] sm:$0xff]  ;;  %v4270_v7 = vmul.f32 -1.442695, %v6891_v40 }
 0x1f1   : > { %v4586_v31 = vpop.eup %4585  ;;  %4605 = vrcp.f32 %v3086_v12  ;;  %v3088_v35 = vadd.f32 1.0, %v4584_v47  ;;  %v3521_v4 = vld [vmem:[%s5869_s24 + $0x448] sm:$0xff]  ;;  %v4271_v12 = vmul.f32 -1.442695, %v6899_v53  ;;  %v7032_v47 = vpop.xlane.xlu1 %2440  ;;  %v3522_v40 = vld [vmem:[%s5869_s24 + $0x450] sm:$0xff] }
 0x1f2   : > { %v4588_v19 = vpop.eup %4587  ;;  %4607 = vrcp.f32 %v3087_v48  ;;  %v3089_v46 = vadd.f32 1.0, %v4586_v31 }
 0x1f3   : > { %v4590_v16 = vpop.eup %4589  ;;  %4609 = vrcp.f32 %v3088_v35  ;;  %v3090_v24 = vadd.f32 1.0, %v4588_v19  ;;  %v3523_v19 = vld [vmem:[%s5869_s24 + $0x458] sm:$0xff] }
 0x1f4   : > { %v4592_v21 = vpop.eup %4591  ;;  %4611 = vrcp.f32 %v3089_v46  ;;  %v3091_v10 = vadd.f32 1.0, %v4590_v16  ;;  %v4272_v46 = vmul.f32 -1.442695, %v6901_v50 }
 0x1f5   : > { %v4594_v22 = vpop.eup %4593  ;;  %4613 = vrcp.f32 %v3090_v24  ;;  %v3092_v2 = vadd.f32 1.0, %v4592_v21  ;;  %v3524_v21 = vld [vmem:[%s5869_s24 + $0x460] sm:$0xff] }
 0x1f6   : > { %v4596_v42 = vpop.eup %4595  ;;  %4615 = vrcp.f32 %v3091_v10  ;;  %v3093_v26 = vadd.f32 1.0, %v4594_v22 }
 0x1f7   : > { %v4598_v36 = vpop.eup %4597  ;;  %v3750_v30 = vmul.f32 %v4596_v42, %v3508_v32  ;;  %v3751_v9 = vmul.f32 %v4596_v42, %v3509_v41  ;;  %4617 = vrcp.f32 %v3092_v2  ;;  %v3525_v32 = vld [vmem:[%s5869_s24 + $0x468] sm:$0xff]  ;;  %v4273_v41 = vmul.f32 -1.442695, %v6911_v58 }
 0x1f8   : > { %v4600_v1 = vpop.eup %4599  ;;  %v3752_v37 = vmul.f32 %v4598_v36, %v3510_v59  ;;  %v3753_v23 = vmul.f32 %v4598_v36, %v3511_v49  ;;  %4619 = vrcp.f32 %v3093_v26  ;;  %v3526_v59 = vld [vmem:[%s5869_s24 + $0x470] sm:$0xff]  ;;  %v3527_v49 = vld [vmem:[%s5869_s24 + $0x478] sm:$0xff]  ;;  %v4274_v2 = vmul.f32 -1.442695, %v6914_v33 }
 0x1f9   : > { %v4602_v51 = vpop.eup %4601  ;;  %3993 = vst [vmem:[%s5892_s27 + $0x3e0] sm:$0xff] %v3750_v30  ;;  %3994 = vst.msk [vmem:[%s5892_s27 + $0x3e8] sm:$0xff] %vm3869_vm1, %v3751_v9  ;;  %v3754_v0 = vmul.f32 %v4600_v1, %v3512_v60  ;;  %v3755_v13 = vmul.f32 %v4600_v1, %v3513_v62  ;;  %4621 = vpow2.f32 %v4266_v15  ;;  %v3528_v60 = vld [vmem:[%s5869_s24 + $0x480] sm:$0xff]  ;;  %v3529_v62 = vld [vmem:[%s5869_s24 + $0x488] sm:$0xff]  ;;  %v4275_v26 = vmul.f32 -1.442695, %v6936_v17 }
 0x1fa   : > { %v4604_v11 = vpop.eup %4603  ;;  %3995 = vst [vmem:[%s5892_s27 + $0x3f0] sm:$0xff] %v3752_v37  ;;  %3996 = vst.msk [vmem:[%s5892_s27 + $0x3f8] sm:$0xff] %vm3869_vm1, %v3753_v23  ;;  %v3094_v18 = vadd.f32 1.0, %v4602_v51  ;;  %4623 = vpow2.f32 %v4267_v27  ;;  %v7055_v27 = vpop.xlane.xlu0 %2448  ;;  %v4276_v9 = vmul.f32 -1.442695, %v6947_v6 }
 0x1fb   : > { %v4606_v44 = vpop.eup %4605  ;;  %3997 = vst [vmem:[%s5892_s27 + $0x400] sm:$0xff] %v3754_v0  ;;  %3998 = vst.msk [vmem:[%s5892_s27 + $0x408] sm:$0xff] %vm3869_vm1, %v3755_v13  ;;  %v3095_v8 = vadd.f32 1.0, %v4604_v11  ;;  %4625 = vpow2.f32 %v4268_v3  ;;  %v7064_v37 = vpop.xlane.xlu1 %2456  ;;  %v3530_v13 = vld [vmem:[%s5869_s24 + $0x490] sm:$0xff] }
 0x1fc   : > { %v4608_v63 = vpop.eup %4607  ;;  %v3756_v55 = vmul.f32 %v4606_v44, %v3514_v14  ;;  %v3757_v57 = vmul.f32 %v4606_v44, %v3515_v56  ;;  %4627 = vrcp.f32 %v3094_v18  ;;  %v3531_v14 = vld [vmem:[%s5869_s24 + $0x498] sm:$0xff] }
 0x1fd   : > { %v4610_v48 = vpop.eup %4609  ;;  %v3758_v31 = vmul.f32 %v4608_v63, %v3516_v39  ;;  %v3759_v35 = vmul.f32 %v4608_v63, %v3517_v43  ;;  %4629 = vrcp.f32 %v3095_v8  ;;  %v3532_v39 = vld [vmem:[%s5869_s24 + $0x4a0] sm:$0xff]  ;;  %v3533_v43 = vld [vmem:[%s5869_s24 + $0x4a8] sm:$0xff] }
 0x1fe   : > { %v4612_v16 = vpop.eup %4611  ;;  %3999 = vst [vmem:[%s5892_s27 + $0x410] sm:$0xff] %v3756_v55  ;;  %4000 = vst.msk [vmem:[%s5892_s27 + $0x418] sm:$0xff] %vm3869_vm1, %v3757_v57  ;;  %v3760_v24 = vmul.f32 %v4610_v48, %v3518_v38  ;;  %v3761_v53 = vmul.f32 %v4610_v48, %v3519_v34  ;;  %4631 = vpow2.f32 %v4269_v45  ;;  %v4277_v45 = vmul.f32 -1.442695, %v6968_v52  ;;  %v7081_v8 = vpop.xlane.xlu0 %2464 }
 0x1ff   : > { %v4614_v10 = vpop.eup %4613  ;;  %4001 = vst [vmem:[%s5892_s27 + $0x420] sm:$0xff] %v3758_v31  ;;  %4002 = vst.msk [vmem:[%s5892_s27 + $0x428] sm:$0xff] %vm3869_vm1, %v3759_v35  ;;  %v3762_v50 = vmul.f32 %v4612_v16, %v3520_v5  ;;  %v3763_v22 = vmul.f32 %v4612_v16, %v3521_v4  ;;  %4633 = vpow2.f32 %v4270_v7  ;;  %v4278_v34 = vmul.f32 -1.442695, %v6978_v25  ;;  %v7083_v52 = vpop.xlane.xlu1 %2472 }
 0x200   : > { %v4616_v15 = vpop.eup %4615  ;;  %4003 = vst [vmem:[%s5892_s27 + $0x430] sm:$0xff] %v3760_v24  ;;  %4004 = vst.msk [vmem:[%s5892_s27 + $0x438] sm:$0xff] %vm3869_vm1, %v3761_v53  ;;  %v3764_v58 = vmul.f32 %v4614_v10, %v3522_v40  ;;  %v3765_v42 = vmul.f32 %v4614_v10, %v3523_v19  ;;  %4635 = vpow2.f32 %v4271_v12 }
 0x201   : > { %v4618_v36 = vpop.eup %4617  ;;  %4005 = vst [vmem:[%s5892_s27 + $0x440] sm:$0xff] %v3762_v50  ;;  %4006 = vst.msk [vmem:[%s5892_s27 + $0x448] sm:$0xff] %vm3869_vm1, %v3763_v22  ;;  %v3766_v33 = vmul.f32 %v4616_v15, %v3524_v21  ;;  %v3767_v30 = vmul.f32 %v4616_v15, %v3525_v32  ;;  %4637 = vpow2.f32 %v4272_v46  ;;  %v3534_v32 = vld [vmem:[%s5869_s24 + $0x4b0] sm:$0xff]  ;;  %v4279_v15 = vmul.f32 -1.442695, %v6987_v54 }
 0x202   : > { %v4620_v3 = vpop.eup %4619  ;;  %4007 = vst [vmem:[%s5892_s27 + $0x450] sm:$0xff] %v3764_v58  ;;  %4008 = vst.msk [vmem:[%s5892_s27 + $0x458] sm:$0xff] %vm3869_vm1, %v3765_v42  ;;  %v3768_v17 = vmul.f32 %v4618_v36, %v3526_v59  ;;  %v3769_v1 = vmul.f32 %v4618_v36, %v3527_v49  ;;  %4639 = vpow2.f32 %v4273_v41  ;;  %v7091_v16 = vpop.xlane.xlu0 %2480  ;;  %v3535_v41 = vld [vmem:[%s5869_s24 + $0x4b8] sm:$0xff]  ;;  %v3536_v59 = vld [vmem:[%s5869_s24 + $0x4c0] sm:$0xff] }
 0x203   : > { %v4622_v23 = vpop.eup %4621  ;;  %4009 = vst [vmem:[%s5892_s27 + $0x460] sm:$0xff] %v3766_v33  ;;  %4010 = vst.msk [vmem:[%s5892_s27 + $0x468] sm:$0xff] %vm3869_vm1, %v3767_v30  ;;  %v3770_v6 = vmul.f32 %v4620_v3, %v3528_v60  ;;  %v3771_v51 = vmul.f32 %v4620_v3, %v3529_v62  ;;  %4641 = vpow2.f32 %v4274_v2  ;;  %v7095_v50 = vpop.xlane.xlu1 %2488  ;;  %v3537_v49 = vld [vmem:[%s5869_s24 + $0x4c8] sm:$0xff]  ;;  %v3538_v42 = vld [vmem:[%s5869_s24 + $0x4d0] sm:$0xff] }
 0x204   : > { %v4624_v0 = vpop.eup %4623  ;;  %4011 = vst [vmem:[%s5892_s27 + $0x470] sm:$0xff] %v3768_v17  ;;  %4012 = vst.msk [vmem:[%s5892_s27 + $0x478] sm:$0xff] %vm3869_vm1, %v3769_v1  ;;  %v3096_v56 = vadd.f32 1.0, %v4622_v23  ;;  %4643 = vpow2.f32 %v4275_v26  ;;  %v3539_v60 = vld [vmem:[%s5869_s24 + $0x4d8] sm:$0xff]  ;;  %v4280_v26 = vmul.f32 -1.442695, %v6995_v61 }
 0x205   : > { %v4626_v11 = vpop.eup %4625  ;;  %4013 = vst [vmem:[%s5892_s27 + $0x480] sm:$0xff] %v3770_v6  ;;  %4014 = vst.msk [vmem:[%s5892_s27 + $0x488] sm:$0xff] %vm3869_vm1, %v3771_v51  ;;  %v3097_v18 = vadd.f32 1.0, %v4624_v0  ;;  %4645 = vpow2.f32 %v4276_v9  ;;  %v4281_v9 = vmul.f32 -1.442695, %v6999_v29  ;;  %v3540_v51 = vld [vmem:[%s5869_s24 + $0x4e0] sm:$0xff] }
 0x206   : > { %v4628_v44 = vpop.eup %4627  ;;  %4647 = vrcp.f32 %v3096_v56  ;;  %v3098_v38 = vadd.f32 1.0, %v4626_v11  ;;  %v7104_v1 = vpop.xlane.xlu0 %2496  ;;  %v3541_v29 = vld [vmem:[%s5869_s24 + $0x4e8] sm:$0xff]  ;;  %v4282_v11 = vmul.f32 -1.442695, %v7007_v20  ;;  %v3546_v20 = vld [vmem:[%s5869_s24 + $0x510] sm:$0xff] }
 0x207   : > { %v4630_v7 = vpop.eup %4629  ;;  %v3772_v63 = vmul.f32 %v4628_v44, %v3530_v13  ;;  %v3773_v55 = vmul.f32 %v4628_v44, %v3531_v14  ;;  %4649 = vrcp.f32 %v3097_v18  ;;  %v3542_v13 = vld [vmem:[%s5869_s24 + $0x4f0] sm:$0xff]  ;;  %v3543_v14 = vld [vmem:[%s5869_s24 + $0x4f8] sm:$0xff]  ;;  %v3544_v18 = vld [vmem:[%s5869_s24 + $0x500] sm:$0xff] }
 0x208   : > { %v4632_v57 = vpop.eup %4631  ;;  %v3774_v5 = vmul.f32 %v4630_v7, %v3532_v39  ;;  %v3775_v4 = vmul.f32 %v4630_v7, %v3533_v43  ;;  %4651 = vrcp.f32 %v3098_v38  ;;  %v7117_v39 = vpop.xlane.xlu1 %2504  ;;  %v4283_v38 = vmul.f32 -1.442695, %v7021_v28 }
 0x209   : > { %v4634_v12 = vpop.eup %4633  ;;  %4015 = vst [vmem:[%s5892_s27 + $0x490] sm:$0xff] %v3772_v63  ;;  %4016 = vst.msk [vmem:[%s5892_s27 + $0x498] sm:$0xff] %vm3869_vm1, %v3773_v55  ;;  %v3099_v48 = vadd.f32 1.0, %v4632_v57  ;;  %4653 = vpow2.f32 %v4277_v45  ;;  %v3545_v45 = vld [vmem:[%s5869_s24 + $0x508] sm:$0xff]  ;;  %v3547_v55 = vld [vmem:[%s5869_s24 + $0x518] sm:$0xff] }
 0x20a   : > { %v4636_v25 = vpop.eup %4635  ;;  %4017 = vst [vmem:[%s5892_s27 + $0x4a0] sm:$0xff] %v3774_v5  ;;  %4018 = vst.msk [vmem:[%s5892_s27 + $0x4a8] sm:$0xff] %vm3869_vm1, %v3775_v4  ;;  %v3100_v31 = vadd.f32 1.0, %v4634_v12  ;;  %4655 = vpow2.f32 %v4278_v34  ;;  %v4284_v57 = vmul.f32 -1.442695, %v7032_v47  ;;  %v3550_v47 = vld [vmem:[%s5869_s24 + $0x530] sm:$0xff] }
 0x20b   : > { %v4638_v35 = vpop.eup %4637  ;;  %4657 = vrcp.f32 %v3099_v48  ;;  %v3101_v40 = vadd.f32 1.0, %v4636_v25  ;;  %v3548_v48 = vld [vmem:[%s5869_s24 + $0x520] sm:$0xff]  ;;  %v3549_v25 = vld [vmem:[%s5869_s24 + $0x528] sm:$0xff]  ;;  %v4285_v28 = vmul.f32 -1.442695, %v7055_v27 }
 0x20c   : > { %v4640_v19 = vpop.eup %4639  ;;  %4659 = vrcp.f32 %v3100_v31  ;;  %v3102_v46 = vadd.f32 1.0, %v4638_v35 }
 0x20d   : > { %v4642_v24 = vpop.eup %4641  ;;  %4661 = vrcp.f32 %v3101_v40  ;;  %v3103_v53 = vadd.f32 1.0, %v4640_v19  ;;  %v3551_v19 = vld [vmem:[%s5869_s24 + $0x538] sm:$0xff] }
 0x20e   : > { %v4644_v21 = vpop.eup %4643  ;;  %4663 = vrcp.f32 %v3102_v46  ;;  %v3104_v10 = vadd.f32 1.0, %v4642_v24  ;;  %v4286_v46 = vmul.f32 -1.442695, %v7064_v37  ;;  %v7137_v24 = vpop.xlane.xlu0 %2512 }
 0x20f   : > { %v4646_v22 = vpop.eup %4645  ;;  %4665 = vrcp.f32 %v3103_v53  ;;  %v3105_v2 = vadd.f32 1.0, %v4644_v21 }
 0x210   : > { %v4648_v58 = vpop.eup %4647  ;;  %4667 = vrcp.f32 %v3104_v10  ;;  %v3106_v62 = vadd.f32 1.0, %v4646_v22  ;;  %v4287_v10 = vmul.f32 -1.442695, %v7081_v8 }
 0x211   : > { %v4650_v36 = vpop.eup %4649  ;;  %v3776_v33 = vmul.f32 %v4648_v58, %v3534_v32  ;;  %v3777_v30 = vmul.f32 %v4648_v58, %v3535_v41  ;;  %4669 = vrcp.f32 %v3105_v2  ;;  %v3552_v32 = vld [vmem:[%s5869_s24 + $0x540] sm:$0xff]  ;;  %v3553_v41 = vld [vmem:[%s5869_s24 + $0x548] sm:$0xff]  ;;  %v3555_v2 = vld [vmem:[%s5869_s24 + $0x558] sm:$0xff]  ;;  %v7151_v58 = vpop.xlane.xlu1 %2520 }
 0x212   : > { %v4652_v54 = vpop.eup %4651  ;;  %v3778_v3 = vmul.f32 %v4650_v36, %v3536_v59  ;;  %v3779_v17 = vmul.f32 %v4650_v36, %v3537_v49  ;;  %4671 = vrcp.f32 %v3106_v62  ;;  %v3554_v49 = vld [vmem:[%s5869_s24 + $0x550] sm:$0xff]  ;;  %v4289_v62 = vmul.f32 -1.442695, %v7091_v16 }
 0x213   : > { %v4654_v23 = vpop.eup %4653  ;;  %4019 = vst [vmem:[%s5892_s27 + $0x4b0] sm:$0xff] %v3776_v33  ;;  %4020 = vst.msk [vmem:[%s5892_s27 + $0x4b8] sm:$0xff] %vm3869_vm1, %v3777_v30  ;;  %v3780_v61 = vmul.f32 %v4652_v54, %v3538_v42  ;;  %v3781_v6 = vmul.f32 %v4652_v54, %v3539_v60  ;;  %4673 = vpow2.f32 %v4279_v15  ;;  %v4288_v15 = vmul.f32 -1.442695, %v7083_v52  ;;  %v3556_v54 = vld [vmem:[%s5869_s24 + $0x560] sm:$0xff] }
 0x214   : > { %v4656_v0 = vpop.eup %4655  ;;  %4021 = vst [vmem:[%s5892_s27 + $0x4c0] sm:$0xff] %v3778_v3  ;;  %4022 = vst.msk [vmem:[%s5892_s27 + $0x4c8] sm:$0xff] %vm3869_vm1, %v3779_v17  ;;  %v3107_v56 = vadd.f32 1.0, %v4654_v23  ;;  %4675 = vpow2.f32 %v4280_v26  ;;  %v3557_v3 = vld [vmem:[%s5869_s24 + $0x568] sm:$0xff]  ;;  %v7168_v23 = vpop.xlane.xlu0 %2528 }
 0x215   : > { %v4658_v43 = vpop.eup %4657  ;;  %4023 = vst [vmem:[%s5892_s27 + $0x4d0] sm:$0xff] %v3780_v61  ;;  %4024 = vst.msk [vmem:[%s5892_s27 + $0x4d8] sm:$0xff] %vm3869_vm1, %v3781_v6  ;;  %v3108_v44 = vadd.f32 1.0, %v4656_v0  ;;  %4677 = vpow2.f32 %v4281_v9  ;;  %v3558_v6 = vld [vmem:[%s5869_s24 + $0x570] sm:$0xff]  ;;  %v4290_v0 = vmul.f32 -1.442695, %v7095_v50 }
 0x216   : > { %v4660_v34 = vpop.eup %4659  ;;  %v3782_v7 = vmul.f32 %v4658_v43, %v3540_v51  ;;  %v3783_v63 = vmul.f32 %v4658_v43, %v3541_v29  ;;  %4679 = vrcp.f32 %v3107_v56  ;;  %v3559_v51 = vld [vmem:[%s5869_s24 + $0x578] sm:$0xff]  ;;  %v4291_v56 = vmul.f32 -1.442695, %v7104_v1 }
 0x217   : > { %v4662_v5 = vpop.eup %4661  ;;  %v3784_v4 = vmul.f32 %v4660_v34, %v3542_v13  ;;  %v3785_v12 = vmul.f32 %v4660_v34, %v3543_v14  ;;  %4681 = vrcp.f32 %v3108_v44 }
 0x218   : > { %v4664_v31 = vpop.eup %4663  ;;  %4025 = vst [vmem:[%s5892_s27 + $0x4e0] sm:$0xff] %v3782_v7  ;;  %4026 = vst.msk [vmem:[%s5892_s27 + $0x4e8] sm:$0xff] %vm3869_vm1, %v3783_v63  ;;  %v3786_v35 = vmul.f32 %v4662_v5, %v3544_v18  ;;  %v3787_v40 = vmul.f32 %v4662_v5, %v3545_v45  ;;  %4683 = vpow2.f32 %v4282_v11  ;;  %v7177_v11 = vpop.xlane.xlu1 %2536 }
 0x219   : > { %v4666_v27 = vpop.eup %4665  ;;  %4027 = vst [vmem:[%s5892_s27 + $0x4f0] sm:$0xff] %v3784_v4  ;;  %4028 = vst.msk [vmem:[%s5892_s27 + $0x4f8] sm:$0xff] %vm3869_vm1, %v3785_v12  ;;  %v3788_v53 = vmul.f32 %v4664_v31, %v3546_v20  ;;  %v3789_v21 = vmul.f32 %v4664_v31, %v3547_v55  ;;  %4685 = vpow2.f32 %v4283_v38  ;;  %v7185_v20 = vpop.xlane.xlu0 %2544  ;;  %v3560_v31 = vld [vmem:[%s5869_s24 + $0x580] sm:$0xff] }
 0x21a   : > { %v4668_v22 = vpop.eup %4667  ;;  %4029 = vst [vmem:[%s5892_s27 + $0x500] sm:$0xff] %v3786_v35  ;;  %4030 = vst.msk [vmem:[%s5892_s27 + $0x508] sm:$0xff] %vm3869_vm1, %v3787_v40  ;;  %v3790_v37 = vmul.f32 %v4666_v27, %v3548_v48  ;;  %v3791_v59 = vmul.f32 %v4666_v27, %v3549_v25  ;;  %4687 = vpow2.f32 %v4284_v57  ;;  %v3561_v35 = vld [vmem:[%s5869_s24 + $0x588] sm:$0xff] }
 0x21b   : > { %v4670_v42 = vpop.eup %4669  ;;  %4031 = vst [vmem:[%s5892_s27 + $0x510] sm:$0xff] %v3788_v53  ;;  %4032 = vst.msk [vmem:[%s5892_s27 + $0x518] sm:$0xff] %vm3869_vm1, %v3789_v21  ;;  %v3792_v8 = vmul.f32 %v4668_v22, %v3550_v47  ;;  %v3793_v60 = vmul.f32 %v4668_v22, %v3551_v19  ;;  %4689 = vpow2.f32 %v4285_v28  ;;  %v3562_v19 = vld [vmem:[%s5869_s24 + $0x590] sm:$0xff]  ;;  %v4292_v53 = vmul.f32 -1.442695, %v7117_v39 }
 0x21c   : > { %v4672_v26 = vpop.eup %4671  ;;  %4033 = vst [vmem:[%s5892_s27 + $0x520] sm:$0xff] %v3790_v37  ;;  %4034 = vst.msk [vmem:[%s5892_s27 + $0x528] sm:$0xff] %vm3869_vm1, %v3791_v59  ;;  %v3794_v52 = vmul.f32 %v4670_v42, %v3552_v32  ;;  %v3795_v36 = vmul.f32 %v4670_v42, %v3553_v41  ;;  %4691 = vpow2.f32 %v4286_v46  ;;  %v3563_v46 = vld [vmem:[%s5869_s24 + $0x598] sm:$0xff]  ;;  %v3564_v32 = vld [vmem:[%s5869_s24 + $0x5a0] sm:$0xff]  ;;  %v4293_v22 = vmul.f32 -1.442695, %v7137_v24 }
 0x21d   : > { %v4674_v33 = vpop.eup %4673  ;;  %4035 = vst [vmem:[%s5892_s27 + $0x530] sm:$0xff] %v3792_v8  ;;  %4036 = vst.msk [vmem:[%s5892_s27 + $0x538] sm:$0xff] %vm3869_vm1, %v3793_v60  ;;  %v3796_v30 = vmul.f32 %v4672_v26, %v3554_v49  ;;  %v3797_v9 = vmul.f32 %v4672_v26, %v3555_v2  ;;  %4693 = vpow2.f32 %v4287_v10  ;;  %v3565_v41 = vld [vmem:[%s5869_s24 + $0x5a8] sm:$0xff] }
 0x21e   : > { %v4676_v16 = vpop.eup %4675  ;;  %4037 = vst [vmem:[%s5892_s27 + $0x540] sm:$0xff] %v3794_v52  ;;  %4038 = vst.msk [vmem:[%s5892_s27 + $0x548] sm:$0xff] %vm3869_vm1, %v3795_v36  ;;  %v3109_v17 = vadd.f32 1.0, %v4674_v33  ;;  %4695 = vpow2.f32 %v4288_v15  ;;  %v7187_v12 = vpop.xlane.xlu1 %2552  ;;  %v4294_v15 = vmul.f32 -1.442695, %v7151_v58  ;;  %v3566_v52 = vld [vmem:[%s5869_s24 + $0x5b0] sm:$0xff] }
 0x21f   : > { %v4678_v61 = vpop.eup %4677  ;;  %4039 = vst [vmem:[%s5892_s27 + $0x550] sm:$0xff] %v3796_v30  ;;  %4040 = vst.msk [vmem:[%s5892_s27 + $0x558] sm:$0xff] %vm3869_vm1, %v3797_v9  ;;  %v3110_v29 = vadd.f32 1.0, %v4676_v16  ;;  %4697 = vpow2.f32 %v4289_v62  ;;  %v3567_v58 = vld [vmem:[%s5869_s24 + $0x5b8] sm:$0xff]  ;;  %v3568_v33 = vld [vmem:[%s5869_s24 + $0x5c0] sm:$0xff] }
 0x220   : > { %v4680_v13 = vpop.eup %4679  ;;  %4699 = vrcp.f32 %v3109_v17  ;;  %v3111_v14 = vadd.f32 1.0, %v4678_v61  ;;  %v3569_v30 = vld [vmem:[%s5869_s24 + $0x5c8] sm:$0xff]  ;;  %v4295_v16 = vmul.f32 -1.442695, %v7168_v23  ;;  %v3571_v17 = vld [vmem:[%s5869_s24 + $0x5d8] sm:$0xff] }
 0x221   : > { %v4682_v43 = vpop.eup %4681  ;;  %v3798_v18 = vmul.f32 %v4680_v13, %v3556_v54  ;;  %v3799_v45 = vmul.f32 %v4680_v13, %v3557_v3  ;;  %4701 = vrcp.f32 %v3110_v29  ;;  %v2561_v37 = vpop.xlane.xlu0 %2560  ;;  %v3570_v3 = vld [vmem:[%s5869_s24 + $0x5d0] sm:$0xff]  ;;  %v3572_v13 = vld [vmem:[%s5869_s24 + $0x5e0] sm:$0xff]  ;;  %v4297_v23 = vmul.f32 -1.442695, %v7185_v20 }
 0x222   : > { %v4684_v44 = vpop.eup %4683  ;;  %v3800_v38 = vmul.f32 %v4682_v43, %v3558_v6  ;;  %v3801_v34 = vmul.f32 %v4682_v43, %v3559_v51  ;;  %4703 = vrcp.f32 %v3111_v14  ;;  %v4296_v6 = vmul.f32 -1.442695, %v7177_v11  ;;  %v3573_v14 = vld [vmem:[%s5869_s24 + $0x5e8] sm:$0xff]  ;;  %v3575_v11 = vld [vmem:[%s5869_s24 + $0x5f8] sm:$0xff] }
 0x223   : > { %v4686_v7 = vpop.eup %4685  ;;  %4041 = vst [vmem:[%s5892_s27 + $0x560] sm:$0xff] %v3798_v18  ;;  %4042 = vst.msk [vmem:[%s5892_s27 + $0x568] sm:$0xff] %vm3869_vm1, %v3799_v45  ;;  %v3112_v50 = vadd.f32 1.0, %v4684_v44  ;;  %4705 = vpow2.f32 %v4290_v0  ;;  %v3574_v44 = vld [vmem:[%s5869_s24 + $0x5f0] sm:$0xff]  ;;  %v4299_v20 = vmul.f32 -1.442695, %v2561_v37 }
 0x224   : > { %v4688_v63 = vpop.eup %4687  ;;  %4043 = vst [vmem:[%s5892_s27 + $0x570] sm:$0xff] %v3800_v38  ;;  %4044 = vst.msk [vmem:[%s5892_s27 + $0x578] sm:$0xff] %vm3869_vm1, %v3801_v34  ;;  %v3113_v1 = vadd.f32 1.0, %v4686_v7  ;;  %4707 = vpow2.f32 %v4291_v56  ;;  %v4298_v38 = vmul.f32 -1.442695, %v7187_v12  ;;  %v3578_v12 = vld [vmem:[%s5869_s24 + $0x610] sm:$0xff] }
 0x225   : > { %v4690_v55 = vpop.eup %4689  ;;  %4709 = vrcp.f32 %v3112_v50  ;;  %v3114_v57 = vadd.f32 1.0, %v4688_v63  ;;  %v3576_v63 = vld [vmem:[%s5869_s24 + $0x600] sm:$0xff] }
 0x226   : > { %v4692_v5 = vpop.eup %4691  ;;  %4711 = vrcp.f32 %v3113_v1  ;;  %v3115_v4 = vadd.f32 1.0, %v4690_v55  ;;  %v3577_v1 = vld [vmem:[%s5869_s24 + $0x608] sm:$0xff] }
 0x227   : > { %v4694_v48 = vpop.eup %4693  ;;  %4713 = vrcp.f32 %v3114_v57  ;;  %v3116_v25 = vadd.f32 1.0, %v4692_v5  ;;  %v2569_v60 = vpop.xlane.xlu1 %2568 }
 0x228   : > { %v4696_v28 = vpop.eup %4695  ;;  %4715 = vrcp.f32 %v3115_v4  ;;  %v3117_v40 = vadd.f32 1.0, %v4694_v48  ;;  %v3579_v48 = vld [vmem:[%s5869_s24 + $0x618] sm:$0xff] }
 0x229   : > { %v4698_v47 = vpop.eup %4697  ;;  %4717 = vrcp.f32 %v3116_v25  ;;  %v3118_v27 = vadd.f32 1.0, %v4696_v28  ;;  %v4300_v25 = vmul.f32 -1.442695, %v2569_v60  ;;  %v3584_v60 = vld [vmem:[%s5869_s24 + $0x640] sm:$0xff] }
 0x22a   : > { %v4700_v21 = vpop.eup %4699  ;;  %4719 = vrcp.f32 %v3117_v40  ;;  %v3119_v10 = vadd.f32 1.0, %v4698_v47  ;;  %v3580_v40 = vld [vmem:[%s5869_s24 + $0x620] sm:$0xff]  ;;  %v3581_v47 = vld [vmem:[%s5869_s24 + $0x628] sm:$0xff] }
 0x22b   : > { %v4702_v59 = vpop.eup %4701  ;;  %v3802_v49 = vmul.f32 %v4700_v21, %v3560_v31  ;;  %v3803_v2 = vmul.f32 %v4700_v21, %v3561_v35  ;;  %4721 = vrcp.f32 %v3118_v27  ;;  %v2577_v56 = vpop.xlane.xlu0 %2576 }
 0x22c   : > { %v4704_v39 = vpop.eup %4703  ;;  %v3804_v42 = vmul.f32 %v4702_v59, %v3562_v19  ;;  %v3805_v8 = vmul.f32 %v4702_v59, %v3563_v46  ;;  %4723 = vrcp.f32 %v3119_v10  ;;  %v4301_v19 = vmul.f32 -1.442695, %v2577_v56 }
 0x22d   : > { %v4706_v62 = vpop.eup %4705  ;;  %4045 = vst [vmem:[%s5892_s27 + $0x580] sm:$0xff] %v3802_v49  ;;  %4046 = vst.msk [vmem:[%s5892_s27 + $0x588] sm:$0xff] %vm3869_vm1, %v3803_v2  ;;  %v3806_v24 = vmul.f32 %v4704_v39, %v3564_v32  ;;  %v3807_v26 = vmul.f32 %v4704_v39, %v3565_v41  ;;  %4725 = vpow2.f32 %v4292_v53  ;;  %v3583_v39 = vld [vmem:[%s5869_s24 + $0x638] sm:$0xff] }
 0x22e   : > { %v4708_v36 = vpop.eup %4707  ;;  %4047 = vst [vmem:[%s5892_s27 + $0x590] sm:$0xff] %v3804_v42  ;;  %4048 = vst.msk [vmem:[%s5892_s27 + $0x598] sm:$0xff] %vm3869_vm1, %v3805_v8  ;;  %v3120_v9 = vadd.f32 1.0, %v4706_v62  ;;  %4727 = vpow2.f32 %v4293_v22  ;;  %v3585_v62 = vld [vmem:[%s5869_s24 + $0x648] sm:$0xff] }
 0x22f   : > { %v4710_v54 = vpop.eup %4709  ;;  %4049 = vst [vmem:[%s5892_s27 + $0x5a0] sm:$0xff] %v3806_v24  ;;  %4050 = vst.msk [vmem:[%s5892_s27 + $0x5a8] sm:$0xff] %vm3869_vm1, %v3807_v26  ;;  %v3121_v61 = vadd.f32 1.0, %v4708_v36  ;;  %4729 = vpow2.f32 %v4294_v15  ;;  %v3582_v15 = vld [vmem:[%s5869_s24 + $0x630] sm:$0xff] }
 0x230   : > { %v4712_v51 = vpop.eup %4711  ;;  %v3808_v29 = vmul.f32 %v4710_v54, %v3566_v52  ;;  %v3809_v0 = vmul.f32 %v4710_v54, %v3567_v58  ;;  %4731 = vrcp.f32 %v3120_v9  ;;  %v2585_v55 = vpop.xlane.xlu1 %2584 }
 0x231   : > { %v4714_v43 = vpop.eup %4713  ;;  %v3810_v18 = vmul.f32 %v4712_v51, %v3568_v33  ;;  %v3811_v45 = vmul.f32 %v4712_v51, %v3569_v30  ;;  %4733 = vrcp.f32 %v3121_v61  ;;  %v4302_v21 = vmul.f32 -1.442695, %v2585_v55 }
 0x232   : > { %v4716_v34 = vpop.eup %4715  ;;  %4051 = vst [vmem:[%s5892_s27 + $0x5b0] sm:$0xff] %v3808_v29  ;;  %4052 = vst.msk [vmem:[%s5892_s27 + $0x5b8] sm:$0xff] %vm3869_vm1, %v3809_v0  ;;  %v3812_v7 = vmul.f32 %v4714_v43, %v3570_v3  ;;  %v3813_v50 = vmul.f32 %v4714_v43, %v3571_v17  ;;  %4735 = vpow2.f32 %v4295_v16 }
 0x233   : > { %v4718_v57 = vpop.eup %4717  ;;  %4053 = vst [vmem:[%s5892_s27 + $0x5c0] sm:$0xff] %v3810_v18  ;;  %4054 = vst.msk [vmem:[%s5892_s27 + $0x5c8] sm:$0xff] %vm3869_vm1, %v3811_v45  ;;  %v3814_v5 = vmul.f32 %v4716_v34, %v3572_v13  ;;  %v3815_v4 = vmul.f32 %v4716_v34, %v3573_v14  ;;  %4737 = vpow2.f32 %v4296_v6  ;;  %v2593_v22 = vpop.xlane.xlu0 %2592 }
 0x234   : > { %v4720_v28 = vpop.eup %4719  ;;  %4055 = vst [vmem:[%s5892_s27 + $0x5d0] sm:$0xff] %v3812_v7  ;;  %4056 = vst.msk [vmem:[%s5892_s27 + $0x5d8] sm:$0xff] %vm3869_vm1, %v3813_v50  ;;  %v3816_v31 = vmul.f32 %v4718_v57, %v3574_v44  ;;  %v3817_v35 = vmul.f32 %v4718_v57, %v3575_v11  ;;  %4739 = vpow2.f32 %v4297_v23  ;;  %v4303_v26 = vmul.f32 -1.442695, %v2593_v22  ;;  %v3586_v44 = vld [vmem:[%s5869_s24 + $0x650] sm:$0xff]  ;;  %v3587_v11 = vld [vmem:[%s5869_s24 + $0x658] sm:$0xff] }
 0x235   : > { %v4722_v46 = vpop.eup %4721  ;;  %4057 = vst [vmem:[%s5892_s27 + $0x5e0] sm:$0xff] %v3814_v5  ;;  %4058 = vst.msk [vmem:[%s5892_s27 + $0x5e8] sm:$0xff] %vm3869_vm1, %v3815_v4  ;;  %v3818_v27 = vmul.f32 %v4720_v28, %v3576_v63  ;;  %v3819_v53 = vmul.f32 %v4720_v28, %v3577_v1  ;;  %4741 = vpow2.f32 %v4298_v38  ;;  %v3588_v50 = vld [vmem:[%s5869_s24 + $0x660] sm:$0xff]  ;;  %v3589_v63 = vld [vmem:[%s5869_s24 + $0x668] sm:$0xff] }
 0x236   : > { %v4724_v32 = vpop.eup %4723  ;;  %4059 = vst [vmem:[%s5892_s27 + $0x5f0] sm:$0xff] %v3816_v31  ;;  %4060 = vst.msk [vmem:[%s5892_s27 + $0x5f8] sm:$0xff] %vm3869_vm1, %v3817_v35  ;;  %v3820_v41 = vmul.f32 %v4722_v46, %v3578_v12  ;;  %v3821_v10 = vmul.f32 %v4722_v46, %v3579_v48  ;;  %4743 = vpow2.f32 %v4299_v20  ;;  %v3590_v57 = vld [vmem:[%s5869_s24 + $0x670] sm:$0xff]  ;;  %v3591_v5 = vld [vmem:[%s5869_s24 + $0x678] sm:$0xff] }
 0x237   : > { %v4726_v37 = vpop.eup %4725  ;;  %4061 = vst [vmem:[%s5892_s27 + $0x600] sm:$0xff] %v3818_v27  ;;  %4062 = vst.msk [vmem:[%s5892_s27 + $0x608] sm:$0xff] %vm3869_vm1, %v3819_v53  ;;  %v3822_v59 = vmul.f32 %v4724_v32, %v3580_v40  ;;  %v3823_v49 = vmul.f32 %v4724_v32, %v3581_v47  ;;  %4745 = vpow2.f32 %v4300_v25  ;;  %v3593_v32 = vld [vmem:[%s5869_s24 + $0x688] sm:$0xff]  ;;  %v3595_v22 = vld [vmem:[%s5869_s24 + $0x698] sm:$0xff] }
 0x238   : > { %v4728_v2 = vpop.eup %4727  ;;  %4063 = vst [vmem:[%s5892_s27 + $0x610] sm:$0xff] %v3820_v41  ;;  %4064 = vst.msk [vmem:[%s5892_s27 + $0x618] sm:$0xff] %vm3869_vm1, %v3821_v10  ;;  %v3122_v42 = vadd.f32 1.0, %v4726_v37  ;;  %4747 = vpow2.f32 %v4301_v19  ;;  %v3594_v10 = vld [vmem:[%s5869_s24 + $0x690] sm:$0xff] }
 0x239   : > { %v4730_v8 = vpop.eup %4729  ;;  %4065 = vst [vmem:[%s5892_s27 + $0x620] sm:$0xff] %v3822_v59  ;;  %4066 = vst.msk [vmem:[%s5892_s27 + $0x628] sm:$0xff] %vm3869_vm1, %v3823_v49  ;;  %v3123_v24 = vadd.f32 1.0, %v4728_v2  ;;  %4749 = vpow2.f32 %v4302_v21  ;;  %v2601_v52 = vpop.xlane.xlu1 %2600  ;;  %v3592_v21 = vld [vmem:[%s5869_s24 + $0x680] sm:$0xff]  ;;  %v3597_v2 = vld [vmem:[%s5869_s24 + $0x6a8] sm:$0xff] }
 0x23a   : > { %v4732_v58 = vpop.eup %4731  ;;  %4751 = vrcp.f32 %v3122_v42  ;;  %v3124_v36 = vadd.f32 1.0, %v4730_v8  ;;  %v4304_v33 = vmul.f32 -1.442695, %v2601_v52  ;;  %v3596_v49 = vld [vmem:[%s5869_s24 + $0x6a0] sm:$0xff] }
 0x23b   : > { %v4734_v30 = vpop.eup %4733  ;;  %v3824_v9 = vmul.f32 %v4732_v58, %v3582_v15  ;;  %v3825_v16 = vmul.f32 %v4732_v58, %v3583_v39  ;;  %4753 = vrcp.f32 %v3123_v24  ;;  %v3600_v58 = vld [vmem:[%s5869_s24 + $0x6c0] sm:$0xff] }
 0x23c   : > { %v4736_v54 = vpop.eup %4735  ;;  %v3826_v3 = vmul.f32 %v4734_v30, %v3584_v60  ;;  %v3827_v17 = vmul.f32 %v4734_v30, %v3585_v62  ;;  %4755 = vrcp.f32 %v3124_v36  ;;  %v3598_v60 = vld [vmem:[%s5869_s24 + $0x6b0] sm:$0xff]  ;;  %v3599_v62 = vld [vmem:[%s5869_s24 + $0x6b8] sm:$0xff]  ;;  %v3601_v36 = vld [vmem:[%s5869_s24 + $0x6c8] sm:$0xff] }
 0x23d   : > { %v4738_v61 = vpop.eup %4737  ;;  %4067 = vst [vmem:[%s5892_s27 + $0x630] sm:$0xff] %v3824_v9  ;;  %4068 = vst.msk [vmem:[%s5892_s27 + $0x638] sm:$0xff] %vm3869_vm1, %v3825_v16  ;;  %v3125_v6 = vadd.f32 1.0, %v4736_v54  ;;  %4757 = vpow2.f32 %v4303_v26  ;;  %v2609_v14 = vpop.xlane.xlu0 %2608  ;;  %v3602_v54 = vld [vmem:[%s5869_s24 + $0x6d0] sm:$0xff] }
 0x23e   : > { %v4740_v51 = vpop.eup %4739  ;;  %4069 = vst [vmem:[%s5892_s27 + $0x640] sm:$0xff] %v3826_v3  ;;  %4070 = vst.msk [vmem:[%s5892_s27 + $0x648] sm:$0xff] %vm3869_vm1, %v3827_v17  ;;  %v3126_v29 = vadd.f32 1.0, %v4738_v61  ;;  %4759 = vpow2.f32 %v4304_v33  ;;  %v4305_v20 = vmul.f32 -1.442695, %v2609_v14  ;;  %v3603_v3 = vld [vmem:[%s5869_s24 + $0x6d8] sm:$0xff] }
 0x23f   : > { %v4742_v0 = vpop.eup %4741  ;;  %4761 = vrcp.f32 %v3125_v6  ;;  %v3127_v13 = vadd.f32 1.0, %v4740_v51 }
 0x240   : > { %v4744_v23 = vpop.eup %4743  ;;  %4763 = vrcp.f32 %v3126_v29  ;;  %v3128_v56 = vadd.f32 1.0, %v4742_v0  ;;  %v3604_v29 = vld [vmem:[%s5869_s24 + $0x6e0] sm:$0xff]  ;;  %v3605_v0 = vld [vmem:[%s5869_s24 + $0x6e8] sm:$0xff] }
 0x241   : > { %v4746_v43 = vpop.eup %4745  ;;  %4765 = vrcp.f32 %v3127_v13  ;;  %v3129_v18 = vadd.f32 1.0, %v4744_v23 }
 0x242   : > { %v4748_v45 = vpop.eup %4747  ;;  %4767 = vrcp.f32 %v3128_v56  ;;  %v3130_v38 = vadd.f32 1.0, %v4746_v43  ;;  %v2617_v34 = vpop.xlane.xlu1 %2616  ;;  %v3606_v56 = vld [vmem:[%s5869_s24 + $0x6f0] sm:$0xff]  ;;  %v3607_v43 = vld [vmem:[%s5869_s24 + $0x6f8] sm:$0xff] }
 0x243   : > { %v4750_v7 = vpop.eup %4749  ;;  %4769 = vrcp.f32 %v3129_v18  ;;  %v3131_v1 = vadd.f32 1.0, %v4748_v45  ;;  %v4306_v12 = vmul.f32 -1.442695, %v2617_v34 }
 0x244   : > { %v4752_v55 = vpop.eup %4751  ;;  %4771 = vrcp.f32 %v3130_v38  ;;  %v3132_v4 = vadd.f32 1.0, %v4750_v7 }
 0x245   : > { %v4754_v48 = vpop.eup %4753  ;;  %v3828_v25 = vmul.f32 %v4752_v55, %v3586_v44  ;;  %v3829_v28 = vmul.f32 %v4752_v55, %v3587_v11  ;;  %4773 = vrcp.f32 %v3131_v1  ;;  %v2625_v31 = vpop.xlane.xlu0 %2624 }
 0x246   : > { %v4756_v35 = vpop.eup %4755  ;;  %v3830_v40 = vmul.f32 %v4754_v48, %v3588_v50  ;;  %v3831_v47 = vmul.f32 %v4754_v48, %v3589_v63  ;;  %4775 = vrcp.f32 %v3132_v4  ;;  %v4307_v19 = vmul.f32 -1.442695, %v2625_v31  ;;  %v3610_v48 = vld [vmem:[%s5869_s24 + $0x710] sm:$0xff] }
 0x247   : > { %v4758_v46 = vpop.eup %4757  ;;  %4071 = vst [vmem:[%s5892_s27 + $0x650] sm:$0xff] %v3828_v25  ;;  %4072 = vst.msk [vmem:[%s5892_s27 + $0x658] sm:$0xff] %vm3869_vm1, %v3829_v28  ;;  %v3832_v27 = vmul.f32 %v4756_v35, %v3590_v57  ;;  %v3833_v53 = vmul.f32 %v4756_v35, %v3591_v5  ;;  %4777 = vpow2.f32 %v4305_v20  ;;  %v3608_v57 = vld [vmem:[%s5869_s24 + $0x700] sm:$0xff]  ;;  %v3609_v5 = vld [vmem:[%s5869_s24 + $0x708] sm:$0xff] }
 0x248   : > { %v4760_v41 = vpop.eup %4759  ;;  %4073 = vst [vmem:[%s5892_s27 + $0x660] sm:$0xff] %v3830_v40  ;;  %4074 = vst.msk [vmem:[%s5892_s27 + $0x668] sm:$0xff] %vm3869_vm1, %v3831_v47  ;;  %v3133_v37 = vadd.f32 1.0, %v4758_v46  ;;  %4779 = vpow2.f32 %v4306_v12  ;;  %v3611_v25 = vld [vmem:[%s5869_s24 + $0x718] sm:$0xff] }
 0x249   : > { %v4762_v59 = vpop.eup %4761  ;;  %4075 = vst [vmem:[%s5892_s27 + $0x670] sm:$0xff] %v3832_v27  ;;  %4076 = vst.msk [vmem:[%s5892_s27 + $0x678] sm:$0xff] %vm3869_vm1, %v3833_v53  ;;  %v3134_v15 = vadd.f32 1.0, %v4760_v41  ;;  %4781 = vpow2.f32 %v4307_v19 }
 0x24a   : > { %v4764_v39 = vpop.eup %4763  ;;  %v3834_v42 = vmul.f32 %v4762_v59, %v3592_v21  ;;  %v3835_v8 = vmul.f32 %v4762_v59, %v3593_v32  ;;  %4783 = vrcp.f32 %v3133_v37  ;;  %v3612_v59 = vld [vmem:[%s5869_s24 + $0x720] sm:$0xff] }
 0x24b   : > { %v4766_v24 = vpop.eup %4765  ;;  %v3836_v26 = vmul.f32 %v4764_v39, %v3594_v10  ;;  %v3837_v52 = vmul.f32 %v4764_v39, %v3595_v22  ;;  %4785 = vrcp.f32 %v3134_v15  ;;  %v2633_v33 = vpop.xlane.xlu1 %2632  ;;  %v3615_v15 = vld [vmem:[%s5869_s24 + $0x738] sm:$0xff] }
 0x24c   : > { %v4768_v30 = vpop.eup %4767  ;;  %4077 = vst [vmem:[%s5892_s27 + $0x680] sm:$0xff] %v3834_v42  ;;  %4078 = vst.msk [vmem:[%s5892_s27 + $0x688] sm:$0xff] %vm3869_vm1, %v3835_v8  ;;  %v3838_v9 = vmul.f32 %v4766_v24, %v3596_v49  ;;  %v3839_v16 = vmul.f32 %v4766_v24, %v3597_v2  ;;  %v4308_v17 = vmul.f32 -1.442695, %v2633_v33  ;;  %v3613_v49 = vld [vmem:[%s5869_s24 + $0x728] sm:$0xff]  ;;  %v3614_v2 = vld [vmem:[%s5869_s24 + $0x730] sm:$0xff] }
 0x24d   : > { %v4770_v61 = vpop.eup %4769  ;;  %4079 = vst [vmem:[%s5892_s27 + $0x690] sm:$0xff] %v3836_v26  ;;  %4080 = vst.msk [vmem:[%s5892_s27 + $0x698] sm:$0xff] %vm3869_vm1, %v3837_v52  ;;  %v3840_v6 = vmul.f32 %v4768_v30, %v3598_v60  ;;  %v3841_v51 = vmul.f32 %v4768_v30, %v3599_v62  ;;  %v3616_v8 = vld [vmem:[%s5869_s24 + $0x740] sm:$0xff]  ;;  %v3617_v60 = vld [vmem:[%s5869_s24 + $0x748] sm:$0xff] }
 0x24e   : > { %v4772_v13 = vpop.eup %4771  ;;  %4081 = vst [vmem:[%s5892_s27 + $0x6a0] sm:$0xff] %v3838_v9  ;;  %4082 = vst.msk [vmem:[%s5892_s27 + $0x6a8] sm:$0xff] %vm3869_vm1, %v3839_v16  ;;  %v3842_v14 = vmul.f32 %v4770_v61, %v3600_v58  ;;  %v3843_v23 = vmul.f32 %v4770_v61, %v3601_v36  ;;  %4787 = vpow2.f32 %v4308_v17 }
 0x24f   : > { %v4774_v18 = vpop.eup %4773  ;;  %4083 = vst [vmem:[%s5892_s27 + $0x6b0] sm:$0xff] %v3840_v6  ;;  %4084 = vst.msk [vmem:[%s5892_s27 + $0x6b8] sm:$0xff] %vm3869_vm1, %v3841_v51  ;;  %v3844_v45 = vmul.f32 %v4772_v13, %v3602_v54  ;;  %v3845_v44 = vmul.f32 %v4772_v13, %v3603_v3  ;;  %v2641_v11 = vpop.xlane.xlu0 %2640  ;;  %v3618_v54 = vld [vmem:[%s5869_s24 + $0x750] sm:$0xff]  ;;  %v3619_v3 = vld [vmem:[%s5869_s24 + $0x758] sm:$0xff] }
 0x250   : > { %v4776_v38 = vpop.eup %4775  ;;  %4085 = vst [vmem:[%s5892_s27 + $0x6c0] sm:$0xff] %v3842_v14  ;;  %4086 = vst.msk [vmem:[%s5892_s27 + $0x6c8] sm:$0xff] %vm3869_vm1, %v3843_v23  ;;  %v3846_v34 = vmul.f32 %v4774_v18, %v3604_v29  ;;  %v3847_v7 = vmul.f32 %v4774_v18, %v3605_v0  ;;  %v4309_v50 = vmul.f32 -1.442695, %v2641_v11  ;;  %v3620_v0 = vld [vmem:[%s5869_s24 + $0x760] sm:$0xff]  ;;  %v3621_v13 = vld [vmem:[%s5869_s24 + $0x768] sm:$0xff] }
 0x251   : > { %v4778_v63 = vpop.eup %4777  ;;  %4087 = vst [vmem:[%s5892_s27 + $0x6d0] sm:$0xff] %v3844_v45  ;;  %4088 = vst.msk [vmem:[%s5892_s27 + $0x6d8] sm:$0xff] %vm3869_vm1, %v3845_v44  ;;  %v3848_v1 = vmul.f32 %v4776_v38, %v3606_v56  ;;  %v3849_v20 = vmul.f32 %v4776_v38, %v3607_v43  ;;  %v3622_v43 = vld [vmem:[%s5869_s24 + $0x770] sm:$0xff]  ;;  %v3623_v18 = vld [vmem:[%s5869_s24 + $0x778] sm:$0xff] }
 0x252   : > { %v4780_v55 = vpop.eup %4779  ;;  %4089 = vst [vmem:[%s5892_s27 + $0x6e0] sm:$0xff] %v3846_v34  ;;  %4090 = vst.msk [vmem:[%s5892_s27 + $0x6e8] sm:$0xff] %vm3869_vm1, %v3847_v7  ;;  %v3135_v4 = vadd.f32 1.0, %v4778_v63  ;;  %4789 = vpow2.f32 %v4309_v50  ;;  %v3624_v38 = vld [vmem:[%s5869_s24 + $0x780] sm:$0xff]  ;;  %v3625_v34 = vld [vmem:[%s5869_s24 + $0x788] sm:$0xff] }
 0x253   : > { %v4782_v12 = vpop.eup %4781  ;;  %4091 = vst [vmem:[%s5892_s27 + $0x6f0] sm:$0xff] %v3848_v1  ;;  %4092 = vst.msk [vmem:[%s5892_s27 + $0x6f8] sm:$0xff] %vm3869_vm1, %v3849_v20  ;;  %v3136_v28 = vadd.f32 1.0, %v4780_v55 }
 0x254   : > { %v4784_v31 = vpop.eup %4783  ;;  %4791 = vrcp.f32 %v3135_v4  ;;  %v3137_v35 = vadd.f32 1.0, %v4782_v12  ;;  %v2649_v40 = vpop.xlane.xlu1 %2648 }
 0x255   : > { %v4786_v47 = vpop.eup %4785  ;;  %v3850_v19 = vmul.f32 %v4784_v31, %v3608_v57  ;;  %v3851_v46 = vmul.f32 %v4784_v31, %v3609_v5  ;;  %4793 = vrcp.f32 %v3136_v28  ;;  %v4310_v27 = vmul.f32 -1.442695, %v2649_v40 }
 0x256   : > { %v3852_v53 = vmul.f32 %v4786_v47, %v3610_v48  ;;  %v3853_v21 = vmul.f32 %v4786_v47, %v3611_v25  ;;  %4795 = vrcp.f32 %v3137_v35 }
 0x257   : > { %4093 = vst [vmem:[%s5892_s27 + $0x700] sm:$0xff] %v3850_v19  ;;  %4094 = vst.msk [vmem:[%s5892_s27 + $0x708] sm:$0xff] %vm3869_vm1, %v3851_v46  ;;  %4797 = vpow2.f32 %v4310_v27  ;;  %v2657_v32 = vpop.xlane.xlu0 %2656 }
 0x258   : > { %v4788_v41 = vpop.eup %4787  ;;  %4095 = vst [vmem:[%s5892_s27 + $0x710] sm:$0xff] %v3852_v53  ;;  %4096 = vst.msk [vmem:[%s5892_s27 + $0x718] sm:$0xff] %vm3869_vm1, %v3853_v21  ;;  %v4311_v10 = vmul.f32 -1.442695, %v2657_v32 }
 0x259   : > { %v3138_v22 = vadd.f32 1.0, %v4788_v41 }
 0x25a   : > { %4799 = vpow2.f32 %v4311_v10 }
 0x25b   : > { %4801 = vrcp.f32 %v3138_v22 }
 0x25c   : > { %v4790_v37 = vpop.eup %4789 }
 0x25d   : > { %v3139_v39 = vadd.f32 1.0, %v4790_v37 }
 0x25e   : > { %v4792_v42 = vpop.eup %4791 }
 0x25f   : > { %v4794_v62 = vpop.eup %4793  ;;  %v3854_v24 = vmul.f32 %v4792_v42, %v3612_v59  ;;  %v3855_v26 = vmul.f32 %v4792_v42, %v3613_v49  ;;  %4803 = vrcp.f32 %v3139_v39 }
 0x260   : > { %v4796_v52 = vpop.eup %4795  ;;  %v3856_v58 = vmul.f32 %v4794_v62, %v3614_v2  ;;  %v3857_v36 = vmul.f32 %v4794_v62, %v3615_v15 }
 0x261   : > { %v4798_v33 = vpop.eup %4797  ;;  %4097 = vst [vmem:[%s5892_s27 + $0x720] sm:$0xff] %v3854_v24  ;;  %4098 = vst.msk [vmem:[%s5892_s27 + $0x728] sm:$0xff] %vm3869_vm1, %v3855_v26  ;;  %v3858_v30 = vmul.f32 %v4796_v52, %v3616_v8  ;;  %v3859_v9 = vmul.f32 %v4796_v52, %v3617_v60 }
 0x262   : > { %4099 = vst [vmem:[%s5892_s27 + $0x730] sm:$0xff] %v3856_v58  ;;  %4100 = vst.msk [vmem:[%s5892_s27 + $0x738] sm:$0xff] %vm3869_vm1, %v3857_v36  ;;  %v3140_v16 = vadd.f32 1.0, %v4798_v33 }
 0x263   : > { %4101 = vst [vmem:[%s5892_s27 + $0x740] sm:$0xff] %v3858_v30  ;;  %4102 = vst.msk [vmem:[%s5892_s27 + $0x748] sm:$0xff] %vm3869_vm1, %v3859_v9 }
 0x264   : > { %v4800_v17 = vpop.eup %4799  ;;  %4805 = vrcp.f32 %v3140_v16 }
 0x265   : > { %v4802_v61 = vpop.eup %4801  ;;  %v3141_v6 = vadd.f32 1.0, %v4800_v17 }
 0x266   : > { %v3860_v51 = vmul.f32 %v4802_v61, %v3618_v54  ;;  %v3861_v29 = vmul.f32 %v4802_v61, %v3619_v3 }
 0x267   : > { %4807 = vrcp.f32 %v3141_v6 }
 0x268   : > { %4103 = vst [vmem:[%s5892_s27 + $0x750] sm:$0xff] %v3860_v51  ;;  %4104 = vst.msk [vmem:[%s5892_s27 + $0x758] sm:$0xff] %vm3869_vm1, %v3861_v29 }
 0x269   : > { %v4804_v14 = vpop.eup %4803 }
 0x26a   : > { %v3862_v23 = vmul.f32 %v4804_v14, %v3620_v0  ;;  %v3863_v56 = vmul.f32 %v4804_v14, %v3621_v13 }
 0x26c   : > { %4105 = vst [vmem:[%s5892_s27 + $0x760] sm:$0xff] %v3862_v23  ;;  %4106 = vst.msk [vmem:[%s5892_s27 + $0x768] sm:$0xff] %vm3869_vm1, %v3863_v56 }
 0x26e   : > { %v4806_v45 = vpop.eup %4805 }
 0x26f   : > { %v3864_v44 = vmul.f32 %v4806_v45, %v3622_v43  ;;  %v3865_v11 = vmul.f32 %v4806_v45, %v3623_v18 }
 0x271   : > { %v4808_v7 = vpop.eup %4807  ;;  %4107 = vst [vmem:[%s5892_s27 + $0x770] sm:$0xff] %v3864_v44  ;;  %4108 = vst.msk [vmem:[%s5892_s27 + $0x778] sm:$0xff] %vm3869_vm1, %v3865_v11 }
 0x272   : > { %v3866_v50 = vmul.f32 %v4808_v7, %v3624_v38  ;;  %v3867_v63 = vmul.f32 %v4808_v7, %v3625_v34 }
 0x274   : > { %4109 = vst [vmem:[%s5892_s27 + $0x780] sm:$0xff] %v3866_v50  ;;  %4110 = vst.msk [vmem:[%s5892_s27 + $0x788] sm:$0xff] %vm3869_vm1, %v3867_v63 }
 0x275 PF: > { %s13_s12 = sadd.s32 1, %s4815_s12  }
 0x276   : > { %p10_p4 = scmp.ge.s32.totalorder %s13_s12, 5  }
 0x278   :  { %12 = sbr.rel (!%p10_p4) target bundleno = 1 (0x1), region = 65 }

</bundles_post_ra>
